<compile_context>
chip_gen: v7x
topology: tpu7x:2x2x1
jax: 0.10.0
libtpu: 0.0.40
codegen_flags: <defaults>
</compile_context>

<pallas_src>
import functools

import jax
import jax.numpy as jnp
from jax.experimental import pallas as pl
from jax.experimental.pallas import tpu as pltpu

EPS = 1e-5


# ----------------------------------------------------------------------------------
# In-kernel helper: per-row BatchNorm (training-mode batch stats over lanes) + ReLU
# ----------------------------------------------------------------------------------
def _bn_relu_rows(y, gamma, beta, inv_n):
    """y: (rows, B*H*W). One-pass stats over the lane axis (= N,H,W), biased variance."""
    s1 = jnp.sum(y, axis=-1, keepdims=True)
    s2 = jnp.sum(y * y, axis=-1, keepdims=True)
    mu = s1 * inv_n
    var = s2 * inv_n - mu * mu
    yhat = (y - mu) * jax.lax.rsqrt(var + EPS)
    return jnp.maximum(gamma * yhat + beta, 0.0)


# ----------------------------------------------------------------------------------
# Fused MDCR kernel
# ----------------------------------------------------------------------------------
def _mdcr_kernel(H, W, rates,
                 x_ref, hh_ref, ww_ref,
                 wdw_ref, bdw_ref, gdw_ref, tdw_ref,
                 ws_ref, bs_ref, gs_ref, ts_ref,
                 wo_ref, bo_ref, go_ref, to_ref,
                 out_ref):
    # x_ref       : (4, Cq, B*H*W) f32 VMEM  -- branch-major input, channels on sublanes
    # hh/ww_ref   : (1, B*H*W) int32 VMEM    -- per-lane row / col index inside each HxW image
    # wdw_ref     : (4, Cq, 9)  f32 VMEM     -- depthwise 3x3 weights per branch / channel
    # bdw/gdw/tdw : (4, Cq, 1)  f32 VMEM     -- conv bias / BN gamma / BN beta per branch
    # ws_ref      : (4, 4) f32 SMEM, bs/gs/ts_ref: (4,) f32 SMEM  -- shared 1x1 (4->4) + BN
    # wo_ref      : (4, C, Cq) f32 VMEM      -- final 1x1 weight, pre-split per out_s channel
    # bo/go/to    : (C, 1) f32 VMEM          -- final conv bias / BN gamma / BN beta
    # out_ref     : (C, B*H*W) f32 VMEM
    _, Cq, BHW = x_ref.shape
    inv_n = 1.0 / float(BHW)            # BN statistics are over (N, H, W)

    hh = hh_ref[...]                    # (1, BHW)
    ww = ww_ref[...]

    # ---- stage 1: per-branch depthwise dilated 3x3 conv (+bias) + BN + ReLU --------------
    ys = []
    for i, d in enumerate(rates):       # 4 branches; dilation is a trace-time constant
        xb = x_ref[i]                   # (Cq, BHW)
        wk = wdw_ref[i]                 # (Cq, 9)
        acc = wk[:, 4:5] * xb           # center tap (ky=kx=1), always in-bounds
        for ky in range(3):
            dy = (ky - 1) * d
            if dy <= -H or dy >= H:     # tap reads only zero padding -> skip at trace time
                continue
            for kx in range(3):
                dx = (kx - 1) * d
                if (dx <= -W or dx >= W) or (dy == 0 and dx == 0):
                    continue
                # output position p needs x[p + dy*W + dx] of the same image, else 0
                t = dy * W + dx
                shifted = pltpu.roll(xb, shift=(-t) % BHW, axis=1)
                conds = []
                if dy > 0:
                    conds.append(hh < H - dy)
                elif dy < 0:
                    conds.append(hh >= -dy)
                if dx > 0:
                    conds.append(ww < W - dx)
                elif dx < 0:
                    conds.append(ww >= -dx)
                ok = conds[0]
                for c in conds[1:]:
                    ok = ok & c
                tap = ky * 3 + kx
                acc = acc + wk[:, tap:tap + 1] * jnp.where(ok, shifted, 0.0)
        acc = acc + bdw_ref[i]          # conv bias, added once (hoisted out of tap loop)
        ys.append(_bn_relu_rows(acc, gdw_ref[i], tdw_ref[i], inv_n))

    # ---- stage 2: shared 1x1 (4->4) mix across branches, vectorized over all groups ------
    # z_co[g, :] is merged channel g*4 + co of the PyTorch module; BN stats are per
    # (group, out-channel), matching one self.out_s call per channel group in training mode.
    zs = []
    for co in range(4):
        z = (ws_ref[co, 0] * ys[0] + ws_ref[co, 1] * ys[1]
             + ws_ref[co, 2] * ys[2] + ws_ref[co, 3] * ys[3] + bs_ref[co])
        zs.append(_bn_relu_rows(z, gs_ref[co], ts_ref[co], inv_n))

    # ---- stage 3: final 1x1 (C->C) conv on the MXU + BN + ReLU ----------------------------
    # The channel regroup is folded into the pre-split weight wo_ref[co] (C, Cq).
    o = jnp.dot(wo_ref[0], zs[0], preferred_element_type=jnp.float32)
    for co in range(1, 4):
        o = o + jnp.dot(wo_ref[co], zs[co], preferred_element_type=jnp.float32)
    o = o + bo_ref[...]
    out_ref[...] = _bn_relu_rows(o, go_ref[...], to_ref[...], inv_n)


# ----------------------------------------------------------------------------------
# MDCR forward (Pallas): one fused pallas_call
# ----------------------------------------------------------------------------------
def mdcr_pallas(x, params, rates):
    B, C, H, W = x.shape
    Cq = C // 4
    HW = H * W
    BHW = B * HW

    # input regroup: (B, C, H, W) -> (4 branches, Cq channels, B*H*W), lane-dense spatial
    x4 = jnp.transpose(x.reshape(B, 4, Cq, HW), (1, 2, 0, 3)).reshape(4, Cq, BHW)

    # per-lane (row, col) indices inside each HxW image (for conv boundary masks)
    hh = jnp.tile(jnp.repeat(jnp.arange(H, dtype=jnp.int32), W), B)[None, :]
    ww = jnp.tile(jnp.arange(W, dtype=jnp.int32), B * H)[None, :]

    blocks = params["blocks"]
    wdw = jnp.stack([blocks[i]["w"] for i in range(4)])                  # (4, Cq, 9)
    bdw = jnp.stack([blocks[i]["b"] for i in range(4)])[..., None]       # (4, Cq, 1)
    gdw = jnp.stack([blocks[i]["gamma"] for i in range(4)])[..., None]
    tdw = jnp.stack([blocks[i]["beta"] for i in range(4)])[..., None]

    ps, po = params["out_s"], params["out"]
    # Final 1x1 weight regrouped: block co holds the weight columns for merged channels
    # {g*4 + co : g in 0..Cq-1}, so the kernel never permutes activations.
    wo_split = jnp.transpose(po["w"].reshape(C, Cq, 4), (2, 0, 1))       # (4, C, Cq)

    vmem = pl.BlockSpec(memory_space=pltpu.MemorySpace.VMEM)
    smem = pl.BlockSpec(memory_space=pltpu.MemorySpace.SMEM)

    out2d = pl.pallas_call(
        functools.partial(_mdcr_kernel, H, W, tuple(rates)),
        out_shape=jax.ShapeDtypeStruct((C, BHW), jnp.float32),
        in_specs=[vmem, vmem, vmem,            # x4, hh, ww
                  vmem, vmem, vmem, vmem,      # depthwise params
                  smem, smem, smem, smem,      # out_s params (read as scalars)
                  vmem, vmem, vmem, vmem],     # final-conv params
        out_specs=vmem,
    )(x4, hh, ww,
      wdw, bdw, gdw, tdw,
      ps["w"], ps["b"], ps["gamma"], ps["beta"],
      wo_split, po["b"][:, None], po["gamma"][:, None], po["beta"][:, None])

    # (C, B*H*W) -> (B, C, H, W)
    return jnp.transpose(out2d.reshape(C, B, H, W), (1, 0, 2, 3))


# ----------------------------------------------------------------------------------
# Pure-JAX reference (for verification)
# ----------------------------------------------------------------------------------
def _bn_relu_ref(y, gamma, beta):
    mu = jnp.mean(y, axis=(0, 2, 3), keepdims=True)
    var = jnp.mean((y - mu) ** 2, axis=(0, 2, 3), keepdims=True)
    yhat = (y - mu) * jax.lax.rsqrt(var + EPS)
    return jnp.maximum(gamma.reshape(1, -1, 1, 1) * yhat + beta.reshape(1, -1, 1, 1), 0.0)


def mdcr_reference(x, params, rates):
    B, C, H, W = x.shape
    Cq = C // 4
    chunks = [x[:, i * Cq:(i + 1) * Cq] for i in range(4)]
    ys = []
    for i, d in enumerate(rates):
        p = params["blocks"][i]
        w = p["w"].reshape(Cq, 1, 3, 3)
        y = jax.lax.conv_general_dilated(
            chunks[i], w, window_strides=(1, 1), padding=[(d, d), (d, d)],
            rhs_dilation=(d, d), dimension_numbers=("NCHW", "OIHW", "NCHW"),
            feature_group_count=Cq)
        y = y + p["b"].reshape(1, Cq, 1, 1)
        ys.append(_bn_relu_ref(y, p["gamma"], p["beta"]))
    ps = params["out_s"]
    groups = []
    for g in range(Cq):
        xg = jnp.stack([ys[k][:, g] for k in range(4)], axis=1)  # (B,4,H,W)
        yg = jnp.einsum("oc,bchw->bohw", ps["w"], xg) + ps["b"].reshape(1, 4, 1, 1)
        groups.append(_bn_relu_ref(yg, ps["gamma"], ps["beta"]))
    merged = jnp.concatenate(groups, axis=1)
    po = params["out"]
    yo = jnp.einsum("oc,bchw->bohw", po["w"], merged) + po["b"].reshape(1, -1, 1, 1)
    return _bn_relu_ref(yo, po["gamma"], po["beta"])


# ----------------------------------------------------------------------------------
# Deterministic parameter init (synthetic weights; shapes from MDCR.__init__)
# ----------------------------------------------------------------------------------
def init_params(key, in_features, out_features):
    Cq = in_features // 4
    assert out_features // 4 == Cq, "demo assumes in_features == out_features"
    keys = jax.random.split(key, 16)
    params = {"blocks": []}
    for i in range(4):
        k0, k1, k2, k3 = jax.random.split(keys[i], 4)
        params["blocks"].append(dict(
            w=0.3 * jax.random.normal(k0, (Cq, 9), jnp.float32),     # depthwise (Cq,1,3,3) flat
            b=0.1 * jax.random.normal(k1, (Cq,), jnp.float32),
            gamma=1.0 + 0.1 * jax.random.normal(k2, (Cq,), jnp.float32),
            beta=0.1 * jax.random.normal(k3, (Cq,), jnp.float32),
        ))
    k0, k1, k2, k3 = jax.random.split(keys[4], 4)
    params["out_s"] = dict(
        w=0.3 * jax.random.normal(k0, (4, 4), jnp.float32),
        b=0.1 * jax.random.normal(k1, (4,), jnp.float32),
        gamma=1.0 + 0.1 * jax.random.normal(k2, (4,), jnp.float32),
        beta=0.1 * jax.random.normal(k3, (4,), jnp.float32),
    )
    C = out_features
    k0, k1, k2, k3 = jax.random.split(keys[5], 4)
    params["out"] = dict(
        w=0.2 * jax.random.normal(k0, (C, C), jnp.float32),
        b=0.1 * jax.random.normal(k1, (C,), jnp.float32),
        gamma=1.0 + 0.1 * jax.random.normal(k2, (C,), jnp.float32),
        beta=0.1 * jax.random.normal(k3, (C,), jnp.float32),
    )
    return params


if __name__ == "__main__":
    key = jax.random.PRNGKey(0)
    in_features = out_features = 16
    B, H, W = 2, 16, 16
    rates = (1, 6, 12, 18)

    k_x, k_p = jax.random.split(key)
    x = jax.random.normal(k_x, (B, in_features, H, W), jnp.float32)
    params = init_params(k_p, in_features, out_features)

    fwd = jax.jit(lambda xx: mdcr_pallas(xx, params, rates))
    out = jax.block_until_ready(fwd(x))

    ref = mdcr_reference(x, params, rates)
    err = float(jnp.max(jnp.abs(out - ref)))
    # tolerance covers MXU vs XLA matmul rounding-mode differences at f32
    if not bool(jnp.allclose(out, ref, atol=5e-3, rtol=5e-3)):
        raise SystemExit(f"mismatch vs JAX reference, max abs err = {err}")
    print("KERNEL_OK")
</pallas_src>

<mosaic_0001>
module attributes {stable_mosaic.version = 11 : i64} {
  func.func @_mdcr_kernel(%arg0: memref<4x4x512xf32, #tpu.memory_space<vmem>>, %arg1: memref<1x512xi32, #tpu.memory_space<vmem>>, %arg2: memref<1x512xi32, #tpu.memory_space<vmem>>, %arg3: memref<4x4x9xf32, #tpu.memory_space<vmem>>, %arg4: memref<4x4x1xf32, #tpu.memory_space<vmem>>, %arg5: memref<4x4x1xf32, #tpu.memory_space<vmem>>, %arg6: memref<4x4x1xf32, #tpu.memory_space<vmem>>, %arg7: memref<4x4xf32, #tpu.memory_space<smem>>, %arg8: memref<4xf32, #tpu.memory_space<smem>>, %arg9: memref<4xf32, #tpu.memory_space<smem>>, %arg10: memref<4xf32, #tpu.memory_space<smem>>, %arg11: memref<4x16x4xf32, #tpu.memory_space<vmem>>, %arg12: memref<16x1xf32, #tpu.memory_space<vmem>>, %arg13: memref<16x1xf32, #tpu.memory_space<vmem>>, %arg14: memref<16x1xf32, #tpu.memory_space<vmem>>, %arg15: memref<16x512xf32, #tpu.memory_space<vmem>>) attributes {dimension_semantics = [], scalar_prefetch = 0 : i64, scratch_operands = 0 : i64, tpu.core_type = #tpu.core_type<tc>} {
    %c0 = arith.constant 0 : index
    %c0_0 = arith.constant 0 : index
    %0 = vector.load %arg1[%c0, %c0_0] : memref<1x512xi32, #tpu.memory_space<vmem>>, vector<1x512xi32>
    %c0_1 = arith.constant 0 : index
    %c0_2 = arith.constant 0 : index
    %1 = vector.load %arg2[%c0_1, %c0_2] : memref<1x512xi32, #tpu.memory_space<vmem>>, vector<1x512xi32>
    %c0_3 = arith.constant 0 : index
    %c0_4 = arith.constant 0 : index
    %c0_5 = arith.constant 0 : index
    %2 = vector.load %arg0[%c0_3, %c0_4, %c0_5] : memref<4x4x512xf32, #tpu.memory_space<vmem>>, vector<1x4x512xf32>
    %3 = vector.shape_cast %2 : vector<1x4x512xf32> to vector<4x512xf32>
    %c0_6 = arith.constant 0 : index
    %c0_7 = arith.constant 0 : index
    %c0_8 = arith.constant 0 : index
    %4 = vector.load %arg3[%c0_6, %c0_7, %c0_8] : memref<4x4x9xf32, #tpu.memory_space<vmem>>, vector<1x4x9xf32>
    %5 = vector.shape_cast %4 : vector<1x4x9xf32> to vector<4x9xf32>
    %6 = vector.extract_strided_slice %5 {offsets = [0, 4], sizes = [4, 1], strides = [1, 1]} : vector<4x9xf32> to vector<4x1xf32>
    %7 = vector.broadcast %6 : vector<4x1xf32> to vector<4x512xf32>
    %8 = arith.mulf %7, %3 : vector<4x512xf32>
    %c17_i32 = arith.constant 17 : i32
    %9 = tpu.dynamic_rotate %3 by %c17_i32 dim 1 : vector<4x512xf32>, i32 -> vector<4x512xf32>
    %c1_i32 = arith.constant 1 : i32
    %10 = vector.broadcast %c1_i32 : i32 to vector<1x512xi32>
    %11 = arith.cmpi sge, %0, %10 : vector<1x512xi32>
    %c1_i32_9 = arith.constant 1 : i32
    %12 = vector.broadcast %c1_i32_9 : i32 to vector<1x512xi32>
    %13 = arith.cmpi sge, %1, %12 : vector<1x512xi32>
    %14 = arith.andi %11, %13 : vector<1x512xi1>
    %15 = vector.extract_strided_slice %5 {offsets = [0, 0], sizes = [4, 1], strides = [1, 1]} : vector<4x9xf32> to vector<4x1xf32>
    %cst = arith.constant 0.000000e+00 : f32
    %16 = vector.shape_cast %14 : vector<1x512xi1> to vector<1x512xi1>
    %17 = vector.broadcast %16 : vector<1x512xi1> to vector<4x512xi1>
    %18 = vector.broadcast %cst : f32 to vector<4x512xf32>
    %19 = arith.select %17, %9, %18 : vector<4x512xi1>, vector<4x512xf32>
    %20 = vector.broadcast %15 : vector<4x1xf32> to vector<4x512xf32>
    %21 = arith.mulf %20, %19 : vector<4x512xf32>
    %22 = arith.addf %8, %21 : vector<4x512xf32>
    %c16_i32 = arith.constant 16 : i32
    %23 = tpu.dynamic_rotate %3 by %c16_i32 dim 1 : vector<4x512xf32>, i32 -> vector<4x512xf32>
    %c1_i32_10 = arith.constant 1 : i32
    %24 = vector.broadcast %c1_i32_10 : i32 to vector<1x512xi32>
    %25 = arith.cmpi sge, %0, %24 : vector<1x512xi32>
    %26 = vector.extract_strided_slice %5 {offsets = [0, 1], sizes = [4, 1], strides = [1, 1]} : vector<4x9xf32> to vector<4x1xf32>
    %cst_11 = arith.constant 0.000000e+00 : f32
    %27 = vector.shape_cast %25 : vector<1x512xi1> to vector<1x512xi1>
    %28 = vector.broadcast %27 : vector<1x512xi1> to vector<4x512xi1>
    %29 = vector.broadcast %cst_11 : f32 to vector<4x512xf32>
    %30 = arith.select %28, %23, %29 : vector<4x512xi1>, vector<4x512xf32>
    %31 = vector.broadcast %26 : vector<4x1xf32> to vector<4x512xf32>
    %32 = arith.mulf %31, %30 : vector<4x512xf32>
    %33 = arith.addf %22, %32 : vector<4x512xf32>
    %c15_i32 = arith.constant 15 : i32
    %34 = tpu.dynamic_rotate %3 by %c15_i32 dim 1 : vector<4x512xf32>, i32 -> vector<4x512xf32>
    %c1_i32_12 = arith.constant 1 : i32
    %35 = vector.broadcast %c1_i32_12 : i32 to vector<1x512xi32>
    %36 = arith.cmpi sge, %0, %35 : vector<1x512xi32>
    %c15_i32_13 = arith.constant 15 : i32
    %37 = vector.broadcast %c15_i32_13 : i32 to vector<1x512xi32>
    %38 = arith.cmpi slt, %1, %37 : vector<1x512xi32>
    %39 = arith.andi %36, %38 : vector<1x512xi1>
    %40 = vector.extract_strided_slice %5 {offsets = [0, 2], sizes = [4, 1], strides = [1, 1]} : vector<4x9xf32> to vector<4x1xf32>
    %cst_14 = arith.constant 0.000000e+00 : f32
    %41 = vector.shape_cast %39 : vector<1x512xi1> to vector<1x512xi1>
    %42 = vector.broadcast %41 : vector<1x512xi1> to vector<4x512xi1>
    %43 = vector.broadcast %cst_14 : f32 to vector<4x512xf32>
    %44 = arith.select %42, %34, %43 : vector<4x512xi1>, vector<4x512xf32>
    %45 = vector.broadcast %40 : vector<4x1xf32> to vector<4x512xf32>
    %46 = arith.mulf %45, %44 : vector<4x512xf32>
    %47 = arith.addf %33, %46 : vector<4x512xf32>
    %c1_i32_15 = arith.constant 1 : i32
    %48 = tpu.dynamic_rotate %3 by %c1_i32_15 dim 1 : vector<4x512xf32>, i32 -> vector<4x512xf32>
    %c1_i32_16 = arith.constant 1 : i32
    %49 = vector.broadcast %c1_i32_16 : i32 to vector<1x512xi32>
    %50 = arith.cmpi sge, %1, %49 : vector<1x512xi32>
    %51 = vector.extract_strided_slice %5 {offsets = [0, 3], sizes = [4, 1], strides = [1, 1]} : vector<4x9xf32> to vector<4x1xf32>
    %cst_17 = arith.constant 0.000000e+00 : f32
    %52 = vector.shape_cast %50 : vector<1x512xi1> to vector<1x512xi1>
    %53 = vector.broadcast %52 : vector<1x512xi1> to vector<4x512xi1>
    %54 = vector.broadcast %cst_17 : f32 to vector<4x512xf32>
    %55 = arith.select %53, %48, %54 : vector<4x512xi1>, vector<4x512xf32>
    %56 = vector.broadcast %51 : vector<4x1xf32> to vector<4x512xf32>
    %57 = arith.mulf %56, %55 : vector<4x512xf32>
    %58 = arith.addf %47, %57 : vector<4x512xf32>
    %c511_i32 = arith.constant 511 : i32
    %59 = tpu.dynamic_rotate %3 by %c511_i32 dim 1 : vector<4x512xf32>, i32 -> vector<4x512xf32>
    %c15_i32_18 = arith.constant 15 : i32
    %60 = vector.broadcast %c15_i32_18 : i32 to vector<1x512xi32>
    %61 = arith.cmpi slt, %1, %60 : vector<1x512xi32>
    %62 = vector.extract_strided_slice %5 {offsets = [0, 5], sizes = [4, 1], strides = [1, 1]} : vector<4x9xf32> to vector<4x1xf32>
    %cst_19 = arith.constant 0.000000e+00 : f32
    %63 = vector.shape_cast %61 : vector<1x512xi1> to vector<1x512xi1>
    %64 = vector.broadcast %63 : vector<1x512xi1> to vector<4x512xi1>
    %65 = vector.broadcast %cst_19 : f32 to vector<4x512xf32>
    %66 = arith.select %64, %59, %65 : vector<4x512xi1>, vector<4x512xf32>
    %67 = vector.broadcast %62 : vector<4x1xf32> to vector<4x512xf32>
    %68 = arith.mulf %67, %66 : vector<4x512xf32>
    %69 = arith.addf %58, %68 : vector<4x512xf32>
    %c497_i32 = arith.constant 497 : i32
    %70 = tpu.dynamic_rotate %3 by %c497_i32 dim 1 : vector<4x512xf32>, i32 -> vector<4x512xf32>
    %c15_i32_20 = arith.constant 15 : i32
    %71 = vector.broadcast %c15_i32_20 : i32 to vector<1x512xi32>
    %72 = arith.cmpi slt, %0, %71 : vector<1x512xi32>
    %c1_i32_21 = arith.constant 1 : i32
    %73 = vector.broadcast %c1_i32_21 : i32 to vector<1x512xi32>
    %74 = arith.cmpi sge, %1, %73 : vector<1x512xi32>
    %75 = arith.andi %72, %74 : vector<1x512xi1>
    %76 = vector.extract_strided_slice %5 {offsets = [0, 6], sizes = [4, 1], strides = [1, 1]} : vector<4x9xf32> to vector<4x1xf32>
    %cst_22 = arith.constant 0.000000e+00 : f32
    %77 = vector.shape_cast %75 : vector<1x512xi1> to vector<1x512xi1>
    %78 = vector.broadcast %77 : vector<1x512xi1> to vector<4x512xi1>
    %79 = vector.broadcast %cst_22 : f32 to vector<4x512xf32>
    %80 = arith.select %78, %70, %79 : vector<4x512xi1>, vector<4x512xf32>
    %81 = vector.broadcast %76 : vector<4x1xf32> to vector<4x512xf32>
    %82 = arith.mulf %81, %80 : vector<4x512xf32>
    %83 = arith.addf %69, %82 : vector<4x512xf32>
    %c496_i32 = arith.constant 496 : i32
    %84 = tpu.dynamic_rotate %3 by %c496_i32 dim 1 : vector<4x512xf32>, i32 -> vector<4x512xf32>
    %c15_i32_23 = arith.constant 15 : i32
    %85 = vector.broadcast %c15_i32_23 : i32 to vector<1x512xi32>
    %86 = arith.cmpi slt, %0, %85 : vector<1x512xi32>
    %87 = vector.extract_strided_slice %5 {offsets = [0, 7], sizes = [4, 1], strides = [1, 1]} : vector<4x9xf32> to vector<4x1xf32>
    %cst_24 = arith.constant 0.000000e+00 : f32
    %88 = vector.shape_cast %86 : vector<1x512xi1> to vector<1x512xi1>
    %89 = vector.broadcast %88 : vector<1x512xi1> to vector<4x512xi1>
    %90 = vector.broadcast %cst_24 : f32 to vector<4x512xf32>
    %91 = arith.select %89, %84, %90 : vector<4x512xi1>, vector<4x512xf32>
    %92 = vector.broadcast %87 : vector<4x1xf32> to vector<4x512xf32>
    %93 = arith.mulf %92, %91 : vector<4x512xf32>
    %94 = arith.addf %83, %93 : vector<4x512xf32>
    %c495_i32 = arith.constant 495 : i32
    %95 = tpu.dynamic_rotate %3 by %c495_i32 dim 1 : vector<4x512xf32>, i32 -> vector<4x512xf32>
    %c15_i32_25 = arith.constant 15 : i32
    %96 = vector.broadcast %c15_i32_25 : i32 to vector<1x512xi32>
    %97 = arith.cmpi slt, %0, %96 : vector<1x512xi32>
    %c15_i32_26 = arith.constant 15 : i32
    %98 = vector.broadcast %c15_i32_26 : i32 to vector<1x512xi32>
    %99 = arith.cmpi slt, %1, %98 : vector<1x512xi32>
    %100 = arith.andi %97, %99 : vector<1x512xi1>
    %101 = vector.extract_strided_slice %5 {offsets = [0, 8], sizes = [4, 1], strides = [1, 1]} : vector<4x9xf32> to vector<4x1xf32>
    %cst_27 = arith.constant 0.000000e+00 : f32
    %102 = vector.shape_cast %100 : vector<1x512xi1> to vector<1x512xi1>
    %103 = vector.broadcast %102 : vector<1x512xi1> to vector<4x512xi1>
    %104 = vector.broadcast %cst_27 : f32 to vector<4x512xf32>
    %105 = arith.select %103, %95, %104 : vector<4x512xi1>, vector<4x512xf32>
    %106 = vector.broadcast %101 : vector<4x1xf32> to vector<4x512xf32>
    %107 = arith.mulf %106, %105 : vector<4x512xf32>
    %108 = arith.addf %94, %107 : vector<4x512xf32>
    %c0_28 = arith.constant 0 : index
    %c0_29 = arith.constant 0 : index
    %c0_30 = arith.constant 0 : index
    %109 = vector.load %arg4[%c0_28, %c0_29, %c0_30] : memref<4x4x1xf32, #tpu.memory_space<vmem>>, vector<1x4x1xf32>
    %110 = vector.shape_cast %109 : vector<1x4x1xf32> to vector<4x1xf32>
    %111 = vector.broadcast %110 : vector<4x1xf32> to vector<4x512xf32>
    %112 = arith.addf %108, %111 : vector<4x512xf32>
    %c0_31 = arith.constant 0 : index
    %c0_32 = arith.constant 0 : index
    %c0_33 = arith.constant 0 : index
    %113 = vector.load %arg5[%c0_31, %c0_32, %c0_33] : memref<4x4x1xf32, #tpu.memory_space<vmem>>, vector<1x4x1xf32>
    %114 = vector.shape_cast %113 : vector<1x4x1xf32> to vector<4x1xf32>
    %c0_34 = arith.constant 0 : index
    %c0_35 = arith.constant 0 : index
    %c0_36 = arith.constant 0 : index
    %115 = vector.load %arg6[%c0_34, %c0_35, %c0_36] : memref<4x4x1xf32, #tpu.memory_space<vmem>>, vector<1x4x1xf32>
    %116 = vector.shape_cast %115 : vector<1x4x1xf32> to vector<4x1xf32>
    %cst_37 = arith.constant dense<0.000000e+00> : vector<4xf32>
    %117 = vector.multi_reduction <add>, %112, %cst_37 [1] : vector<4x512xf32> to vector<4xf32>
    %118 = vector.shape_cast %117 : vector<4xf32> to vector<4x1xf32>
    %119 = arith.mulf %112, %112 : vector<4x512xf32>
    %cst_38 = arith.constant dense<0.000000e+00> : vector<4xf32>
    %120 = vector.multi_reduction <add>, %119, %cst_38 [1] : vector<4x512xf32> to vector<4xf32>
    %121 = vector.shape_cast %120 : vector<4xf32> to vector<4x1xf32>
    %cst_39 = arith.constant 0.001953125 : f32
    %122 = vector.broadcast %cst_39 : f32 to vector<4x1xf32>
    %123 = arith.mulf %118, %122 : vector<4x1xf32>
    %cst_40 = arith.constant 0.001953125 : f32
    %124 = vector.broadcast %cst_40 : f32 to vector<4x1xf32>
    %125 = arith.mulf %121, %124 : vector<4x1xf32>
    %126 = arith.mulf %123, %123 : vector<4x1xf32>
    %127 = arith.subf %125, %126 : vector<4x1xf32>
    %128 = vector.broadcast %123 : vector<4x1xf32> to vector<4x512xf32>
    %129 = arith.subf %112, %128 : vector<4x512xf32>
    %cst_41 = arith.constant 9.99999974E-6 : f32
    %130 = vector.broadcast %cst_41 : f32 to vector<4x1xf32>
    %131 = arith.addf %127, %130 : vector<4x1xf32>
    %132 = math.rsqrt %131 : vector<4x1xf32>
    %133 = vector.broadcast %132 : vector<4x1xf32> to vector<4x512xf32>
    %134 = arith.mulf %129, %133 : vector<4x512xf32>
    %135 = vector.broadcast %114 : vector<4x1xf32> to vector<4x512xf32>
    %136 = arith.mulf %135, %134 : vector<4x512xf32>
    %137 = vector.broadcast %116 : vector<4x1xf32> to vector<4x512xf32>
    %138 = arith.addf %136, %137 : vector<4x512xf32>
    %cst_42 = arith.constant 0.000000e+00 : f32
    %139 = vector.broadcast %cst_42 : f32 to vector<4x512xf32>
    %140 = arith.maximumf %138, %139 : vector<4x512xf32>
    %c1 = arith.constant 1 : index
    %c0_43 = arith.constant 0 : index
    %c0_44 = arith.constant 0 : index
    %141 = vector.load %arg0[%c1, %c0_43, %c0_44] : memref<4x4x512xf32, #tpu.memory_space<vmem>>, vector<1x4x512xf32>
    %142 = vector.shape_cast %141 : vector<1x4x512xf32> to vector<4x512xf32>
    %c1_45 = arith.constant 1 : index
    %c0_46 = arith.constant 0 : index
    %c0_47 = arith.constant 0 : index
    %143 = vector.load %arg3[%c1_45, %c0_46, %c0_47] : memref<4x4x9xf32, #tpu.memory_space<vmem>>, vector<1x4x9xf32>
    %144 = vector.shape_cast %143 : vector<1x4x9xf32> to vector<4x9xf32>
    %145 = vector.extract_strided_slice %144 {offsets = [0, 4], sizes = [4, 1], strides = [1, 1]} : vector<4x9xf32> to vector<4x1xf32>
    %146 = vector.broadcast %145 : vector<4x1xf32> to vector<4x512xf32>
    %147 = arith.mulf %146, %142 : vector<4x512xf32>
    %c102_i32 = arith.constant 102 : i32
    %148 = tpu.dynamic_rotate %142 by %c102_i32 dim 1 : vector<4x512xf32>, i32 -> vector<4x512xf32>
    %c6_i32 = arith.constant 6 : i32
    %149 = vector.broadcast %c6_i32 : i32 to vector<1x512xi32>
    %150 = arith.cmpi sge, %0, %149 : vector<1x512xi32>
    %c6_i32_48 = arith.constant 6 : i32
    %151 = vector.broadcast %c6_i32_48 : i32 to vector<1x512xi32>
    %152 = arith.cmpi sge, %1, %151 : vector<1x512xi32>
    %153 = arith.andi %150, %152 : vector<1x512xi1>
    %154 = vector.extract_strided_slice %144 {offsets = [0, 0], sizes = [4, 1], strides = [1, 1]} : vector<4x9xf32> to vector<4x1xf32>
    %cst_49 = arith.constant 0.000000e+00 : f32
    %155 = vector.shape_cast %153 : vector<1x512xi1> to vector<1x512xi1>
    %156 = vector.broadcast %155 : vector<1x512xi1> to vector<4x512xi1>
    %157 = vector.broadcast %cst_49 : f32 to vector<4x512xf32>
    %158 = arith.select %156, %148, %157 : vector<4x512xi1>, vector<4x512xf32>
    %159 = vector.broadcast %154 : vector<4x1xf32> to vector<4x512xf32>
    %160 = arith.mulf %159, %158 : vector<4x512xf32>
    %161 = arith.addf %147, %160 : vector<4x512xf32>
    %c96_i32 = arith.constant 96 : i32
    %162 = tpu.dynamic_rotate %142 by %c96_i32 dim 1 : vector<4x512xf32>, i32 -> vector<4x512xf32>
    %c6_i32_50 = arith.constant 6 : i32
    %163 = vector.broadcast %c6_i32_50 : i32 to vector<1x512xi32>
    %164 = arith.cmpi sge, %0, %163 : vector<1x512xi32>
    %165 = vector.extract_strided_slice %144 {offsets = [0, 1], sizes = [4, 1], strides = [1, 1]} : vector<4x9xf32> to vector<4x1xf32>
    %cst_51 = arith.constant 0.000000e+00 : f32
    %166 = vector.shape_cast %164 : vector<1x512xi1> to vector<1x512xi1>
    %167 = vector.broadcast %166 : vector<1x512xi1> to vector<4x512xi1>
    %168 = vector.broadcast %cst_51 : f32 to vector<4x512xf32>
    %169 = arith.select %167, %162, %168 : vector<4x512xi1>, vector<4x512xf32>
    %170 = vector.broadcast %165 : vector<4x1xf32> to vector<4x512xf32>
    %171 = arith.mulf %170, %169 : vector<4x512xf32>
    %172 = arith.addf %161, %171 : vector<4x512xf32>
    %c90_i32 = arith.constant 90 : i32
    %173 = tpu.dynamic_rotate %142 by %c90_i32 dim 1 : vector<4x512xf32>, i32 -> vector<4x512xf32>
    %c6_i32_52 = arith.constant 6 : i32
    %174 = vector.broadcast %c6_i32_52 : i32 to vector<1x512xi32>
    %175 = arith.cmpi sge, %0, %174 : vector<1x512xi32>
    %c10_i32 = arith.constant 10 : i32
    %176 = vector.broadcast %c10_i32 : i32 to vector<1x512xi32>
    %177 = arith.cmpi slt, %1, %176 : vector<1x512xi32>
    %178 = arith.andi %175, %177 : vector<1x512xi1>
    %179 = vector.extract_strided_slice %144 {offsets = [0, 2], sizes = [4, 1], strides = [1, 1]} : vector<4x9xf32> to vector<4x1xf32>
    %cst_53 = arith.constant 0.000000e+00 : f32
    %180 = vector.shape_cast %178 : vector<1x512xi1> to vector<1x512xi1>
    %181 = vector.broadcast %180 : vector<1x512xi1> to vector<4x512xi1>
    %182 = vector.broadcast %cst_53 : f32 to vector<4x512xf32>
    %183 = arith.select %181, %173, %182 : vector<4x512xi1>, vector<4x512xf32>
    %184 = vector.broadcast %179 : vector<4x1xf32> to vector<4x512xf32>
    %185 = arith.mulf %184, %183 : vector<4x512xf32>
    %186 = arith.addf %172, %185 : vector<4x512xf32>
    %c6_i32_54 = arith.constant 6 : i32
    %187 = tpu.dynamic_rotate %142 by %c6_i32_54 dim 1 : vector<4x512xf32>, i32 -> vector<4x512xf32>
    %c6_i32_55 = arith.constant 6 : i32
    %188 = vector.broadcast %c6_i32_55 : i32 to vector<1x512xi32>
    %189 = arith.cmpi sge, %1, %188 : vector<1x512xi32>
    %190 = vector.extract_strided_slice %144 {offsets = [0, 3], sizes = [4, 1], strides = [1, 1]} : vector<4x9xf32> to vector<4x1xf32>
    %cst_56 = arith.constant 0.000000e+00 : f32
    %191 = vector.shape_cast %189 : vector<1x512xi1> to vector<1x512xi1>
    %192 = vector.broadcast %191 : vector<1x512xi1> to vector<4x512xi1>
    %193 = vector.broadcast %cst_56 : f32 to vector<4x512xf32>
    %194 = arith.select %192, %187, %193 : vector<4x512xi1>, vector<4x512xf32>
    %195 = vector.broadcast %190 : vector<4x1xf32> to vector<4x512xf32>
    %196 = arith.mulf %195, %194 : vector<4x512xf32>
    %197 = arith.addf %186, %196 : vector<4x512xf32>
    %c506_i32 = arith.constant 506 : i32
    %198 = tpu.dynamic_rotate %142 by %c506_i32 dim 1 : vector<4x512xf32>, i32 -> vector<4x512xf32>
    %c10_i32_57 = arith.constant 10 : i32
    %199 = vector.broadcast %c10_i32_57 : i32 to vector<1x512xi32>
    %200 = arith.cmpi slt, %1, %199 : vector<1x512xi32>
    %201 = vector.extract_strided_slice %144 {offsets = [0, 5], sizes = [4, 1], strides = [1, 1]} : vector<4x9xf32> to vector<4x1xf32>
    %cst_58 = arith.constant 0.000000e+00 : f32
    %202 = vector.shape_cast %200 : vector<1x512xi1> to vector<1x512xi1>
    %203 = vector.broadcast %202 : vector<1x512xi1> to vector<4x512xi1>
    %204 = vector.broadcast %cst_58 : f32 to vector<4x512xf32>
    %205 = arith.select %203, %198, %204 : vector<4x512xi1>, vector<4x512xf32>
    %206 = vector.broadcast %201 : vector<4x1xf32> to vector<4x512xf32>
    %207 = arith.mulf %206, %205 : vector<4x512xf32>
    %208 = arith.addf %197, %207 : vector<4x512xf32>
    %c422_i32 = arith.constant 422 : i32
    %209 = tpu.dynamic_rotate %142 by %c422_i32 dim 1 : vector<4x512xf32>, i32 -> vector<4x512xf32>
    %c10_i32_59 = arith.constant 10 : i32
    %210 = vector.broadcast %c10_i32_59 : i32 to vector<1x512xi32>
    %211 = arith.cmpi slt, %0, %210 : vector<1x512xi32>
    %c6_i32_60 = arith.constant 6 : i32
    %212 = vector.broadcast %c6_i32_60 : i32 to vector<1x512xi32>
    %213 = arith.cmpi sge, %1, %212 : vector<1x512xi32>
    %214 = arith.andi %211, %213 : vector<1x512xi1>
    %215 = vector.extract_strided_slice %144 {offsets = [0, 6], sizes = [4, 1], strides = [1, 1]} : vector<4x9xf32> to vector<4x1xf32>
    %cst_61 = arith.constant 0.000000e+00 : f32
    %216 = vector.shape_cast %214 : vector<1x512xi1> to vector<1x512xi1>
    %217 = vector.broadcast %216 : vector<1x512xi1> to vector<4x512xi1>
    %218 = vector.broadcast %cst_61 : f32 to vector<4x512xf32>
    %219 = arith.select %217, %209, %218 : vector<4x512xi1>, vector<4x512xf32>
    %220 = vector.broadcast %215 : vector<4x1xf32> to vector<4x512xf32>
    %221 = arith.mulf %220, %219 : vector<4x512xf32>
    %222 = arith.addf %208, %221 : vector<4x512xf32>
    %c416_i32 = arith.constant 416 : i32
    %223 = tpu.dynamic_rotate %142 by %c416_i32 dim 1 : vector<4x512xf32>, i32 -> vector<4x512xf32>
    %c10_i32_62 = arith.constant 10 : i32
    %224 = vector.broadcast %c10_i32_62 : i32 to vector<1x512xi32>
    %225 = arith.cmpi slt, %0, %224 : vector<1x512xi32>
    %226 = vector.extract_strided_slice %144 {offsets = [0, 7], sizes = [4, 1], strides = [1, 1]} : vector<4x9xf32> to vector<4x1xf32>
    %cst_63 = arith.constant 0.000000e+00 : f32
    %227 = vector.shape_cast %225 : vector<1x512xi1> to vector<1x512xi1>
    %228 = vector.broadcast %227 : vector<1x512xi1> to vector<4x512xi1>
    %229 = vector.broadcast %cst_63 : f32 to vector<4x512xf32>
    %230 = arith.select %228, %223, %229 : vector<4x512xi1>, vector<4x512xf32>
    %231 = vector.broadcast %226 : vector<4x1xf32> to vector<4x512xf32>
    %232 = arith.mulf %231, %230 : vector<4x512xf32>
    %233 = arith.addf %222, %232 : vector<4x512xf32>
    %c410_i32 = arith.constant 410 : i32
    %234 = tpu.dynamic_rotate %142 by %c410_i32 dim 1 : vector<4x512xf32>, i32 -> vector<4x512xf32>
    %c10_i32_64 = arith.constant 10 : i32
    %235 = vector.broadcast %c10_i32_64 : i32 to vector<1x512xi32>
    %236 = arith.cmpi slt, %0, %235 : vector<1x512xi32>
    %c10_i32_65 = arith.constant 10 : i32
    %237 = vector.broadcast %c10_i32_65 : i32 to vector<1x512xi32>
    %238 = arith.cmpi slt, %1, %237 : vector<1x512xi32>
    %239 = arith.andi %236, %238 : vector<1x512xi1>
    %240 = vector.extract_strided_slice %144 {offsets = [0, 8], sizes = [4, 1], strides = [1, 1]} : vector<4x9xf32> to vector<4x1xf32>
    %cst_66 = arith.constant 0.000000e+00 : f32
    %241 = vector.shape_cast %239 : vector<1x512xi1> to vector<1x512xi1>
    %242 = vector.broadcast %241 : vector<1x512xi1> to vector<4x512xi1>
    %243 = vector.broadcast %cst_66 : f32 to vector<4x512xf32>
    %244 = arith.select %242, %234, %243 : vector<4x512xi1>, vector<4x512xf32>
    %245 = vector.broadcast %240 : vector<4x1xf32> to vector<4x512xf32>
    %246 = arith.mulf %245, %244 : vector<4x512xf32>
    %247 = arith.addf %233, %246 : vector<4x512xf32>
    %c1_67 = arith.constant 1 : index
    %c0_68 = arith.constant 0 : index
    %c0_69 = arith.constant 0 : index
    %248 = vector.load %arg4[%c1_67, %c0_68, %c0_69] : memref<4x4x1xf32, #tpu.memory_space<vmem>>, vector<1x4x1xf32>
    %249 = vector.shape_cast %248 : vector<1x4x1xf32> to vector<4x1xf32>
    %250 = vector.broadcast %249 : vector<4x1xf32> to vector<4x512xf32>
    %251 = arith.addf %247, %250 : vector<4x512xf32>
    %c1_70 = arith.constant 1 : index
    %c0_71 = arith.constant 0 : index
    %c0_72 = arith.constant 0 : index
    %252 = vector.load %arg5[%c1_70, %c0_71, %c0_72] : memref<4x4x1xf32, #tpu.memory_space<vmem>>, vector<1x4x1xf32>
    %253 = vector.shape_cast %252 : vector<1x4x1xf32> to vector<4x1xf32>
    %c1_73 = arith.constant 1 : index
    %c0_74 = arith.constant 0 : index
    %c0_75 = arith.constant 0 : index
    %254 = vector.load %arg6[%c1_73, %c0_74, %c0_75] : memref<4x4x1xf32, #tpu.memory_space<vmem>>, vector<1x4x1xf32>
    %255 = vector.shape_cast %254 : vector<1x4x1xf32> to vector<4x1xf32>
    %cst_76 = arith.constant dense<0.000000e+00> : vector<4xf32>
    %256 = vector.multi_reduction <add>, %251, %cst_76 [1] : vector<4x512xf32> to vector<4xf32>
    %257 = vector.shape_cast %256 : vector<4xf32> to vector<4x1xf32>
    %258 = arith.mulf %251, %251 : vector<4x512xf32>
    %cst_77 = arith.constant dense<0.000000e+00> : vector<4xf32>
    %259 = vector.multi_reduction <add>, %258, %cst_77 [1] : vector<4x512xf32> to vector<4xf32>
    %260 = vector.shape_cast %259 : vector<4xf32> to vector<4x1xf32>
    %cst_78 = arith.constant 0.001953125 : f32
    %261 = vector.broadcast %cst_78 : f32 to vector<4x1xf32>
    %262 = arith.mulf %257, %261 : vector<4x1xf32>
    %cst_79 = arith.constant 0.001953125 : f32
    %263 = vector.broadcast %cst_79 : f32 to vector<4x1xf32>
    %264 = arith.mulf %260, %263 : vector<4x1xf32>
    %265 = arith.mulf %262, %262 : vector<4x1xf32>
    %266 = arith.subf %264, %265 : vector<4x1xf32>
    %267 = vector.broadcast %262 : vector<4x1xf32> to vector<4x512xf32>
    %268 = arith.subf %251, %267 : vector<4x512xf32>
    %cst_80 = arith.constant 9.99999974E-6 : f32
    %269 = vector.broadcast %cst_80 : f32 to vector<4x1xf32>
    %270 = arith.addf %266, %269 : vector<4x1xf32>
    %271 = math.rsqrt %270 : vector<4x1xf32>
    %272 = vector.broadcast %271 : vector<4x1xf32> to vector<4x512xf32>
    %273 = arith.mulf %268, %272 : vector<4x512xf32>
    %274 = vector.broadcast %253 : vector<4x1xf32> to vector<4x512xf32>
    %275 = arith.mulf %274, %273 : vector<4x512xf32>
    %276 = vector.broadcast %255 : vector<4x1xf32> to vector<4x512xf32>
    %277 = arith.addf %275, %276 : vector<4x512xf32>
    %cst_81 = arith.constant 0.000000e+00 : f32
    %278 = vector.broadcast %cst_81 : f32 to vector<4x512xf32>
    %279 = arith.maximumf %277, %278 : vector<4x512xf32>
    %c2 = arith.constant 2 : index
    %c0_82 = arith.constant 0 : index
    %c0_83 = arith.constant 0 : index
    %280 = vector.load %arg0[%c2, %c0_82, %c0_83] : memref<4x4x512xf32, #tpu.memory_space<vmem>>, vector<1x4x512xf32>
    %281 = vector.shape_cast %280 : vector<1x4x512xf32> to vector<4x512xf32>
    %c2_84 = arith.constant 2 : index
    %c0_85 = arith.constant 0 : index
    %c0_86 = arith.constant 0 : index
    %282 = vector.load %arg3[%c2_84, %c0_85, %c0_86] : memref<4x4x9xf32, #tpu.memory_space<vmem>>, vector<1x4x9xf32>
    %283 = vector.shape_cast %282 : vector<1x4x9xf32> to vector<4x9xf32>
    %284 = vector.extract_strided_slice %283 {offsets = [0, 4], sizes = [4, 1], strides = [1, 1]} : vector<4x9xf32> to vector<4x1xf32>
    %285 = vector.broadcast %284 : vector<4x1xf32> to vector<4x512xf32>
    %286 = arith.mulf %285, %281 : vector<4x512xf32>
    %c204_i32 = arith.constant 204 : i32
    %287 = tpu.dynamic_rotate %281 by %c204_i32 dim 1 : vector<4x512xf32>, i32 -> vector<4x512xf32>
    %c12_i32 = arith.constant 12 : i32
    %288 = vector.broadcast %c12_i32 : i32 to vector<1x512xi32>
    %289 = arith.cmpi sge, %0, %288 : vector<1x512xi32>
    %c12_i32_87 = arith.constant 12 : i32
    %290 = vector.broadcast %c12_i32_87 : i32 to vector<1x512xi32>
    %291 = arith.cmpi sge, %1, %290 : vector<1x512xi32>
    %292 = arith.andi %289, %291 : vector<1x512xi1>
    %293 = vector.extract_strided_slice %283 {offsets = [0, 0], sizes = [4, 1], strides = [1, 1]} : vector<4x9xf32> to vector<4x1xf32>
    %cst_88 = arith.constant 0.000000e+00 : f32
    %294 = vector.shape_cast %292 : vector<1x512xi1> to vector<1x512xi1>
    %295 = vector.broadcast %294 : vector<1x512xi1> to vector<4x512xi1>
    %296 = vector.broadcast %cst_88 : f32 to vector<4x512xf32>
    %297 = arith.select %295, %287, %296 : vector<4x512xi1>, vector<4x512xf32>
    %298 = vector.broadcast %293 : vector<4x1xf32> to vector<4x512xf32>
    %299 = arith.mulf %298, %297 : vector<4x512xf32>
    %300 = arith.addf %286, %299 : vector<4x512xf32>
    %c192_i32 = arith.constant 192 : i32
    %301 = tpu.dynamic_rotate %281 by %c192_i32 dim 1 : vector<4x512xf32>, i32 -> vector<4x512xf32>
    %c12_i32_89 = arith.constant 12 : i32
    %302 = vector.broadcast %c12_i32_89 : i32 to vector<1x512xi32>
    %303 = arith.cmpi sge, %0, %302 : vector<1x512xi32>
    %304 = vector.extract_strided_slice %283 {offsets = [0, 1], sizes = [4, 1], strides = [1, 1]} : vector<4x9xf32> to vector<4x1xf32>
    %cst_90 = arith.constant 0.000000e+00 : f32
    %305 = vector.shape_cast %303 : vector<1x512xi1> to vector<1x512xi1>
    %306 = vector.broadcast %305 : vector<1x512xi1> to vector<4x512xi1>
    %307 = vector.broadcast %cst_90 : f32 to vector<4x512xf32>
    %308 = arith.select %306, %301, %307 : vector<4x512xi1>, vector<4x512xf32>
    %309 = vector.broadcast %304 : vector<4x1xf32> to vector<4x512xf32>
    %310 = arith.mulf %309, %308 : vector<4x512xf32>
    %311 = arith.addf %300, %310 : vector<4x512xf32>
    %c180_i32 = arith.constant 180 : i32
    %312 = tpu.dynamic_rotate %281 by %c180_i32 dim 1 : vector<4x512xf32>, i32 -> vector<4x512xf32>
    %c12_i32_91 = arith.constant 12 : i32
    %313 = vector.broadcast %c12_i32_91 : i32 to vector<1x512xi32>
    %314 = arith.cmpi sge, %0, %313 : vector<1x512xi32>
    %c4_i32 = arith.constant 4 : i32
    %315 = vector.broadcast %c4_i32 : i32 to vector<1x512xi32>
    %316 = arith.cmpi slt, %1, %315 : vector<1x512xi32>
    %317 = arith.andi %314, %316 : vector<1x512xi1>
    %318 = vector.extract_strided_slice %283 {offsets = [0, 2], sizes = [4, 1], strides = [1, 1]} : vector<4x9xf32> to vector<4x1xf32>
    %cst_92 = arith.constant 0.000000e+00 : f32
    %319 = vector.shape_cast %317 : vector<1x512xi1> to vector<1x512xi1>
    %320 = vector.broadcast %319 : vector<1x512xi1> to vector<4x512xi1>
    %321 = vector.broadcast %cst_92 : f32 to vector<4x512xf32>
    %322 = arith.select %320, %312, %321 : vector<4x512xi1>, vector<4x512xf32>
    %323 = vector.broadcast %318 : vector<4x1xf32> to vector<4x512xf32>
    %324 = arith.mulf %323, %322 : vector<4x512xf32>
    %325 = arith.addf %311, %324 : vector<4x512xf32>
    %c12_i32_93 = arith.constant 12 : i32
    %326 = tpu.dynamic_rotate %281 by %c12_i32_93 dim 1 : vector<4x512xf32>, i32 -> vector<4x512xf32>
    %c12_i32_94 = arith.constant 12 : i32
    %327 = vector.broadcast %c12_i32_94 : i32 to vector<1x512xi32>
    %328 = arith.cmpi sge, %1, %327 : vector<1x512xi32>
    %329 = vector.extract_strided_slice %283 {offsets = [0, 3], sizes = [4, 1], strides = [1, 1]} : vector<4x9xf32> to vector<4x1xf32>
    %cst_95 = arith.constant 0.000000e+00 : f32
    %330 = vector.shape_cast %328 : vector<1x512xi1> to vector<1x512xi1>
    %331 = vector.broadcast %330 : vector<1x512xi1> to vector<4x512xi1>
    %332 = vector.broadcast %cst_95 : f32 to vector<4x512xf32>
    %333 = arith.select %331, %326, %332 : vector<4x512xi1>, vector<4x512xf32>
    %334 = vector.broadcast %329 : vector<4x1xf32> to vector<4x512xf32>
    %335 = arith.mulf %334, %333 : vector<4x512xf32>
    %336 = arith.addf %325, %335 : vector<4x512xf32>
    %c500_i32 = arith.constant 500 : i32
    %337 = tpu.dynamic_rotate %281 by %c500_i32 dim 1 : vector<4x512xf32>, i32 -> vector<4x512xf32>
    %c4_i32_96 = arith.constant 4 : i32
    %338 = vector.broadcast %c4_i32_96 : i32 to vector<1x512xi32>
    %339 = arith.cmpi slt, %1, %338 : vector<1x512xi32>
    %340 = vector.extract_strided_slice %283 {offsets = [0, 5], sizes = [4, 1], strides = [1, 1]} : vector<4x9xf32> to vector<4x1xf32>
    %cst_97 = arith.constant 0.000000e+00 : f32
    %341 = vector.shape_cast %339 : vector<1x512xi1> to vector<1x512xi1>
    %342 = vector.broadcast %341 : vector<1x512xi1> to vector<4x512xi1>
    %343 = vector.broadcast %cst_97 : f32 to vector<4x512xf32>
    %344 = arith.select %342, %337, %343 : vector<4x512xi1>, vector<4x512xf32>
    %345 = vector.broadcast %340 : vector<4x1xf32> to vector<4x512xf32>
    %346 = arith.mulf %345, %344 : vector<4x512xf32>
    %347 = arith.addf %336, %346 : vector<4x512xf32>
    %c332_i32 = arith.constant 332 : i32
    %348 = tpu.dynamic_rotate %281 by %c332_i32 dim 1 : vector<4x512xf32>, i32 -> vector<4x512xf32>
    %c4_i32_98 = arith.constant 4 : i32
    %349 = vector.broadcast %c4_i32_98 : i32 to vector<1x512xi32>
    %350 = arith.cmpi slt, %0, %349 : vector<1x512xi32>
    %c12_i32_99 = arith.constant 12 : i32
    %351 = vector.broadcast %c12_i32_99 : i32 to vector<1x512xi32>
    %352 = arith.cmpi sge, %1, %351 : vector<1x512xi32>
    %353 = arith.andi %350, %352 : vector<1x512xi1>
    %354 = vector.extract_strided_slice %283 {offsets = [0, 6], sizes = [4, 1], strides = [1, 1]} : vector<4x9xf32> to vector<4x1xf32>
    %cst_100 = arith.constant 0.000000e+00 : f32
    %355 = vector.shape_cast %353 : vector<1x512xi1> to vector<1x512xi1>
    %356 = vector.broadcast %355 : vector<1x512xi1> to vector<4x512xi1>
    %357 = vector.broadcast %cst_100 : f32 to vector<4x512xf32>
    %358 = arith.select %356, %348, %357 : vector<4x512xi1>, vector<4x512xf32>
    %359 = vector.broadcast %354 : vector<4x1xf32> to vector<4x512xf32>
    %360 = arith.mulf %359, %358 : vector<4x512xf32>
    %361 = arith.addf %347, %360 : vector<4x512xf32>
    %c320_i32 = arith.constant 320 : i32
    %362 = tpu.dynamic_rotate %281 by %c320_i32 dim 1 : vector<4x512xf32>, i32 -> vector<4x512xf32>
    %c4_i32_101 = arith.constant 4 : i32
    %363 = vector.broadcast %c4_i32_101 : i32 to vector<1x512xi32>
    %364 = arith.cmpi slt, %0, %363 : vector<1x512xi32>
    %365 = vector.extract_strided_slice %283 {offsets = [0, 7], sizes = [4, 1], strides = [1, 1]} : vector<4x9xf32> to vector<4x1xf32>
    %cst_102 = arith.constant 0.000000e+00 : f32
    %366 = vector.shape_cast %364 : vector<1x512xi1> to vector<1x512xi1>
    %367 = vector.broadcast %366 : vector<1x512xi1> to vector<4x512xi1>
    %368 = vector.broadcast %cst_102 : f32 to vector<4x512xf32>
    %369 = arith.select %367, %362, %368 : vector<4x512xi1>, vector<4x512xf32>
    %370 = vector.broadcast %365 : vector<4x1xf32> to vector<4x512xf32>
    %371 = arith.mulf %370, %369 : vector<4x512xf32>
    %372 = arith.addf %361, %371 : vector<4x512xf32>
    %c308_i32 = arith.constant 308 : i32
    %373 = tpu.dynamic_rotate %281 by %c308_i32 dim 1 : vector<4x512xf32>, i32 -> vector<4x512xf32>
    %c4_i32_103 = arith.constant 4 : i32
    %374 = vector.broadcast %c4_i32_103 : i32 to vector<1x512xi32>
    %375 = arith.cmpi slt, %0, %374 : vector<1x512xi32>
    %c4_i32_104 = arith.constant 4 : i32
    %376 = vector.broadcast %c4_i32_104 : i32 to vector<1x512xi32>
    %377 = arith.cmpi slt, %1, %376 : vector<1x512xi32>
    %378 = arith.andi %375, %377 : vector<1x512xi1>
    %379 = vector.extract_strided_slice %283 {offsets = [0, 8], sizes = [4, 1], strides = [1, 1]} : vector<4x9xf32> to vector<4x1xf32>
    %cst_105 = arith.constant 0.000000e+00 : f32
    %380 = vector.shape_cast %378 : vector<1x512xi1> to vector<1x512xi1>
    %381 = vector.broadcast %380 : vector<1x512xi1> to vector<4x512xi1>
    %382 = vector.broadcast %cst_105 : f32 to vector<4x512xf32>
    %383 = arith.select %381, %373, %382 : vector<4x512xi1>, vector<4x512xf32>
    %384 = vector.broadcast %379 : vector<4x1xf32> to vector<4x512xf32>
    %385 = arith.mulf %384, %383 : vector<4x512xf32>
    %386 = arith.addf %372, %385 : vector<4x512xf32>
    %c2_106 = arith.constant 2 : index
    %c0_107 = arith.constant 0 : index
    %c0_108 = arith.constant 0 : index
    %387 = vector.load %arg4[%c2_106, %c0_107, %c0_108] : memref<4x4x1xf32, #tpu.memory_space<vmem>>, vector<1x4x1xf32>
    %388 = vector.shape_cast %387 : vector<1x4x1xf32> to vector<4x1xf32>
    %389 = vector.broadcast %388 : vector<4x1xf32> to vector<4x512xf32>
    %390 = arith.addf %386, %389 : vector<4x512xf32>
    %c2_109 = arith.constant 2 : index
    %c0_110 = arith.constant 0 : index
    %c0_111 = arith.constant 0 : index
    %391 = vector.load %arg5[%c2_109, %c0_110, %c0_111] : memref<4x4x1xf32, #tpu.memory_space<vmem>>, vector<1x4x1xf32>
    %392 = vector.shape_cast %391 : vector<1x4x1xf32> to vector<4x1xf32>
    %c2_112 = arith.constant 2 : index
    %c0_113 = arith.constant 0 : index
    %c0_114 = arith.constant 0 : index
    %393 = vector.load %arg6[%c2_112, %c0_113, %c0_114] : memref<4x4x1xf32, #tpu.memory_space<vmem>>, vector<1x4x1xf32>
    %394 = vector.shape_cast %393 : vector<1x4x1xf32> to vector<4x1xf32>
    %cst_115 = arith.constant dense<0.000000e+00> : vector<4xf32>
    %395 = vector.multi_reduction <add>, %390, %cst_115 [1] : vector<4x512xf32> to vector<4xf32>
    %396 = vector.shape_cast %395 : vector<4xf32> to vector<4x1xf32>
    %397 = arith.mulf %390, %390 : vector<4x512xf32>
    %cst_116 = arith.constant dense<0.000000e+00> : vector<4xf32>
    %398 = vector.multi_reduction <add>, %397, %cst_116 [1] : vector<4x512xf32> to vector<4xf32>
    %399 = vector.shape_cast %398 : vector<4xf32> to vector<4x1xf32>
    %cst_117 = arith.constant 0.001953125 : f32
    %400 = vector.broadcast %cst_117 : f32 to vector<4x1xf32>
    %401 = arith.mulf %396, %400 : vector<4x1xf32>
    %cst_118 = arith.constant 0.001953125 : f32
    %402 = vector.broadcast %cst_118 : f32 to vector<4x1xf32>
    %403 = arith.mulf %399, %402 : vector<4x1xf32>
    %404 = arith.mulf %401, %401 : vector<4x1xf32>
    %405 = arith.subf %403, %404 : vector<4x1xf32>
    %406 = vector.broadcast %401 : vector<4x1xf32> to vector<4x512xf32>
    %407 = arith.subf %390, %406 : vector<4x512xf32>
    %cst_119 = arith.constant 9.99999974E-6 : f32
    %408 = vector.broadcast %cst_119 : f32 to vector<4x1xf32>
    %409 = arith.addf %405, %408 : vector<4x1xf32>
    %410 = math.rsqrt %409 : vector<4x1xf32>
    %411 = vector.broadcast %410 : vector<4x1xf32> to vector<4x512xf32>
    %412 = arith.mulf %407, %411 : vector<4x512xf32>
    %413 = vector.broadcast %392 : vector<4x1xf32> to vector<4x512xf32>
    %414 = arith.mulf %413, %412 : vector<4x512xf32>
    %415 = vector.broadcast %394 : vector<4x1xf32> to vector<4x512xf32>
    %416 = arith.addf %414, %415 : vector<4x512xf32>
    %cst_120 = arith.constant 0.000000e+00 : f32
    %417 = vector.broadcast %cst_120 : f32 to vector<4x512xf32>
    %418 = arith.maximumf %416, %417 : vector<4x512xf32>
    %c3 = arith.constant 3 : index
    %c0_121 = arith.constant 0 : index
    %c0_122 = arith.constant 0 : index
    %419 = vector.load %arg0[%c3, %c0_121, %c0_122] : memref<4x4x512xf32, #tpu.memory_space<vmem>>, vector<1x4x512xf32>
    %420 = vector.shape_cast %419 : vector<1x4x512xf32> to vector<4x512xf32>
    %c3_123 = arith.constant 3 : index
    %c0_124 = arith.constant 0 : index
    %c0_125 = arith.constant 0 : index
    %421 = vector.load %arg3[%c3_123, %c0_124, %c0_125] : memref<4x4x9xf32, #tpu.memory_space<vmem>>, vector<1x4x9xf32>
    %422 = vector.shape_cast %421 : vector<1x4x9xf32> to vector<4x9xf32>
    %423 = vector.extract_strided_slice %422 {offsets = [0, 4], sizes = [4, 1], strides = [1, 1]} : vector<4x9xf32> to vector<4x1xf32>
    %424 = vector.broadcast %423 : vector<4x1xf32> to vector<4x512xf32>
    %425 = arith.mulf %424, %420 : vector<4x512xf32>
    %c3_126 = arith.constant 3 : index
    %c0_127 = arith.constant 0 : index
    %c0_128 = arith.constant 0 : index
    %426 = vector.load %arg4[%c3_126, %c0_127, %c0_128] : memref<4x4x1xf32, #tpu.memory_space<vmem>>, vector<1x4x1xf32>
    %427 = vector.shape_cast %426 : vector<1x4x1xf32> to vector<4x1xf32>
    %428 = vector.broadcast %427 : vector<4x1xf32> to vector<4x512xf32>
    %429 = arith.addf %425, %428 : vector<4x512xf32>
    %c3_129 = arith.constant 3 : index
    %c0_130 = arith.constant 0 : index
    %c0_131 = arith.constant 0 : index
    %430 = vector.load %arg5[%c3_129, %c0_130, %c0_131] : memref<4x4x1xf32, #tpu.memory_space<vmem>>, vector<1x4x1xf32>
    %431 = vector.shape_cast %430 : vector<1x4x1xf32> to vector<4x1xf32>
    %c3_132 = arith.constant 3 : index
    %c0_133 = arith.constant 0 : index
    %c0_134 = arith.constant 0 : index
    %432 = vector.load %arg6[%c3_132, %c0_133, %c0_134] : memref<4x4x1xf32, #tpu.memory_space<vmem>>, vector<1x4x1xf32>
    %433 = vector.shape_cast %432 : vector<1x4x1xf32> to vector<4x1xf32>
    %cst_135 = arith.constant dense<0.000000e+00> : vector<4xf32>
    %434 = vector.multi_reduction <add>, %429, %cst_135 [1] : vector<4x512xf32> to vector<4xf32>
    %435 = vector.shape_cast %434 : vector<4xf32> to vector<4x1xf32>
    %436 = arith.mulf %429, %429 : vector<4x512xf32>
    %cst_136 = arith.constant dense<0.000000e+00> : vector<4xf32>
    %437 = vector.multi_reduction <add>, %436, %cst_136 [1] : vector<4x512xf32> to vector<4xf32>
    %438 = vector.shape_cast %437 : vector<4xf32> to vector<4x1xf32>
    %cst_137 = arith.constant 0.001953125 : f32
    %439 = vector.broadcast %cst_137 : f32 to vector<4x1xf32>
    %440 = arith.mulf %435, %439 : vector<4x1xf32>
    %cst_138 = arith.constant 0.001953125 : f32
    %441 = vector.broadcast %cst_138 : f32 to vector<4x1xf32>
    %442 = arith.mulf %438, %441 : vector<4x1xf32>
    %443 = arith.mulf %440, %440 : vector<4x1xf32>
    %444 = arith.subf %442, %443 : vector<4x1xf32>
    %445 = vector.broadcast %440 : vector<4x1xf32> to vector<4x512xf32>
    %446 = arith.subf %429, %445 : vector<4x512xf32>
    %cst_139 = arith.constant 9.99999974E-6 : f32
    %447 = vector.broadcast %cst_139 : f32 to vector<4x1xf32>
    %448 = arith.addf %444, %447 : vector<4x1xf32>
    %449 = math.rsqrt %448 : vector<4x1xf32>
    %450 = vector.broadcast %449 : vector<4x1xf32> to vector<4x512xf32>
    %451 = arith.mulf %446, %450 : vector<4x512xf32>
    %452 = vector.broadcast %431 : vector<4x1xf32> to vector<4x512xf32>
    %453 = arith.mulf %452, %451 : vector<4x512xf32>
    %454 = vector.broadcast %433 : vector<4x1xf32> to vector<4x512xf32>
    %455 = arith.addf %453, %454 : vector<4x512xf32>
    %cst_140 = arith.constant 0.000000e+00 : f32
    %456 = vector.broadcast %cst_140 : f32 to vector<4x512xf32>
    %457 = arith.maximumf %455, %456 : vector<4x512xf32>
    %c0_141 = arith.constant 0 : index
    %c0_142 = arith.constant 0 : index
    %458 = memref.load %arg7[%c0_141, %c0_142] : memref<4x4xf32, #tpu.memory_space<smem>>
    %459 = vector.broadcast %458 : f32 to vector<4x512xf32>
    %460 = arith.mulf %459, %140 : vector<4x512xf32>
    %c0_143 = arith.constant 0 : index
    %c1_144 = arith.constant 1 : index
    %461 = memref.load %arg7[%c0_143, %c1_144] : memref<4x4xf32, #tpu.memory_space<smem>>
    %462 = vector.broadcast %461 : f32 to vector<4x512xf32>
    %463 = arith.mulf %462, %279 : vector<4x512xf32>
    %464 = arith.addf %460, %463 : vector<4x512xf32>
    %c0_145 = arith.constant 0 : index
    %c2_146 = arith.constant 2 : index
    %465 = memref.load %arg7[%c0_145, %c2_146] : memref<4x4xf32, #tpu.memory_space<smem>>
    %466 = vector.broadcast %465 : f32 to vector<4x512xf32>
    %467 = arith.mulf %466, %418 : vector<4x512xf32>
    %468 = arith.addf %464, %467 : vector<4x512xf32>
    %c0_147 = arith.constant 0 : index
    %c3_148 = arith.constant 3 : index
    %469 = memref.load %arg7[%c0_147, %c3_148] : memref<4x4xf32, #tpu.memory_space<smem>>
    %470 = vector.broadcast %469 : f32 to vector<4x512xf32>
    %471 = arith.mulf %470, %457 : vector<4x512xf32>
    %472 = arith.addf %468, %471 : vector<4x512xf32>
    %c0_149 = arith.constant 0 : index
    %473 = memref.load %arg8[%c0_149] : memref<4xf32, #tpu.memory_space<smem>>
    %474 = vector.broadcast %473 : f32 to vector<4x512xf32>
    %475 = arith.addf %472, %474 : vector<4x512xf32>
    %c0_150 = arith.constant 0 : index
    %476 = memref.load %arg9[%c0_150] : memref<4xf32, #tpu.memory_space<smem>>
    %c0_151 = arith.constant 0 : index
    %477 = memref.load %arg10[%c0_151] : memref<4xf32, #tpu.memory_space<smem>>
    %cst_152 = arith.constant dense<0.000000e+00> : vector<4xf32>
    %478 = vector.multi_reduction <add>, %475, %cst_152 [1] : vector<4x512xf32> to vector<4xf32>
    %479 = vector.shape_cast %478 : vector<4xf32> to vector<4x1xf32>
    %480 = arith.mulf %475, %475 : vector<4x512xf32>
    %cst_153 = arith.constant dense<0.000000e+00> : vector<4xf32>
    %481 = vector.multi_reduction <add>, %480, %cst_153 [1] : vector<4x512xf32> to vector<4xf32>
    %482 = vector.shape_cast %481 : vector<4xf32> to vector<4x1xf32>
    %cst_154 = arith.constant 0.001953125 : f32
    %483 = vector.broadcast %cst_154 : f32 to vector<4x1xf32>
    %484 = arith.mulf %479, %483 : vector<4x1xf32>
    %cst_155 = arith.constant 0.001953125 : f32
    %485 = vector.broadcast %cst_155 : f32 to vector<4x1xf32>
    %486 = arith.mulf %482, %485 : vector<4x1xf32>
    %487 = arith.mulf %484, %484 : vector<4x1xf32>
    %488 = arith.subf %486, %487 : vector<4x1xf32>
    %489 = vector.broadcast %484 : vector<4x1xf32> to vector<4x512xf32>
    %490 = arith.subf %475, %489 : vector<4x512xf32>
    %cst_156 = arith.constant 9.99999974E-6 : f32
    %491 = vector.broadcast %cst_156 : f32 to vector<4x1xf32>
    %492 = arith.addf %488, %491 : vector<4x1xf32>
    %493 = math.rsqrt %492 : vector<4x1xf32>
    %494 = vector.broadcast %493 : vector<4x1xf32> to vector<4x512xf32>
    %495 = arith.mulf %490, %494 : vector<4x512xf32>
    %496 = vector.broadcast %476 : f32 to vector<4x512xf32>
    %497 = arith.mulf %496, %495 : vector<4x512xf32>
    %498 = vector.broadcast %477 : f32 to vector<4x512xf32>
    %499 = arith.addf %497, %498 : vector<4x512xf32>
    %cst_157 = arith.constant 0.000000e+00 : f32
    %500 = vector.broadcast %cst_157 : f32 to vector<4x512xf32>
    %501 = arith.maximumf %499, %500 : vector<4x512xf32>
    %c1_158 = arith.constant 1 : index
    %c0_159 = arith.constant 0 : index
    %502 = memref.load %arg7[%c1_158, %c0_159] : memref<4x4xf32, #tpu.memory_space<smem>>
    %503 = vector.broadcast %502 : f32 to vector<4x512xf32>
    %504 = arith.mulf %503, %140 : vector<4x512xf32>
    %c1_160 = arith.constant 1 : index
    %c1_161 = arith.constant 1 : index
    %505 = memref.load %arg7[%c1_160, %c1_161] : memref<4x4xf32, #tpu.memory_space<smem>>
    %506 = vector.broadcast %505 : f32 to vector<4x512xf32>
    %507 = arith.mulf %506, %279 : vector<4x512xf32>
    %508 = arith.addf %504, %507 : vector<4x512xf32>
    %c1_162 = arith.constant 1 : index
    %c2_163 = arith.constant 2 : index
    %509 = memref.load %arg7[%c1_162, %c2_163] : memref<4x4xf32, #tpu.memory_space<smem>>
    %510 = vector.broadcast %509 : f32 to vector<4x512xf32>
    %511 = arith.mulf %510, %418 : vector<4x512xf32>
    %512 = arith.addf %508, %511 : vector<4x512xf32>
    %c1_164 = arith.constant 1 : index
    %c3_165 = arith.constant 3 : index
    %513 = memref.load %arg7[%c1_164, %c3_165] : memref<4x4xf32, #tpu.memory_space<smem>>
    %514 = vector.broadcast %513 : f32 to vector<4x512xf32>
    %515 = arith.mulf %514, %457 : vector<4x512xf32>
    %516 = arith.addf %512, %515 : vector<4x512xf32>
    %c1_166 = arith.constant 1 : index
    %517 = memref.load %arg8[%c1_166] : memref<4xf32, #tpu.memory_space<smem>>
    %518 = vector.broadcast %517 : f32 to vector<4x512xf32>
    %519 = arith.addf %516, %518 : vector<4x512xf32>
    %c1_167 = arith.constant 1 : index
    %520 = memref.load %arg9[%c1_167] : memref<4xf32, #tpu.memory_space<smem>>
    %c1_168 = arith.constant 1 : index
    %521 = memref.load %arg10[%c1_168] : memref<4xf32, #tpu.memory_space<smem>>
    %cst_169 = arith.constant dense<0.000000e+00> : vector<4xf32>
    %522 = vector.multi_reduction <add>, %519, %cst_169 [1] : vector<4x512xf32> to vector<4xf32>
    %523 = vector.shape_cast %522 : vector<4xf32> to vector<4x1xf32>
    %524 = arith.mulf %519, %519 : vector<4x512xf32>
    %cst_170 = arith.constant dense<0.000000e+00> : vector<4xf32>
    %525 = vector.multi_reduction <add>, %524, %cst_170 [1] : vector<4x512xf32> to vector<4xf32>
    %526 = vector.shape_cast %525 : vector<4xf32> to vector<4x1xf32>
    %cst_171 = arith.constant 0.001953125 : f32
    %527 = vector.broadcast %cst_171 : f32 to vector<4x1xf32>
    %528 = arith.mulf %523, %527 : vector<4x1xf32>
    %cst_172 = arith.constant 0.001953125 : f32
    %529 = vector.broadcast %cst_172 : f32 to vector<4x1xf32>
    %530 = arith.mulf %526, %529 : vector<4x1xf32>
    %531 = arith.mulf %528, %528 : vector<4x1xf32>
    %532 = arith.subf %530, %531 : vector<4x1xf32>
    %533 = vector.broadcast %528 : vector<4x1xf32> to vector<4x512xf32>
    %534 = arith.subf %519, %533 : vector<4x512xf32>
    %cst_173 = arith.constant 9.99999974E-6 : f32
    %535 = vector.broadcast %cst_173 : f32 to vector<4x1xf32>
    %536 = arith.addf %532, %535 : vector<4x1xf32>
    %537 = math.rsqrt %536 : vector<4x1xf32>
    %538 = vector.broadcast %537 : vector<4x1xf32> to vector<4x512xf32>
    %539 = arith.mulf %534, %538 : vector<4x512xf32>
    %540 = vector.broadcast %520 : f32 to vector<4x512xf32>
    %541 = arith.mulf %540, %539 : vector<4x512xf32>
    %542 = vector.broadcast %521 : f32 to vector<4x512xf32>
    %543 = arith.addf %541, %542 : vector<4x512xf32>
    %cst_174 = arith.constant 0.000000e+00 : f32
    %544 = vector.broadcast %cst_174 : f32 to vector<4x512xf32>
    %545 = arith.maximumf %543, %544 : vector<4x512xf32>
    %c2_175 = arith.constant 2 : index
    %c0_176 = arith.constant 0 : index
    %546 = memref.load %arg7[%c2_175, %c0_176] : memref<4x4xf32, #tpu.memory_space<smem>>
    %547 = vector.broadcast %546 : f32 to vector<4x512xf32>
    %548 = arith.mulf %547, %140 : vector<4x512xf32>
    %c2_177 = arith.constant 2 : index
    %c1_178 = arith.constant 1 : index
    %549 = memref.load %arg7[%c2_177, %c1_178] : memref<4x4xf32, #tpu.memory_space<smem>>
    %550 = vector.broadcast %549 : f32 to vector<4x512xf32>
    %551 = arith.mulf %550, %279 : vector<4x512xf32>
    %552 = arith.addf %548, %551 : vector<4x512xf32>
    %c2_179 = arith.constant 2 : index
    %c2_180 = arith.constant 2 : index
    %553 = memref.load %arg7[%c2_179, %c2_180] : memref<4x4xf32, #tpu.memory_space<smem>>
    %554 = vector.broadcast %553 : f32 to vector<4x512xf32>
    %555 = arith.mulf %554, %418 : vector<4x512xf32>
    %556 = arith.addf %552, %555 : vector<4x512xf32>
    %c2_181 = arith.constant 2 : index
    %c3_182 = arith.constant 3 : index
    %557 = memref.load %arg7[%c2_181, %c3_182] : memref<4x4xf32, #tpu.memory_space<smem>>
    %558 = vector.broadcast %557 : f32 to vector<4x512xf32>
    %559 = arith.mulf %558, %457 : vector<4x512xf32>
    %560 = arith.addf %556, %559 : vector<4x512xf32>
    %c2_183 = arith.constant 2 : index
    %561 = memref.load %arg8[%c2_183] : memref<4xf32, #tpu.memory_space<smem>>
    %562 = vector.broadcast %561 : f32 to vector<4x512xf32>
    %563 = arith.addf %560, %562 : vector<4x512xf32>
    %c2_184 = arith.constant 2 : index
    %564 = memref.load %arg9[%c2_184] : memref<4xf32, #tpu.memory_space<smem>>
    %c2_185 = arith.constant 2 : index
    %565 = memref.load %arg10[%c2_185] : memref<4xf32, #tpu.memory_space<smem>>
    %cst_186 = arith.constant dense<0.000000e+00> : vector<4xf32>
    %566 = vector.multi_reduction <add>, %563, %cst_186 [1] : vector<4x512xf32> to vector<4xf32>
    %567 = vector.shape_cast %566 : vector<4xf32> to vector<4x1xf32>
    %568 = arith.mulf %563, %563 : vector<4x512xf32>
    %cst_187 = arith.constant dense<0.000000e+00> : vector<4xf32>
    %569 = vector.multi_reduction <add>, %568, %cst_187 [1] : vector<4x512xf32> to vector<4xf32>
    %570 = vector.shape_cast %569 : vector<4xf32> to vector<4x1xf32>
    %cst_188 = arith.constant 0.001953125 : f32
    %571 = vector.broadcast %cst_188 : f32 to vector<4x1xf32>
    %572 = arith.mulf %567, %571 : vector<4x1xf32>
    %cst_189 = arith.constant 0.001953125 : f32
    %573 = vector.broadcast %cst_189 : f32 to vector<4x1xf32>
    %574 = arith.mulf %570, %573 : vector<4x1xf32>
    %575 = arith.mulf %572, %572 : vector<4x1xf32>
    %576 = arith.subf %574, %575 : vector<4x1xf32>
    %577 = vector.broadcast %572 : vector<4x1xf32> to vector<4x512xf32>
    %578 = arith.subf %563, %577 : vector<4x512xf32>
    %cst_190 = arith.constant 9.99999974E-6 : f32
    %579 = vector.broadcast %cst_190 : f32 to vector<4x1xf32>
    %580 = arith.addf %576, %579 : vector<4x1xf32>
    %581 = math.rsqrt %580 : vector<4x1xf32>
    %582 = vector.broadcast %581 : vector<4x1xf32> to vector<4x512xf32>
    %583 = arith.mulf %578, %582 : vector<4x512xf32>
    %584 = vector.broadcast %564 : f32 to vector<4x512xf32>
    %585 = arith.mulf %584, %583 : vector<4x512xf32>
    %586 = vector.broadcast %565 : f32 to vector<4x512xf32>
    %587 = arith.addf %585, %586 : vector<4x512xf32>
    %cst_191 = arith.constant 0.000000e+00 : f32
    %588 = vector.broadcast %cst_191 : f32 to vector<4x512xf32>
    %589 = arith.maximumf %587, %588 : vector<4x512xf32>
    %c3_192 = arith.constant 3 : index
    %c0_193 = arith.constant 0 : index
    %590 = memref.load %arg7[%c3_192, %c0_193] : memref<4x4xf32, #tpu.memory_space<smem>>
    %591 = vector.broadcast %590 : f32 to vector<4x512xf32>
    %592 = arith.mulf %591, %140 : vector<4x512xf32>
    %c3_194 = arith.constant 3 : index
    %c1_195 = arith.constant 1 : index
    %593 = memref.load %arg7[%c3_194, %c1_195] : memref<4x4xf32, #tpu.memory_space<smem>>
    %594 = vector.broadcast %593 : f32 to vector<4x512xf32>
    %595 = arith.mulf %594, %279 : vector<4x512xf32>
    %596 = arith.addf %592, %595 : vector<4x512xf32>
    %c3_196 = arith.constant 3 : index
    %c2_197 = arith.constant 2 : index
    %597 = memref.load %arg7[%c3_196, %c2_197] : memref<4x4xf32, #tpu.memory_space<smem>>
    %598 = vector.broadcast %597 : f32 to vector<4x512xf32>
    %599 = arith.mulf %598, %418 : vector<4x512xf32>
    %600 = arith.addf %596, %599 : vector<4x512xf32>
    %c3_198 = arith.constant 3 : index
    %c3_199 = arith.constant 3 : index
    %601 = memref.load %arg7[%c3_198, %c3_199] : memref<4x4xf32, #tpu.memory_space<smem>>
    %602 = vector.broadcast %601 : f32 to vector<4x512xf32>
    %603 = arith.mulf %602, %457 : vector<4x512xf32>
    %604 = arith.addf %600, %603 : vector<4x512xf32>
    %c3_200 = arith.constant 3 : index
    %605 = memref.load %arg8[%c3_200] : memref<4xf32, #tpu.memory_space<smem>>
    %606 = vector.broadcast %605 : f32 to vector<4x512xf32>
    %607 = arith.addf %604, %606 : vector<4x512xf32>
    %c3_201 = arith.constant 3 : index
    %608 = memref.load %arg9[%c3_201] : memref<4xf32, #tpu.memory_space<smem>>
    %c3_202 = arith.constant 3 : index
    %609 = memref.load %arg10[%c3_202] : memref<4xf32, #tpu.memory_space<smem>>
    %cst_203 = arith.constant dense<0.000000e+00> : vector<4xf32>
    %610 = vector.multi_reduction <add>, %607, %cst_203 [1] : vector<4x512xf32> to vector<4xf32>
    %611 = vector.shape_cast %610 : vector<4xf32> to vector<4x1xf32>
    %612 = arith.mulf %607, %607 : vector<4x512xf32>
    %cst_204 = arith.constant dense<0.000000e+00> : vector<4xf32>
    %613 = vector.multi_reduction <add>, %612, %cst_204 [1] : vector<4x512xf32> to vector<4xf32>
    %614 = vector.shape_cast %613 : vector<4xf32> to vector<4x1xf32>
    %cst_205 = arith.constant 0.001953125 : f32
    %615 = vector.broadcast %cst_205 : f32 to vector<4x1xf32>
    %616 = arith.mulf %611, %615 : vector<4x1xf32>
    %cst_206 = arith.constant 0.001953125 : f32
    %617 = vector.broadcast %cst_206 : f32 to vector<4x1xf32>
    %618 = arith.mulf %614, %617 : vector<4x1xf32>
    %619 = arith.mulf %616, %616 : vector<4x1xf32>
    %620 = arith.subf %618, %619 : vector<4x1xf32>
    %621 = vector.broadcast %616 : vector<4x1xf32> to vector<4x512xf32>
    %622 = arith.subf %607, %621 : vector<4x512xf32>
    %cst_207 = arith.constant 9.99999974E-6 : f32
    %623 = vector.broadcast %cst_207 : f32 to vector<4x1xf32>
    %624 = arith.addf %620, %623 : vector<4x1xf32>
    %625 = math.rsqrt %624 : vector<4x1xf32>
    %626 = vector.broadcast %625 : vector<4x1xf32> to vector<4x512xf32>
    %627 = arith.mulf %622, %626 : vector<4x512xf32>
    %628 = vector.broadcast %608 : f32 to vector<4x512xf32>
    %629 = arith.mulf %628, %627 : vector<4x512xf32>
    %630 = vector.broadcast %609 : f32 to vector<4x512xf32>
    %631 = arith.addf %629, %630 : vector<4x512xf32>
    %cst_208 = arith.constant 0.000000e+00 : f32
    %632 = vector.broadcast %cst_208 : f32 to vector<4x512xf32>
    %633 = arith.maximumf %631, %632 : vector<4x512xf32>
    %c0_209 = arith.constant 0 : index
    %c0_210 = arith.constant 0 : index
    %c0_211 = arith.constant 0 : index
    %634 = vector.load %arg11[%c0_209, %c0_210, %c0_211] : memref<4x16x4xf32, #tpu.memory_space<vmem>>, vector<1x16x4xf32>
    %635 = vector.shape_cast %634 : vector<1x16x4xf32> to vector<16x4xf32>
    %cst_212 = arith.constant dense<0.000000e+00> : vector<16x512xf32>
    %636 = tpu.matmul %635, %501, %cst_212 {dimension_numbers = #tpu.dot_dimension_numbers<[1], [0], [0], [1], [0, 0, 1, 1], [], []>} : vector<16x4xf32>, vector<4x512xf32>, vector<16x512xf32> -> vector<16x512xf32>
    %c1_213 = arith.constant 1 : index
    %c0_214 = arith.constant 0 : index
    %c0_215 = arith.constant 0 : index
    %637 = vector.load %arg11[%c1_213, %c0_214, %c0_215] : memref<4x16x4xf32, #tpu.memory_space<vmem>>, vector<1x16x4xf32>
    %638 = vector.shape_cast %637 : vector<1x16x4xf32> to vector<16x4xf32>
    %cst_216 = arith.constant dense<0.000000e+00> : vector<16x512xf32>
    %639 = tpu.matmul %638, %545, %cst_216 {dimension_numbers = #tpu.dot_dimension_numbers<[1], [0], [0], [1], [0, 0, 1, 1], [], []>} : vector<16x4xf32>, vector<4x512xf32>, vector<16x512xf32> -> vector<16x512xf32>
    %640 = arith.addf %636, %639 : vector<16x512xf32>
    %c2_217 = arith.constant 2 : index
    %c0_218 = arith.constant 0 : index
    %c0_219 = arith.constant 0 : index
    %641 = vector.load %arg11[%c2_217, %c0_218, %c0_219] : memref<4x16x4xf32, #tpu.memory_space<vmem>>, vector<1x16x4xf32>
    %642 = vector.shape_cast %641 : vector<1x16x4xf32> to vector<16x4xf32>
    %cst_220 = arith.constant dense<0.000000e+00> : vector<16x512xf32>
    %643 = tpu.matmul %642, %589, %cst_220 {dimension_numbers = #tpu.dot_dimension_numbers<[1], [0], [0], [1], [0, 0, 1, 1], [], []>} : vector<16x4xf32>, vector<4x512xf32>, vector<16x512xf32> -> vector<16x512xf32>
    %644 = arith.addf %640, %643 : vector<16x512xf32>
    %c3_221 = arith.constant 3 : index
    %c0_222 = arith.constant 0 : index
    %c0_223 = arith.constant 0 : index
    %645 = vector.load %arg11[%c3_221, %c0_222, %c0_223] : memref<4x16x4xf32, #tpu.memory_space<vmem>>, vector<1x16x4xf32>
    %646 = vector.shape_cast %645 : vector<1x16x4xf32> to vector<16x4xf32>
    %cst_224 = arith.constant dense<0.000000e+00> : vector<16x512xf32>
    %647 = tpu.matmul %646, %633, %cst_224 {dimension_numbers = #tpu.dot_dimension_numbers<[1], [0], [0], [1], [0, 0, 1, 1], [], []>} : vector<16x4xf32>, vector<4x512xf32>, vector<16x512xf32> -> vector<16x512xf32>
    %648 = arith.addf %644, %647 : vector<16x512xf32>
    %c0_225 = arith.constant 0 : index
    %c0_226 = arith.constant 0 : index
    %649 = vector.load %arg12[%c0_225, %c0_226] : memref<16x1xf32, #tpu.memory_space<vmem>>, vector<16x1xf32>
    %650 = vector.broadcast %649 : vector<16x1xf32> to vector<16x512xf32>
    %651 = arith.addf %648, %650 : vector<16x512xf32>
    %c0_227 = arith.constant 0 : index
    %c0_228 = arith.constant 0 : index
    %652 = vector.load %arg13[%c0_227, %c0_228] : memref<16x1xf32, #tpu.memory_space<vmem>>, vector<16x1xf32>
    %c0_229 = arith.constant 0 : index
    %c0_230 = arith.constant 0 : index
    %653 = vector.load %arg14[%c0_229, %c0_230] : memref<16x1xf32, #tpu.memory_space<vmem>>, vector<16x1xf32>
    %cst_231 = arith.constant dense<0.000000e+00> : vector<16xf32>
    %654 = vector.multi_reduction <add>, %651, %cst_231 [1] : vector<16x512xf32> to vector<16xf32>
    %655 = vector.shape_cast %654 : vector<16xf32> to vector<16x1xf32>
    %656 = arith.mulf %651, %651 : vector<16x512xf32>
    %cst_232 = arith.constant dense<0.000000e+00> : vector<16xf32>
    %657 = vector.multi_reduction <add>, %656, %cst_232 [1] : vector<16x512xf32> to vector<16xf32>
    %658 = vector.shape_cast %657 : vector<16xf32> to vector<16x1xf32>
    %cst_233 = arith.constant 0.001953125 : f32
    %659 = vector.broadcast %cst_233 : f32 to vector<16x1xf32>
    %660 = arith.mulf %655, %659 : vector<16x1xf32>
    %cst_234 = arith.constant 0.001953125 : f32
    %661 = vector.broadcast %cst_234 : f32 to vector<16x1xf32>
    %662 = arith.mulf %658, %661 : vector<16x1xf32>
    %663 = arith.mulf %660, %660 : vector<16x1xf32>
    %664 = arith.subf %662, %663 : vector<16x1xf32>
    %665 = vector.broadcast %660 : vector<16x1xf32> to vector<16x512xf32>
    %666 = arith.subf %651, %665 : vector<16x512xf32>
    %cst_235 = arith.constant 9.99999974E-6 : f32
    %667 = vector.broadcast %cst_235 : f32 to vector<16x1xf32>
    %668 = arith.addf %664, %667 : vector<16x1xf32>
    %669 = math.rsqrt %668 : vector<16x1xf32>
    %670 = vector.broadcast %669 : vector<16x1xf32> to vector<16x512xf32>
    %671 = arith.mulf %666, %670 : vector<16x512xf32>
    %672 = vector.broadcast %652 : vector<16x1xf32> to vector<16x512xf32>
    %673 = arith.mulf %672, %671 : vector<16x512xf32>
    %674 = vector.broadcast %653 : vector<16x1xf32> to vector<16x512xf32>
    %675 = arith.addf %673, %674 : vector<16x512xf32>
    %cst_236 = arith.constant 0.000000e+00 : f32
    %676 = vector.broadcast %cst_236 : f32 to vector<16x512xf32>
    %677 = arith.maximumf %675, %676 : vector<16x512xf32>
    %c0_237 = arith.constant 0 : index
    %c0_238 = arith.constant 0 : index
    %678 = vector.load %arg15[%c0_237, %c0_238] : memref<16x512xf32, #tpu.memory_space<vmem>>, vector<16x512xf32>
    tpu.vector_store %arg15[%c0_237, %c0_238], %677 {strides = array<i32>} : memref<16x512xf32, #tpu.memory_space<vmem>>, vector<16x512xf32>,
    return
  }
}

</mosaic_0001>

<bundles_post_ra>
// kernel: tile.10
= control target key start
LH: loop header
LB: loop body
LE: loop exit
PB: predicated region body
PF: predicated region fallthrough
CT: control target
= control target key end

     0   :  { %s7_s6 = smov 3  ;;  %s21_s9 = smov 3  ;;  %vm4_vm0 = vcmask 130048   ;;  %vm11_vm1 = vcmask 1048448   ;;  %vm18_vm2 = vcmask 917248   ;;  %vm25_vm3 = vcmask 786048   ;;  %s119_s0 = inlined_call_operand.vmem [shape: s32[16,16], index: 0, kind: input, shape index: {}]   ;;  %s120_s1 = inlined_call_operand.vmem [shape: s32[256], index: 1, kind: output, shape index: {}]  }
   0x1   :  { %v61_v0 = vld [vmem:[%s119_s0 + $0x7] ss:$8 sm:%s7_s6]   ;;  %s75_s10 = smov 112   ;;  %v63_v1 = vld [vmem:[%s119_s0 + $0x5] ss:$8 sm:%s21_s9]   ;;  %s14_s13 = smov 3 }
   0x2   :  { %9 = vrot.lane.b32.xlu0 %v61_v0, %s75_s10  ;;  %s76_s14 = smov 80   ;;  %v62_v2 = vld [vmem:[%s119_s0 + $0x6] ss:$8 sm:%s14_s13]   ;;  %s28_s17 = smov 3  ;;  %vm32_vm4 = vcmask 654848   ;;  %vm39_vm5 = vcmask 523648  }
   0x3   :  { %23 = vrot.lane.b32.xlu1 %v63_v1, %s76_s14  ;;  %v64_v3 = vld [vmem:[%s119_s0 + $0x4] ss:$8 sm:%s28_s17]   ;;  %s35_s20 = smov 3  ;;  %s42_s21 = smov 3  ;;  %vm46_vm6 = vcmask 392448   ;;  %vm53_vm7 = vcmask 261248  }
   0x4   :  { %s77_s22 = smov 96   ;;  %s78_s23 = smov 64   ;;  %v65_v4 = vld [vmem:[%s119_s0 + $0x3] ss:$8 sm:%s35_s20]   ;;  %v66_v5 = vld [vmem:[%s119_s0 + $0x2] ss:$8 sm:%s42_s21]  }
   0x5   :  { %s2_s26 = smov 3  ;;  %s49_s29 = smov 3 }
   0x6   :  { %16 = vrot.lane.b32.xlu0 %v62_v2, %s77_s22  ;;  %v3_v6 = vld [vmem:[%s119_s0] ss:$8 sm:%s2_s26]   ;;  %s79_s3 = smov 48   ;;  %s80_s4 = smov 32  }
   0x7   :  { %30 = vrot.lane.b32.xlu1 %v64_v3, %s78_s23  ;;  %5 = vst.msk [vmem:[#allocation0] sm:$0x3] %vm4_vm0, %v3_v6   ;;  %v67_v7 = vld [vmem:[%s119_s0 + $0x1] ss:$8 sm:%s49_s29]   ;;  %s81_s0 = smov 16  }
   0xa   :  { %37 = vrot.lane.b32.xlu0 %v65_v4, %s79_s3 }
   0xb   :  { %44 = vrot.lane.b32.xlu1 %v66_v5, %s80_s4 }
   0xe   :  { %51 = vrot.lane.b32.xlu0 %v67_v7, %s81_s0 }
  0x74   :  { %v10_v8 = vpop.permute.xlu0 %9  }
  0x75   :  { %12 = vst.msk [vmem:[#allocation0] sm:$0x3] %vm11_vm1, %v10_v8   ;;  %v24_v9 = vpop.permute.xlu1 %23  }
  0x78   :  { %v17_v10 = vpop.permute.xlu0 %16  }
  0x79   :  { %19 = vst.msk [vmem:[#allocation0] sm:$0x3] %vm18_vm2, %v17_v10   ;;  %v31_v11 = vpop.permute.xlu1 %30  }
  0x7a   :  { %26 = vst.msk [vmem:[#allocation0] sm:$0x3] %vm25_vm3, %v24_v9  }
  0x7b   :  { %33 = vst.msk [vmem:[#allocation0] sm:$0x3] %vm32_vm4, %v31_v11  }
  0x7c   :  { %v38_v12 = vpop.permute.xlu0 %37  }
  0x7d   :  { %40 = vst.msk [vmem:[#allocation0] sm:$0x3] %vm39_vm5, %v38_v12   ;;  %v45_v13 = vpop.permute.xlu1 %44  }
  0x7e   :  { %47 = vst.msk [vmem:[#allocation0] sm:$0x3] %vm46_vm6, %v45_v13  }
  0x80   :  { %v52_v14 = vpop.permute.xlu0 %51  }
  0x81   :  { %54 = vst.msk [vmem:[#allocation0] sm:$0x3] %vm53_vm7, %v52_v14  }
  0x88   :  { %v58_v15 = vld [vmem:[#allocation0] sm:$0x3] }
  0x89   :  { %60 = vst [vmem:[%s120_s1] sm:$0x3] %v58_v15 }

// kernel: tile.17
= control target key start
LH: loop header
LB: loop body
LE: loop exit
PB: predicated region body
PF: predicated region fallthrough
CT: control target
= control target key end

     0   :  { %s89_s8 = smov 112   ;;  %s90_s11 = smov 80   ;;  %vm3_vm0 = vcmask 130048   ;;  %vm9_vm1 = vcmask 1048448   ;;  %vm15_vm2 = vcmask 917248   ;;  %vm21_vm3 = vcmask 786048   ;;  %s142_s0 = inlined_call_operand.vmem [shape: s32[32,16], index: 0, kind: input, shape index: {}]   ;;  %s143_s1 = inlined_call_operand.vmem [shape: s32[1,512], index: 1, kind: output, shape index: {}]  }
   0x1   :  { %v72_v0 = vld [vmem:[%s142_s0 + $0x7] ss:$8 sm:$0xf]   ;;  %v74_v1 = vld [vmem:[%s142_s0 + $0x5] ss:$8 sm:$0xf]  }
   0x2   :  { %7 = vrot.lane.b32.xlu0 %v72_v0, %s89_s8  ;;  %19 = vrot.lane.b32.xlu1 %v74_v1, %s90_s11  ;;  %v73_v2 = vld [vmem:[%s142_s0 + $0x6] ss:$8 sm:$0xf]   ;;  %v75_v3 = vld [vmem:[%s142_s0 + $0x4] ss:$8 sm:$0xf]  }
   0x3   :  { %s91_s16 = smov 96   ;;  %v2_v4 = vld [vmem:[%s142_s0] ss:$8 sm:$0xf]   ;;  %s92_s19 = smov 64   ;;  %vm27_vm4 = vcmask 654848  }
   0x4   :  { %v76_v5 = vld [vmem:[%s142_s0 + $0x3] ss:$8 sm:$0xf]   ;;  %4 = vst.msk [vmem:[#allocation0] ss:$8 sm:$0xf] %vm3_vm0, %v2_v4  }
   0x5   :  { %v77_v6 = vld [vmem:[%s142_s0 + $0x2] ss:$8 sm:$0xf]   ;;  %s93_s24 = smov 48   ;;  %s94_s25 = smov 32   ;;  %vm33_vm5 = vcmask 523648  }
   0x6   :  { %13 = vrot.lane.b32.xlu0 %v73_v2, %s91_s16  ;;  %25 = vrot.lane.b32.xlu1 %v75_v3, %s92_s19  ;;  %v78_v7 = vld [vmem:[%s142_s0 + $0x1] ss:$8 sm:$0xf]   ;;  %s95_s0 = smov 16   ;;  %vm39_vm6 = vcmask 392448   ;;  %vm45_vm7 = vcmask 261248  }
   0xa   :  { %31 = vrot.lane.b32.xlu0 %v76_v5, %s93_s24  ;;  %37 = vrot.lane.b32.xlu1 %v77_v6, %s94_s25 }
   0xe   :  { %43 = vrot.lane.b32.xlu0 %v78_v7, %s95_s0 }
  0x74   :  { %v8_v8 = vpop.permute.xlu0 %7   ;;  %v20_v9 = vpop.permute.xlu1 %19  }
  0x75   :  { %10 = vst.msk [vmem:[#allocation0] ss:$8 sm:$0xf] %vm9_vm1, %v8_v8  }
  0x78   :  { %v14_v10 = vpop.permute.xlu0 %13   ;;  %v26_v11 = vpop.permute.xlu1 %25  }
  0x79   :  { %16 = vst.msk [vmem:[#allocation0] ss:$8 sm:$0xf] %vm15_vm2, %v14_v10  }
  0x7a   :  { %22 = vst.msk [vmem:[#allocation0] ss:$8 sm:$0xf] %vm21_vm3, %v20_v9  }
  0x7b   :  { %28 = vst.msk [vmem:[#allocation0] ss:$8 sm:$0xf] %vm27_vm4, %v26_v11  }
  0x7c   :  { %v32_v12 = vpop.permute.xlu0 %31   ;;  %v38_v13 = vpop.permute.xlu1 %37  }
  0x7d   :  { %34 = vst.msk [vmem:[#allocation0] ss:$8 sm:$0xf] %vm33_vm5, %v32_v12  }
  0x7e   :  { %40 = vst.msk [vmem:[#allocation0] ss:$8 sm:$0xf] %vm39_vm6, %v38_v13  }
  0x80   :  { %v44_v14 = vpop.permute.xlu0 %43  }
  0x81   :  { %46 = vst.msk [vmem:[#allocation0] ss:$8 sm:$0xf] %vm45_vm7, %v44_v14  }
  0x88   :  { %v50_v15 = vld [vmem:[#allocation0] sm:$0x1]  ;;  %v54_v16 = vld [vmem:[#allocation0 + $0x8] sm:$0x1]  ;;  %v59_v17 = vld [vmem:[#allocation0 + $0x10] sm:$0x1] }
  0x89   :  { %52 = vst [vmem:[%s143_s1] sm:$0x1] %v50_v15  ;;  %79 = vst [vmem:[%s143_s1 + $0x1] sm:$0x1] %v54_v16  ;;  %v65_v18 = vld [vmem:[#allocation0 + $0x18] sm:$0x1] }
  0x8a   :  { %80 = vst [vmem:[%s143_s1 + $0x2] sm:$0x1] %v59_v17  ;;  %81 = vst [vmem:[%s143_s1 + $0x3] sm:$0x1] %v65_v18 }

// kernel: _lambda_.1
= control target key start
LH: loop header
LB: loop body
LE: loop exit
PB: predicated region body
PF: predicated region fallthrough
CT: control target
= control target key end

     0   :  { %20 = vsyncpa [#allocation3], 0  ;;  %s6288_s0 = inlined_call_operand.vmem [shape: f32[4,4,512], index: 0, kind: input, shape index: {}]   ;;  %s6289_s1 = inlined_call_operand.vmem [shape: s32[1,512], index: 1, kind: input, shape index: {}]   ;;  %s6290_s2 = inlined_call_operand.vmem [shape: s32[1,512], index: 2, kind: input, shape index: {}]   ;;  %s6291_s3 = inlined_call_operand.vmem [shape: f32[4,4,9], index: 3, kind: input, shape index: {}]   ;;  %s6292_s4 = inlined_call_operand.vmem [shape: f32[4,4,1], index: 4, kind: input, shape index: {}]   ;;  %s6293_s5 = inlined_call_operand.vmem [shape: f32[4,4,1], index: 5, kind: input, shape index: {}]   ;;  %s6294_s6 = inlined_call_operand.vmem [shape: f32[4,4,1], index: 6, kind: input, shape index: {}]   ;;  %s6295_s7 = inlined_call_operand.vmem [shape: f32[4,4], index: 7, kind: input, shape index: {}]   ;;  %s6296_s8 = inlined_call_operand.vmem [shape: f32[4], index: 8, kind: input, shape index: {}]   ;;  %s6297_s9 = inlined_call_operand.vmem [shape: f32[4], index: 9, kind: input, shape index: {}]   ;;  %s6298_s10 = inlined_call_operand.vmem [shape: f32[4], index: 10, kind: input, shape index: {}]   ;;  %s6299_s11 = inlined_call_operand.vmem [shape: f32[4,16,4], index: 11, kind: input, shape index: {}]   ;;  %s6300_s12 = inlined_call_operand.vmem [shape: f32[16,1], index: 12, kind: input, shape index: {}]   ;;  %s6301_s13 = inlined_call_operand.vmem [shape: f32[16,1], index: 13, kind: input, shape index: {}]   ;;  %s6302_s14 = inlined_call_operand.vmem [shape: f32[16,1], index: 14, kind: input, shape index: {}]   ;;  %s6303_s15 = inlined_call_operand.vmem [shape: f32[16,512], index: 15, kind: output, shape index: {}]  }
   0x1   :  { %21 = vsyncpa [#allocation5], 0  ;;  %s53_s20 = sshll.u32 %s6296_s8, 4  ;;  %s54_s20 = int_to_ptr.vmem [resolvable:$true] %s53_s20 }
   0x2   :  { %22 = vsyncpa [#allocation8], 0  ;;  %s43_s23 = sshll.u32 %s6295_s7, 4  ;;  %s3083_s24 = scalar_lea.vmem %s54_s20, 16  ;;  %s44_s23 = int_to_ptr.vmem [resolvable:$true] %s43_s23 }
   0x3   :  { %p3084_p0 = scmp.ne.s32.totalorder %s54_s20, %s3083_s24  ;;  %p3088_p1 = scmp.lt.s32.totalorder %s54_s20, %s54_s20 }
   0x4   :  { %p3089_p2 = scmp.lt.s32.totalorder %s3083_s24, %s3083_s24 }
   0x6   :  { %p3090_p3 = por %p3089_p2, %p3088_p1 }
   0x8   :  { %p3091_p4 = pnand %p3090_p3, %p3084_p0 }
   0xa   :  { %3094 = shalt.err (!%p3091_p4)
}
   0xb   :  { %s3137_s25 = smov [#allocation4]   ;;  %s3095_s26 = scalar_lea.vmem %s44_s23, 64 }
   0xc   :  { %56 = dma.vmem_to_smem %s54_s20, 16, %s3137_s25, [#allocation5]  }
   0xd   :  { %p3096_p5 = scmp.ne.s32.totalorder %s44_s23, %s3095_s26  ;;  %p3100_p6 = scmp.lt.s32.totalorder %s44_s23, %s44_s23 }
   0xe   :  { %p3101_p7 = scmp.lt.s32.totalorder %s3095_s26, %s3095_s26 }
  0x10   :  { %p3102_p8 = por %p3101_p7, %p3100_p6 }
  0x12   :  { %p3103_p9 = pnand %p3102_p8, %p3096_p5 }
  0x14   :  { %3106 = shalt.err (!%p3103_p9)
}
  0x15   :  { %s3138_s8 = smov [#allocation2]   ;;  %s63_s28 = sshll.u32 %s6297_s9, 4  ;;  %s64_s28 = int_to_ptr.vmem [resolvable:$true] %s63_s28 }
  0x16   :  { %46 = dma.vmem_to_smem %s44_s23, 64, %s3138_s8, [#allocation3]  }
  0x17   :  { %s73_s16 = sshll.u32 %s6298_s10, 4  ;;  %s3107_s17 = scalar_lea.vmem %s64_s28, 16  ;;  %s74_s16 = int_to_ptr.vmem [resolvable:$true] %s73_s16 }
  0x18   :  { %p3108_p10 = scmp.ne.s32.totalorder %s64_s28, %s3107_s17  ;;  %p3112_p11 = scmp.lt.s32.totalorder %s64_s28, %s64_s28 }
  0x19   :  { %p3113_p12 = scmp.lt.s32.totalorder %s3107_s17, %s3107_s17 }
  0x1b   :  { %p3114_p13 = por %p3113_p12, %p3112_p11 }
  0x1d   :  { %p3115_p0 = pnand %p3114_p13, %p3108_p10 }
  0x1f   :  { %3118 = shalt.err (!%p3115_p0)
}
  0x20   :  { %s3139_s18 = smov [#allocation6]   ;;  %s3119_s19 = scalar_lea.vmem %s74_s16, 16 }
  0x21   :  { %66 = dma.vmem_to_smem %s64_s28, 16, %s3139_s18, [#allocation5]  }
  0x22   :  { %p3120_p1 = scmp.ne.s32.totalorder %s74_s16, %s3119_s19  ;;  %p3124_p2 = scmp.lt.s32.totalorder %s74_s16, %s74_s16 }
  0x23   :  { %p3125_p3 = scmp.lt.s32.totalorder %s3119_s19, %s3119_s19 }
  0x25   :  { %p3126_p4 = por %p3125_p3, %p3124_p2 }
  0x27   :  { %p3127_p5 = pnand %p3126_p4, %p3120_p1 }
  0x29   :  { %3130 = shalt.err (!%p3127_p5)
}
  0x2a   :  { %s3140_s9 = smov [#allocation7]  }
  0x2b   :  { %76 = dma.vmem_to_smem %s74_s16, 16, %s3140_s9, [#allocation8]  }
  0x2c   :  { %3131 = dma.done.wait [#allocation3], 64  }
  0x2d   :  { %3132 = vsyncadd [#allocation3], 4294967232 }
  0x2e   :  { %3133 = dma.done.wait [#allocation5], 32  }
  0x2f   :  { %3134 = vsyncadd [#allocation5], 4294967264 }
  0x30   :  { %3135 = dma.done.wait [#allocation8], 16  }
  0x31   :  { %3136 = vsyncadd [#allocation8], 4294967280 }
  0x32   :  { %97 = sfence }
  0x33   :  { %v3267_v0 = vld [vmem:[%s6291_s3 + $0x4] sm:$0xf]  ;;  %v3272_v1 = vld [vmem:[%s6291_s3] sm:$0xf]  ;;  %v6306_v2 = vmov 4   ;;  %v6304_v3 = vmov 0  }
  0x34   :  { %3026 = vset.pattern.permute.xlu1 %v6306_v2  ;;  %3025 = vset.pattern.permute.xlu0 %v6306_v2  ;;  %v3143_v4 = vmov 1   ;;  %v3144_v5 = vmov 2   ;;  %v3286_v6 = vld [vmem:[%s6288_s0] sm:$0xff]  ;;  %v3291_v7 = vld [vmem:[%s6288_s0 + $0x8] sm:$0xff]  ;;  %s3145_s27 = smov 17   ;;  %v3308_v10 = vld [vmem:[%s6288_s0 + $0x10] sm:$0xff] }
  0x35   :  { %606 = vperm.xlu1 %3026, %v3267_v0   ;;  %105 = vperm.xlu0 %3025, %v3272_v1   ;;  %v3296_v8 = vld [vmem:[%s6291_s3 + $0x8] sm:$0xf]  ;;  %v3302_v9 = vcombine.high %v3291_v7, %v3291_v7  ;;  %v3146_v11 = vmov 3   ;;  %v3313_v12 = vcombine.high %v3308_v10, %v3308_v10  ;;  %s3147_s30 = smov 102   ;;  %v3324_v13 = vcombine.high %v3286_v6, %v3286_v6  ;;  %s3149_s16 = smov 16   ;;  %v3333_v15 = vld [vmem:[%s6288_s0 + $0x18] sm:$0xff] }
  0x36   :  { %v3148_v14 = vmov 5   ;;  %v3339_v16 = vcombine.high %v3333_v15, %v3333_v15  ;;  %s3150_s19 = smov 96   ;;  %v3347_v17 = vld [vmem:[%s6288_s0 + $0x20] sm:$0xff]  ;;  %v3352_v18 = vld [vmem:[%s6288_s0 + $0x28] sm:$0xff]  ;;  %s3151_s22 = smov 76   ;;  %v3153_v20 = vmov 6  }
  0x37   :  { %v3359_v19 = vcombine.high %v3352_v18, %v3352_v18  ;;  %s3152_s23 = smov 15   ;;  %s3154_s24 = smov 90   ;;  %v3157_v21 = vmov 7   ;;  %v3410_v22 = vcombine.high %v3347_v17, %v3347_v17  ;;  %v3161_v23 = vmov 8   ;;  %v2889_v53 = vld [vmem:[%s6292_s4 + $0x4] sm:$0xf] }
  0x38   :  { %s3155_s25 = smov 64   ;;  %s3156_s26 = smov 1   ;;  %v2895_v62 = vld [vmem:[%s6292_s4 + $0x8] sm:$0xf] }
  0x39   :  { %3027 = vset.pattern.permute.xlu1 %v6304_v3  ;;  %3029 = vset.pattern.permute.xlu0 %v3143_v4  ;;  %s3158_s8 = smov 6   ;;  %s3159_s7 = smov 52  }
  0x3a   :  { %661 = vperm.xlu1 %3027, %v3267_v0   ;;  %711 = vperm.xlu0 %3029, %v3267_v0   ;;  %s3162_s28 = smov 122   ;;  %s3163_s29 = smov 12  }
  0x3b   :  { %s3166_s17 = smov 116   ;;  %s3167_s18 = smov 112  }
  0x3c   :  { %s3169_s20 = smov 111   ;;  %s3170_s21 = smov 26  }
  0x3d   :  { %s5713_s9 = sld [smem:[#allocation2 + $0x103]] }
  0x3e   :  { %3028 = vset.pattern.permute.xlu1 %v3143_v4  ;;  %3032 = vset.pattern.permute.xlu0 %v3144_v5  ;;  %s5715_s10 = sld [smem:[#allocation2 + $0x183]] }
  0x3f   :  { %212 = vperm.xlu1 %3028, %v3272_v1   ;;  %264 = vperm.xlu0 %3032, %v3272_v1  }
  0x43   :  { %3030 = vset.pattern.permute.xlu1 %v6306_v2  ;;  %118 = vrot.lane.b32.xlu0 %v3286_v6, %s3145_s27 }
  0x44   :  { %1107 = vperm.xlu1 %3030, %v3296_v8   ;;  %3035 = vset.pattern.permute.xlu0 %v3146_v11 }
  0x47   :  { %124 = vrot.lane.b32.xlu0 %v3302_v9, %s3145_s27 }
  0x48   :  { %3031 = vset.pattern.permute.xlu1 %v6304_v3 }
  0x49   :  { %1162 = vperm.xlu1 %3031, %v3296_v8  }
  0x4b   :  { %621 = vrot.lane.b32.xlu0 %v3313_v12, %s3147_s30 }
  0x4d   :  { %3033 = vset.pattern.permute.xlu1 %v3144_v5 }
  0x4e   :  { %763 = vperm.xlu1 %3033, %v3267_v0  }
  0x4f   :  { %314 = vperm.xlu0 %3035, %v3272_v1  }
  0x52   :  { %3034 = vset.pattern.permute.xlu1 %v3143_v4 }
  0x53   :  { %1212 = vperm.xlu1 %3034, %v3296_v8   ;;  %122 = vrot.lane.b32.xlu0 %v3291_v7, %s3145_s27 }
  0x54   :  { %3039 = vset.pattern.permute.xlu0 %v3148_v14 }
  0x57   :  { %175 = vrot.lane.b32.xlu0 %v3324_v13, %s3149_s16  ;;  %120 = vrot.lane.b32.xlu1 %v3324_v13, %s3145_s27  ;;  %s3160_s27 = smov 127  }
  0x58   :  { %3036 = vset.pattern.permute.xlu1 %v3146_v11 }
  0x5b   :  { %623 = vrot.lane.b32.xlu0 %v3333_v15, %s3147_s30  ;;  %619 = vrot.lane.b32.xlu1 %v3308_v10, %s3147_s30 }
  0x5f   :  { %674 = vrot.lane.b32.xlu0 %v3313_v12, %s3150_s19  ;;  %625 = vrot.lane.b32.xlu1 %v3339_v16, %s3147_s30  ;;  %s3164_s30 = smov 113  }
  0x63   :  { %1120 = vrot.lane.b32.xlu0 %v3347_v17, %s3151_s22  ;;  %813 = vperm.xlu1 %3036, %v3267_v0  }
  0x67   :  { %1126 = vrot.lane.b32.xlu0 %v3359_v19, %s3151_s22  ;;  %3037 = vset.pattern.permute.xlu1 %v3144_v5  ;;  %v2901_v5 = vld [vmem:[%s6292_s4 + $0xc] sm:$0xf] }
  0x68   :  { %1264 = vperm.xlu1 %3037, %v3296_v8  }
  0x6b   :  { %863 = vperm.xlu0 %3039, %v3267_v0  }
  0x6c   :  { %173 = vrot.lane.b32.xlu1 %v3286_v6, %s3149_s16 }
  0x6d   :  { %3038 = vset.pattern.permute.xlu1 %v3148_v14 }
  0x6f   :  { %223 = vrot.lane.b32.xlu0 %v3286_v6, %s3152_s23 }
  0x70   :  { %179 = vrot.lane.b32.xlu1 %v3302_v9, %s3149_s16  ;;  %3042 = vset.pattern.permute.xlu0 %v3153_v20 }
  0x73   :  { %229 = vrot.lane.b32.xlu0 %v3302_v9, %s3152_s23 }
  0x74   :  { %672 = vrot.lane.b32.xlu1 %v3308_v10, %s3150_s19 }
  0x77   :  { %722 = vrot.lane.b32.xlu0 %v3308_v10, %s3154_s24 }
  0x78   :  { %678 = vrot.lane.b32.xlu1 %v3339_v16, %s3150_s19 }
  0x7b   :  { %728 = vrot.lane.b32.xlu0 %v3339_v16, %s3154_s24 }
  0x7c   :  { %1124 = vrot.lane.b32.xlu1 %v3352_v18, %s3151_s22 }
  0x7f   :  { %1173 = vrot.lane.b32.xlu0 %v3347_v17, %s3155_s25 }
  0x80   :  { %364 = vperm.xlu1 %3038, %v3272_v1  }
  0x83   :  { %1179 = vrot.lane.b32.xlu0 %v3359_v19, %s3155_s25 }
  0x84   :  { %3040 = vset.pattern.permute.xlu1 %v3146_v11 }
  0x85   :  { %1314 = vperm.xlu1 %3040, %v3296_v8  }
  0x87   :  { %915 = vperm.xlu0 %3042, %v3267_v0  }
  0x89   :  { %177 = vrot.lane.b32.xlu1 %v3291_v7, %s3149_s16  ;;  %s3165_s16 = smov 38  }
  0x8a   :  { %3041 = vset.pattern.permute.xlu1 %v3153_v20 }
  0x8b   :  { %275 = vrot.lane.b32.xlu0 %v3286_v6, %s3156_s26 }
  0x8c   :  { %3045 = vset.pattern.permute.xlu0 %v3157_v21 }
  0x8d   :  { %225 = vrot.lane.b32.xlu1 %v3324_v13, %s3152_s23 }
  0x8f   :  { %281 = vrot.lane.b32.xlu0 %v3302_v9, %s3156_s26 }
  0x91   :  { %676 = vrot.lane.b32.xlu1 %v3333_v15, %s3150_s19  ;;  %s3168_s19 = smov 32  }
  0x93   :  { %774 = vrot.lane.b32.xlu0 %v3308_v10, %s3158_s8 }
  0x95   :  { %724 = vrot.lane.b32.xlu1 %v3313_v12, %s3154_s24 }
  0x97   :  { %780 = vrot.lane.b32.xlu0 %v3339_v16, %s3158_s8 }
  0x99   :  { %1122 = vrot.lane.b32.xlu1 %v3410_v22, %s3151_s22  ;;  %s5721_s22 = sld [smem:[#allocation4 + $0x2]] }
  0x9b   :  { %1223 = vrot.lane.b32.xlu0 %v3347_v17, %s3159_s7 }
  0x9d   :  { %1177 = vrot.lane.b32.xlu1 %v3352_v18, %s3155_s25 }
  0x9f   :  { %1229 = vrot.lane.b32.xlu0 %v3359_v19, %s3159_s7 }
  0xa1   :  { %416 = vperm.xlu1 %3041, %v3272_v1  }
  0xa3   :  { %965 = vperm.xlu0 %3045, %v3267_v0  }
  0xa5   :  { %3043 = vset.pattern.permute.xlu1 %v3148_v14 }
  0xa6   :  { %1364 = vperm.xlu1 %3043, %v3296_v8  }
  0xa7   :  { %325 = vrot.lane.b32.xlu0 %v3286_v6, %s3160_s27 }
  0xa8   :  { %3048 = vset.pattern.permute.xlu0 %v3161_v23 }
  0xaa   :  { %227 = vrot.lane.b32.xlu1 %v3291_v7, %s3152_s23  ;;  %s5725_s23 = sld [smem:[#allocation4 + $0x3]] }
  0xab   :  { %329 = vrot.lane.b32.xlu0 %v3291_v7, %s3160_s27  ;;  %3044 = vset.pattern.permute.xlu1 %v3157_v21 }
  0xae   :  { %277 = vrot.lane.b32.xlu1 %v3324_v13, %s3156_s26 }
  0xaf   :  { %824 = vrot.lane.b32.xlu0 %v3308_v10, %s3162_s28 }
  0xb2   :  { %726 = vrot.lane.b32.xlu1 %v3333_v15, %s3154_s24 }
  0xb3   :  { %828 = vrot.lane.b32.xlu0 %v3333_v15, %s3162_s28 }
  0xb4   :  { %v3442_v24 = vpop.permute.xlu1 %606  ;;  %v3444_v25 = vpop.permute.xlu0 %105 }
  0xb6   :  { %776 = vrot.lane.b32.xlu1 %v3313_v12, %s3158_s8 }
  0xb7   :  { %1275 = vrot.lane.b32.xlu0 %v3347_v17, %s3163_s29 }
  0xb9   :  { %v3450_v26 = vpop.permute.xlu1 %661  ;;  %v3452_v27 = vpop.permute.xlu0 %711 }
  0xba   :  { %6437 = vst [vmem:[#allocation12_spill] sm:$0xff] %v3450_v26  ;;  %6438 = vst [vmem:[#allocation13_spill] sm:$0xff] %v3452_v27  ;;  %1175 = vrot.lane.b32.xlu1 %v3410_v22, %s3155_s25 }
  0xbb   :  { %1281 = vrot.lane.b32.xlu0 %v3359_v19, %s3163_s29 }
  0xbe   :  { %v3458_v28 = vpop.permute.xlu1 %212  ;;  %v3460_v29 = vpop.permute.xlu0 %264  ;;  %1227 = vrot.lane.b32.xlu1 %v3352_v18, %s3159_s7 }
  0xbf   :  { %6439 = vst [vmem:[#allocation14_spill] sm:$0xff] %v3458_v28  ;;  %6440 = vst [vmem:[#allocation15_spill] sm:$0xff] %v3460_v29  ;;  %1016 = vperm.xlu0 %3048, %v3267_v0  }
  0xc2   :  { %v3465_v30 = vpop.permute.xlu0 %118  ;;  %466 = vperm.xlu1 %3044, %v3272_v1  }
  0xc3   :  { %6441 = vst [vmem:[#allocation16_spill] sm:$0xff] %v3465_v30  ;;  %v3468_v31 = vpop.permute.xlu1 %1107  ;;  %3049 = vset.pattern.permute.xlu0 %v6304_v3 }
  0xc4   :  { %162 = vperm.xlu0 %3049, %v3272_v1  }
  0xc6   :  { %v3472_v32 = vpop.permute.xlu0 %124  ;;  %3046 = vset.pattern.permute.xlu1 %v3153_v20  ;;  %v126_v20 = vlaneseq }
  0xc7   :  { %6442 = vst [vmem:[#allocation17_spill] sm:$0xff] %v3472_v32  ;;  %1403 = vperm.xlu1 %3046, %v3296_v8  }
  0xc8   :  { %v3476_v33 = vpop.permute.xlu1 %1162  ;;  %375 = vrot.lane.b32.xlu0 %v3286_v6, %s3164_s30 }
  0xca   :  { %v3480_v34 = vpop.permute.xlu0 %621 }
  0xcb   :  { %279 = vrot.lane.b32.xlu1 %v3291_v7, %s3156_s26 }
  0xcc   :  { %379 = vrot.lane.b32.xlu0 %v3291_v7, %s3164_s30  ;;  %3047 = vset.pattern.permute.xlu1 %v3161_v23 }
  0xcd   :  { %v3487_v35 = vpop.permute.xlu1 %763 }
  0xce   :  { %6443 = vst [vmem:[#allocation18_spill] sm:$0xff] %v3487_v35  ;;  %v3489_v36 = vpop.permute.xlu0 %314 }
  0xcf   :  { %6444 = vst [vmem:[#allocation19_spill] sm:$0xff] %v3489_v36  ;;  %327 = vrot.lane.b32.xlu1 %v3324_v13, %s3160_s27 }
  0xd0   :  { %874 = vrot.lane.b32.xlu0 %v3308_v10, %s3165_s16 }
  0xd2   :  { %v3495_v37 = vpop.permute.xlu1 %1212  ;;  %v3497_v38 = vpop.permute.xlu0 %122 }
  0xd3   :  { %6445 = vst [vmem:[#allocation20_spill] sm:$0xff] %v3497_v38  ;;  %778 = vrot.lane.b32.xlu1 %v3333_v15, %s3158_s8 }
  0xd4   :  { %878 = vrot.lane.b32.xlu0 %v3333_v15, %s3165_s16 }
  0xd6   :  { %v3503_v39 = vpop.permute.xlu0 %175  ;;  %v3505_v40 = vpop.permute.xlu1 %120 }
  0xd7   :  { %6446 = vst [vmem:[#allocation21_spill] sm:$0xff] %v3503_v39  ;;  %6447 = vst [vmem:[#allocation22_spill] sm:$0xff] %v3505_v40  ;;  %826 = vrot.lane.b32.xlu1 %v3313_v12, %s3162_s28  ;;  %v3656_v39 = vld [vmem:[%s6289_s1] sm:$0xf]  ;;  %s5681_s1 = sld [smem:[#allocation2 + $0x100]] }
  0xd8   :  { %1325 = vrot.lane.b32.xlu0 %v3347_v17, %s3166_s17  ;;  %6478 = vst [vmem:[#allocation53_spill] sm:$0xff] %v3656_v39  ;;  %vm133_vm2 = vcmp.ge.s32.totalorder %v3656_v39, 1  ;;  %vm632_vm4 = vcmp.ge.s32.totalorder %v3656_v39, 6  ;;  %vm1133_vm8 = vcmp.ge.s32.totalorder %v3656_v39, 12  ;;  %vm1375_vm13 = vcmp.lt.s32.totalorder %v3656_v39, 4 }
  0xda   :  { %v3511_v41 = vpop.permute.xlu0 %623  ;;  %v3513_v42 = vpop.permute.xlu1 %619 }
  0xdb   :  { %6448 = vst [vmem:[#allocation23_spill] sm:$0xff] %v3511_v41  ;;  %1225 = vrot.lane.b32.xlu1 %v3410_v22, %s3159_s7 }
  0xdc   :  { %1329 = vrot.lane.b32.xlu0 %v3352_v18, %s3166_s17 }
  0xde   :  { %v3519_v43 = vpop.permute.xlu0 %674  ;;  %v3521_v44 = vpop.permute.xlu1 %625 }
  0xdf   :  { %6449 = vst [vmem:[#allocation24_spill] sm:$0xff] %v3519_v43  ;;  %1277 = vrot.lane.b32.xlu1 %v3410_v22, %s3163_s29 }
  0xe0   :  { %381 = vrot.lane.b32.xlu0 %v3302_v9, %s3164_s30 }
  0xe2   :  { %v3527_v45 = vpop.permute.xlu0 %1120  ;;  %v3529_v46 = vpop.permute.xlu1 %813 }
  0xe3   :  { %6450 = vst [vmem:[#allocation25_spill] sm:$0xff] %v3527_v45  ;;  %6451 = vst [vmem:[#allocation26_spill] sm:$0xff] %v3529_v46  ;;  %517 = vperm.xlu1 %3047, %v3272_v1  }
  0xe4   :  { %429 = vrot.lane.b32.xlu0 %v3324_v13, %s3167_s18 }
  0xe6   :  { %v3534_v47 = vpop.permute.xlu0 %1126 }
  0xe7   :  { %3050 = vset.pattern.permute.xlu1 %v3157_v21  ;;  %v3537_v48 = vpop.permute.xlu1 %1264 }
  0xe8   :  { %880 = vrot.lane.b32.xlu0 %v3339_v16, %s3165_s16  ;;  %1440 = vperm.xlu1 %3050, %v3296_v8  }
  0xea   :  { %v3542_v49 = vpop.permute.xlu0 %863 }
  0xeb   :  { %6452 = vst [vmem:[#allocation27_spill] sm:$0xff] %v3542_v49  ;;  %v3544_v50 = vpop.permute.xlu1 %173 }
  0xec   :  { %6453 = vst [vmem:[#allocation28_spill] sm:$0xff] %v3544_v50  ;;  %928 = vrot.lane.b32.xlu0 %v3313_v12, %s3168_s19  ;;  %331 = vrot.lane.b32.xlu1 %v3302_v9, %s3160_s27  ;;  %s5677_s27 = sld [smem:[#allocation2]] }
  0xed   :  { %3051 = vset.pattern.permute.xlu1 %v3161_v23  ;;  %v3624_v23 = vand.u32 127, %v126_v20 }
  0xee   :  { %v3551_v51 = vpop.permute.xlu0 %223 }
  0xef   :  { %6454 = vst [vmem:[#allocation29_spill] sm:$0xff] %v3551_v51  ;;  %v3553_v52 = vpop.permute.xlu1 %179  ;;  %vm6365_vm0 = vcmp.lt.s32.totalorder %v3624_v23, 6  ;;  %vm6376_vm1 = vcmp.lt.s32.totalorder %v3624_v23, 52 }
  0xf0   :  { %6455 = vst [vmem:[#allocation30_spill] sm:$0xff] %v3553_v52  ;;  %1331 = vrot.lane.b32.xlu0 %v3359_v19, %s3166_s17  ;;  %377 = vrot.lane.b32.xlu1 %v3324_v13, %s3164_s30  ;;  %s5699_s30 = sld [smem:[#allocation2 + $0x2]] }
  0xf2   :  { %v3562_v54 = vpop.permute.xlu0 %229 }
  0xf3   :  { %6456 = vst [vmem:[#allocation31_spill] sm:$0xff] %v3562_v54  ;;  %v3564_v55 = vpop.permute.xlu1 %672 }
  0xf4   :  { %6457 = vst [vmem:[#allocation32_spill] sm:$0xff] %v3564_v55  ;;  %1031 = vperm.xlu0 %3049, %v2889_v53   ;;  %830 = vrot.lane.b32.xlu1 %v3339_v16, %s3162_s28  ;;  %s5679_s28 = sld [smem:[#allocation2 + $0x80]] }
  0xf6   :  { %v3568_v56 = vpop.permute.xlu0 %722 }
  0xf7   :  { %6458 = vst [vmem:[#allocation33_spill] sm:$0xff] %v3568_v56  ;;  %v3570_v57 = vpop.permute.xlu1 %678  ;;  %v2900_v56 = vld [vmem:[%s6291_s3 + $0xc] sm:$0xf]  ;;  %s5691_s3 = sld [smem:[#allocation2 + $0x81]] }
  0xf8   :  { %6459 = vst [vmem:[#allocation34_spill] sm:$0xff] %v3570_v57  ;;  %479 = vrot.lane.b32.xlu0 %v3324_v13, %s3169_s20  ;;  %876 = vrot.lane.b32.xlu1 %v3313_v12, %s3165_s16  ;;  %s5701_s16 = sld [smem:[#allocation2 + $0x82]] }
  0xfa   :  { %v3576_v58 = vpop.permute.xlu0 %728 }
  0xfb   :  { %6460 = vst [vmem:[#allocation35_spill] sm:$0xff] %v3576_v58  ;;  %v3578_v59 = vpop.permute.xlu1 %1124 }
  0xfc   :  { %6461 = vst [vmem:[#allocation36_spill] sm:$0xff] %v3578_v59  ;;  %932 = vrot.lane.b32.xlu0 %v3339_v16, %s3168_s19  ;;  %1279 = vrot.lane.b32.xlu1 %v3352_v18, %s3163_s29  ;;  %s5697_s29 = sld [smem:[#allocation2 + $0x181]] }
  0xfe   :  { %v3584_v60 = vpop.permute.xlu0 %1173 }
  0xff   :  { %6462 = vst [vmem:[#allocation37_spill] sm:$0xff] %v3584_v60  ;;  %v3586_v61 = vpop.permute.xlu1 %364 }
 0x100   :  { %6463 = vst [vmem:[#allocation38_spill] sm:$0xff] %v3586_v61  ;;  %978 = vrot.lane.b32.xlu0 %v3313_v12, %s3170_s21  ;;  %1327 = vrot.lane.b32.xlu1 %v3410_v22, %s3166_s17  ;;  %v6486_v61 = vmov 0   ;;  %s5707_s17 = sld [smem:[#allocation2 + $0x182]] }
 0x101   :  { %v3840_v28 = vsel %vm1375_vm13, 1, %v6486_v61 }
 0x102   :  { %v3595_v63 = vpop.permute.xlu0 %1179 }
 0x103   :  { %6464 = vst [vmem:[#allocation39_spill] sm:$0xff] %v3595_v63 }
 0x104   :  { %1493 = vperm.xlu0 %3049, %v2895_v62   ;;  %1478 = vperm.xlu1 %3051, %v3296_v8   ;;  %v3598_v0 = vpop.permute.xlu1 %1314 }
 0x105   :  { %6465 = vst [vmem:[#allocation40_spill] sm:$0xff] %v3598_v0 }
 0x106   :  { %v3600_v1 = vpop.permute.xlu0 %915 }
 0x107   :  { %6466 = vst [vmem:[#allocation41_spill] sm:$0xff] %v3600_v1 }
 0x108   :  { %483 = vrot.lane.b32.xlu0 %v3302_v9, %s3169_s20  ;;  %427 = vrot.lane.b32.xlu1 %v3286_v6, %s3167_s18  ;;  %v3606_v4 = vpop.permute.xlu1 %177 }
 0x109   :  { %6467 = vst [vmem:[#allocation42_spill] sm:$0xff] %v3606_v4  ;;  %3052 = vset.pattern.permute.xlu1 %v6304_v3  ;;  %v6480_v4 = vmov 4  }
 0x10a   :  { %v3612_v11 = vpop.permute.xlu0 %275 }
 0x10b   :  { %6468 = vst [vmem:[#allocation43_spill] sm:$0xff] %v3612_v11  ;;  %v3803_v11 = vsel %vm1133_vm8, 1, %v6486_v61 }
 0x10c   :  { %1586 = vperm.xlu0 %3049, %v2901_v5   ;;  %431 = vrot.lane.b32.xlu1 %v3291_v7, %s3167_s18  ;;  %v3616_v8 = vpop.permute.xlu1 %225  ;;  %v528_v5 = vld [vmem:[%s6292_s4] sm:$0xf] }
 0x10d   :  { %6469 = vst [vmem:[#allocation44_spill] sm:$0xff] %v3616_v8 }
 0x10e   :  { %v3618_v14 = vpop.permute.xlu0 %281 }
 0x10f   :  { %6470 = vst [vmem:[#allocation45_spill] sm:$0xff] %v3618_v14 }
 0x110   :  { %926 = vrot.lane.b32.xlu1 %v3308_v10, %s3168_s19  ;;  %v3622_v21 = vpop.permute.xlu1 %676 }
 0x111   :  { %6471 = vst [vmem:[#allocation46_spill] sm:$0xff] %v3622_v21 }
 0x112   :  { %v3626_v53 = vpop.permute.xlu0 %774 }
 0x114   :  { %930 = vrot.lane.b32.xlu1 %v3333_v15, %s3168_s19  ;;  %v3630_v62 = vpop.permute.xlu1 %724  ;;  %s5711_s19 = sld [smem:[#allocation2 + $0x83]] }
 0x115   :  { %6472 = vst [vmem:[#allocation47_spill] sm:$0xff] %v3630_v62  ;;  %v3763_v62 = vsel %vm133_vm2, 1, %v6486_v61 }
 0x116   :  { %v3636_v3 = vpop.permute.xlu0 %780  ;;  %6492 = vst [vmem:[#allocation63_spill] sm:$0xff] %v3763_v62 }
 0x117   :  { %6473 = vst [vmem:[#allocation48_spill] sm:$0xff] %v3636_v3  ;;  %v3642_v2 = vsel %vm6365_vm0, %v3636_v3, %v3626_v53 }
 0x118   :  { %6474 = vst [vmem:[#allocation49_spill] sm:$0xff] %v3642_v2  ;;  %531 = vperm.xlu1 %3052, %v528_v5   ;;  %v3644_v1 = vpop.permute.xlu1 %1122  ;;  %v3661_v5 = vld [vmem:[%s6290_s2] sm:$0xf]  ;;  %s5689_s2 = sld [smem:[#allocation2 + $0x1]] }
 0x119   :  { %6475 = vst [vmem:[#allocation50_spill] sm:$0xff] %v3644_v1  ;;  %6479 = vst [vmem:[#allocation54_spill] sm:$0xff] %v3661_v5  ;;  %vm6363_vm3 = vcmp.ge.s32.totalorder %v3661_v5, 1  ;;  %vm6364_vm5 = vcmp.ge.s32.totalorder %v3661_v5, 6  ;;  %vm1134_vm9 = vcmp.ge.s32.totalorder %v3661_v5, 12  ;;  %vm6371_vm10 = vcmp.lt.s32.totalorder %v3661_v5, 15 }
 0x11a   :  { %v3646_v21 = vpop.permute.xlu0 %1223  ;;  %vm135_vm6 = vmand %vm133_vm2, %vm6363_vm3  ;;  %vm6394_vm11 = vcmp.lt.s32.totalorder %v3661_v5, 10  ;;  %v3847_v40 = vsel %vm6364_vm5, 1, %v6486_v61 }
 0x11b   :  { %6476 = vst [vmem:[#allocation51_spill] sm:$0xff] %v3646_v21  ;;  %vm634_vm7 = vmand %vm632_vm4, %vm6364_vm5  ;;  %v3707_v35 = vsel %vm135_vm6, 1, %v6486_v61 }
 0x11c   :  { %433 = vrot.lane.b32.xlu1 %v3302_v9, %s3167_s18  ;;  %v3650_v8 = vpop.permute.xlu1 %1177  ;;  %6487 = vst [vmem:[#allocation60_spill] sm:$0xff] %v3707_v35  ;;  %v3712_v2 = vsel %vm634_vm7, 1, %v6486_v61  ;;  %vm1135_vm12 = vmand %vm1133_vm8, %vm1134_vm9  ;;  %s5709_s18 = sld [smem:[#allocation2 + $0x3]] }
 0x11d   :  { %6477 = vst [vmem:[#allocation52_spill] sm:$0xff] %v3650_v8  ;;  %3053 = vset.pattern.permute.xlu1 %v6480_v4  ;;  %v138_v4 = vshrl.u32 %v126_v20, 7  ;;  %vm3723_vm14 = vmand %vm133_vm2, %vm6371_vm10  ;;  %vm6368_vm2 = vcmp.lt.s32.totalorder %v3624_v23, 76 }
 0x11e   :  { %v3664_v49 = vpop.permute.xlu0 %1229  ;;  %vm736_vm15 = vmand %vm632_vm4, %vm6394_vm11  ;;  %v3768_v29 = vsel %vm3723_vm14, 1, %v6486_v61  ;;  %v3877_v45 = vsel %vm6368_vm2, %v3578_v59, %v3534_v47 }
 0x11f   :  { %v3670_v3 = vsel %vm6376_vm1, %v3664_v49, %v3646_v21  ;;  %v3701_v21 = vsub.s32 2, %v138_v4  ;;  %v3709_v1 = vsub.s32 3, %v138_v4  ;;  %vm1376_vm6 = vmand %vm1375_vm13, %vm1134_vm9  ;;  %6493 = vst [vmem:[#allocation64_spill] sm:$0xff] %v3768_v29  ;;  %v3776_v27 = vsel %vm736_vm15, 1, %v6486_v61 }
 0x120   :  { %6481 = vst [vmem:[#allocation55_spill] sm:$0xff] %v3670_v3  ;;  %477 = vrot.lane.b32.xlu1 %v3286_v6, %s3169_s20  ;;  %v3676_v60 = vpop.permute.xlu1 %416  ;;  %6494 = vst [vmem:[#allocation65_spill] sm:$0xff] %v3776_v27  ;;  %vm6403_vm15 = vcmp.lt.s32.totalorder %v3624_v23, 17 }
 0x121   :  { %6482 = vst [vmem:[#allocation56_spill] sm:$0xff] %v3676_v60  ;;  %v3699_v60 = vsub.s32 1, %v138_v4  ;;  %6505 = vst [vmem:[#allocation72_spill] sm:$0xff] %v3877_v45 }
 0x122   :  { %v3680_v46 = vpop.permute.xlu0 %965 }
 0x123   :  { %6483 = vst [vmem:[#allocation57_spill] sm:$0xff] %v3680_v46  ;;  %v3697_v46 = vsub.s32 0, %v138_v4  ;;  %v3746_v4 = vsel %vm1135_vm12, 1, %v6486_v61  ;;  %vm6367_vm12 = vcmp.lt.s32.totalorder %v3624_v23, 64 }
 0x124   :  { %481 = vrot.lane.b32.xlu1 %v3291_v7, %s3169_s20  ;;  %v3906_v59 = vsel %vm6367_vm12, %v3650_v8, %v3595_v63  ;;  %s5717_s20 = sld [smem:[#allocation4 + $0x1]] }
 0x125   :  { %v3695_v20 = vpop.permute.xlu1 %1364  ;;  %v1140_v41 = vrot.slane %v3746_v4, %v3697_v46  ;;  %v1190_v57 = vrot.slane %v3803_v11, %v3697_v46  ;;  %6508 = vst [vmem:[#allocation75_spill] sm:$0xff] %v3906_v59  ;;  %v6561_v8 = vrot.slane %v3847_v40, %v3697_v46 }
 0x126   :  { %6484 = vst [vmem:[#allocation58_spill] sm:$0xff] %v3695_v20  ;;  %v3704_v3 = vpop.permute.xlu0 %325  ;;  %v190_v20 = vrot.slane %v3763_v62, %v3697_v46 }
 0x127   :  { %6485 = vst [vmem:[#allocation59_spill] sm:$0xff] %v3704_v3  ;;  %vm3815_vm7 = vcmp.eq.s32.totalorder %v1140_v41, 1 }
 0x128   :  { %976 = vrot.lane.b32.xlu1 %v3308_v10, %s3170_s21 }
 0x129   :  { %v3737_v36 = vpop.permute.xlu1 %227 }
 0x12a   :  { %6490 = vst [vmem:[#allocation61_spill] sm:$0xff] %v3737_v36  ;;  %v3752_v3 = vpop.permute.xlu0 %329  ;;  %v3773_v36 = vsel %vm632_vm4, 1, %v6486_v61  ;;  %vm6360_vm4 = vcmp.lt.s32.totalorder %v3661_v5, 4  ;;  %v6639_v5 = vld [vmem:[#allocation26_spill] sm:$0xff] }
 0x12b   :  { %6491 = vst [vmem:[#allocation62_spill] sm:$0xff] %v3752_v3  ;;  %v3786_v3 = vsel %vm1376_vm6, 1, %v6486_v61  ;;  %vm3831_vm14 = vmand %vm1133_vm8, %vm6360_vm4  ;;  %vm6377_vm6 = vcmp.lt.s32.totalorder %v3624_v23, 102 }
 0x12c   :  { %980 = vrot.lane.b32.xlu1 %v3333_v15, %s3170_s21  ;;  %6495 = vst [vmem:[#allocation66_spill] sm:$0xff] %v3786_v3  ;;  %vm1451_vm8 = vmand %vm1375_vm13, %vm6360_vm4  ;;  %v3884_v39 = vsel %vm3831_vm14, 1, %v6486_v61  ;;  %vm3908_vm13 = vcmp.eq.s32.totalorder %v1190_v57, 1  ;;  %v1157_v57 = vsel %vm3815_vm7, %v3877_v45, 0.0  ;;  %vm6374_vm14 = vcmp.lt.s32.totalorder %v3624_v23, 16 }
 0x12d   :  { %v3789_v58 = vpop.permute.xlu1 %277  ;;  %v1242_v63 = vrot.slane %v3884_v39, %v3697_v46  ;;  %vm3952_vm7 = vcmp.eq.s32.totalorder %v190_v20, 1  ;;  %v3968_v20 = vmul.f32 %v3308_v10, %v3442_v24  ;;  %v6520_v3 = vrot.slane %v3712_v2, %v3699_v60 }
 0x12e   :  { %6496 = vst [vmem:[#allocation67_spill] sm:$0xff] %v3789_v58  ;;  %v3805_v26 = vpop.permute.xlu0 %824  ;;  %v3825_v58 = vsel %vm6363_vm3, 1, %v6486_v61  ;;  %v1165_v38 = vmul.f32 %v3476_v33, %v1157_v57  ;;  %v3987_v10 = vmul.f32 %v3313_v12, %v3442_v24  ;;  %v114_v57 = vmul.f32 %v3444_v25, %v3286_v6 }
 0x12f   :  { %6497 = vst [vmem:[#allocation68_spill] sm:$0xff] %v3805_v26  ;;  %6500 = vst [vmem:[#allocation69_spill] sm:$0xff] %v3825_v58  ;;  %v3923_v26 = vsel %vm1134_vm9, 1, %v6486_v61  ;;  %vm3973_vm4 = vcmp.eq.s32.totalorder %v6520_v3, 1  ;;  %v3991_v3 = vmul.f32 %v3333_v15, %v3442_v24  ;;  %v1116_v12 = vmul.f32 %v3347_v17, %v3468_v31 }
 0x130   :  { %1569 = vperm.xlu1 %3053, %v2900_v56   ;;  %6512 = vst [vmem:[#allocation77_spill] sm:$0xff] %v3923_v26  ;;  %6519 = vst [vmem:[#allocation79_spill] sm:$0xff] %v3968_v20  ;;  %v3995_v20 = vmul.f32 %v3339_v16, %v3442_v24  ;;  %v4020_v24 = vmul.f32 %v3324_v13, %v3444_v25  ;;  %v4028_v17 = vmul.f32 %v3302_v9, %v3444_v25 }
 0x131   :  { %v3853_v56 = vpop.permute.xlu1 %726  ;;  %6524 = vst [vmem:[#allocation81_spill] sm:$0xff] %v3991_v3  ;;  %v4099_v6 = vmul.f32 %v3410_v22, %v3468_v31  ;;  %v4117_v22 = vmul.f32 %v3359_v19, %v3468_v31  ;;  %v630_v13 = vsel %vm6377_vm6, %v3513_v42, %v3480_v34  ;;  %v631_v19 = vsel %vm6377_vm6, %v3521_v44, %v3513_v42 }
 0x132   :  { %6503 = vst [vmem:[#allocation70_spill] sm:$0xff] %v3853_v56  ;;  %v3863_v55 = vpop.permute.xlu0 %828  ;;  %v3887_v56 = vsel %vm1451_vm8, 1, %v6486_v61  ;;  %vm6366_vm8 = vcmp.lt.s32.totalorder %v3624_v23, 12  ;;  %6525 = vst [vmem:[#allocation82_spill] sm:$0xff] %v3995_v20  ;;  %v4071_v20 = vsel %vm6371_vm10, 1, %v6486_v61  ;;  %vm6566_vm6 = vcmp.lt.s32.totalorder %v3624_v23, 15 }
 0x133   :  { %6504 = vst [vmem:[#allocation71_spill] sm:$0xff] %v3863_v55  ;;  %6506 = vst [vmem:[#allocation73_spill] sm:$0xff] %v3887_v56  ;;  %v1250_v9 = vrot.slane %v3884_v39, %v3701_v21 }
 0x134   :  { %982 = vrot.lane.b32.xlu1 %v3339_v16, %s3170_s21  ;;  %6531 = vst [vmem:[#allocation83_spill] sm:$0xff] %v4020_v24  ;;  %6533 = vst [vmem:[#allocation85_spill] sm:$0xff] %v4028_v17  ;;  %v132_v17 = vsel %vm6403_vm15, %v3472_v32, %v3465_v30  ;;  %v6675_v30 = vld [vmem:[#allocation55_spill] sm:$0xff]  ;;  %s5719_s21 = sld [smem:[#allocation4]] }
 0x135   :  { %v3899_v55 = vpop.permute.xlu1 %776  ;;  %3054 = vset.pattern.permute.xlu1 %v6486_v61  ;;  %6547 = vst [vmem:[#allocation88_spill] sm:$0xff] %v4071_v20 }
 0x136   :  { %6507 = vst [vmem:[#allocation74_spill] sm:$0xff] %v3899_v55  ;;  %v3916_v62 = vsel %vm6365_vm0, %v3626_v53, %v3899_v55  ;;  %v3918_v14 = vpop.permute.xlu0 %1275  ;;  %v6513_v55 = vrot.slane %v3707_v35, %v3697_v46  ;;  %v1292_v53 = vrot.slane %v3923_v26, %v3697_v46  ;;  %vm4014_vm0 = vcmp.eq.s32.totalorder %v1242_v63, 1 }
 0x137   :  { %6511 = vst [vmem:[#allocation76_spill] sm:$0xff] %v3916_v62 }
 0x138   :  { %vm3939_vm9 = vcmp.eq.s32.totalorder %v6513_v55, 1  ;;  %v1207_v55 = vsel %vm3908_vm13, %v3906_v59, 0.0  ;;  %v6526_v59 = vrot.slane %v3712_v2, %v3697_v46  ;;  %vm4038_vm2 = vcmp.eq.s32.totalorder %v1292_v53, 1 }
 0x139   :  { %v3961_v35 = vpop.permute.xlu1 %1175  ;;  %v1215_v15 = vmul.f32 %v3495_v37, %v1207_v55  ;;  %v6534_v55 = vrot.slane %v3768_v29, %v3697_v46  ;;  %v1169_v53 = vadd.f32 %v1165_v38, %v1116_v12 }
 0x13a   :  { %6518 = vst [vmem:[#allocation78_spill] sm:$0xff] %v3961_v35  ;;  %v3983_v62 = vpop.permute.xlu0 %1281  ;;  %vm4002_vm3 = vcmp.eq.s32.totalorder %v6526_v59, 1  ;;  %v4024_v59 = vmul.f32 %v3444_v25, %v3291_v7  ;;  %v6539_v7 = vrot.slane %v3773_v36, %v3699_v60  ;;  %v6542_v25 = vrot.slane %v3773_v36, %v3697_v46 }
 0x13b   :  { %6523 = vst [vmem:[#allocation80_spill] sm:$0xff] %v3983_v62  ;;  %v1287_v16 = vsel %vm6366_vm8, %v3983_v62, %v3918_v14  ;;  %vm4033_vm8 = vcmp.eq.s32.totalorder %v6534_v55, 1  ;;  %v1219_v12 = vadd.f32 %v1215_v15, %v1169_v53  ;;  %v342_v15 = vrot.slane %v4071_v20, %v3697_v46  ;;  %v6599_v55 = vld [vmem:[#allocation15_spill] sm:$0xff] }
 0x13c   :  { %6532 = vst [vmem:[#allocation84_spill] sm:$0xff] %v4024_v59  ;;  %vm4047_vm5 = vcmp.eq.s32.totalorder %v6539_v7, 1  ;;  %vm4054_vm13 = vcmp.eq.s32.totalorder %v6542_v25, 1  ;;  %v1309_v25 = vsel %vm4038_vm2, %v1287_v16, 0.0  ;;  %v4113_v16 = vmul.f32 %v3352_v18, %v3468_v31 }
 0x13d   :  { %v4042_v24 = vpop.permute.xlu1 %1227  ;;  %v6552_v53 = vrot.slane %v3776_v27, %v3697_v46  ;;  %v157_v18 = vsel %vm3939_vm9, %v132_v17, 0.0  ;;  %v6555_v31 = vrot.slane %v3746_v4, %v3699_v60  ;;  %vm4153_vm9 = vcmp.eq.s32.totalorder %v6561_v8, 1  ;;  %v6635_v17 = vld [vmem:[#allocation59_spill] sm:$0xff] }
 0x13e   :  { %v4064_v62 = vsel %vm6376_vm1, %v4042_v24, %v3664_v49  ;;  %v4066_v7 = vpop.permute.xlu0 %1016  ;;  %v1317_v42 = vmul.f32 %v3598_v0, %v1309_v25  ;;  %vm6420_vm1 = vcmp.lt.s32.totalorder %v3624_v23, 127  ;;  %v4169_v8 = vsel %vm6394_vm11, 1, %v6486_v61  ;;  %v6590_v61 = vld [vmem:[#allocation45_spill] sm:$0xff] }
 0x13f   :  { %6545 = vst [vmem:[#allocation86_spill] sm:$0xff] %v4064_v62  ;;  %6546 = vst [vmem:[#allocation87_spill] sm:$0xff] %v4066_v7  ;;  %v1259_v49 = vsel %vm4014_vm0, %v4064_v62, 0.0  ;;  %v6548_v7 = vrot.slane %v3825_v58, %v3697_v46  ;;  %v185_v62 = vsel %vm6374_vm14, %v3553_v52, %v3544_v50  ;;  %vm4126_vm0 = vcmp.eq.s32.totalorder %v6552_v53, 1  ;;  %v6570_v50 = vld [vmem:[#allocation32_spill] sm:$0xff]  ;;  %v6592_v0 = vld [vmem:[#allocation25_spill] sm:$0xff] }
 0x140   :  { %v1267_v3 = vmul.f32 %v3537_v48, %v1259_v49  ;;  %vm4139_vm2 = vcmp.eq.s32.totalorder %v6555_v31, 1  ;;  %v6558_v53 = vrot.slane %v3776_v27, %v3699_v60  ;;  %6565 = vst [vmem:[#allocation91_spill] sm:$0xff] %v4169_v8  ;;  %v657_v25 = vsel %vm3973_vm4, %v630_v13, 0.0  ;;  %v6572_v13 = vld [vmem:[#allocation34_spill] sm:$0xff]  ;;  %v6626_v49 = vld [vmem:[#allocation49_spill] sm:$0xff] }
 0x141   :  { %vm4090_vm10 = vcmp.eq.s32.totalorder %v6548_v7, 1  ;;  %v4107_v59 = vpop.permute.xlu1 %466  ;;  %v235_v31 = vsel %vm6566_vm6, %v3562_v54, %v3551_v51  ;;  %vm4177_vm12 = vcmp.eq.s32.totalorder %v342_v15, 1  ;;  %v6574_v15 = vrot.slane %v3847_v40, %v3699_v60 }
 0x142   :  { %6551 = vst [vmem:[#allocation89_spill] sm:$0xff] %v4107_v59  ;;  %v1271_v7 = vadd.f32 %v1267_v3, %v1219_v12  ;;  %vm4146_vm14 = vcmp.eq.s32.totalorder %v6558_v53, 1  ;;  %v207_v53 = vsel %vm3952_vm7, %v185_v62, 0.0  ;;  %vm6571_vm7 = vcmp.lt.s32.totalorder %v3624_v23, 96 }
 0x143   :  { %v4158_v12 = vpop.permute.xlu0 %162  ;;  %v683_v41 = vsel %vm6571_vm7, %v6570_v50, %v3519_v43  ;;  %vm6573_vm4 = vmmov %vm6571_vm7  ;;  %vm4196_vm6 = vcmp.eq.s32.totalorder %v6574_v15, 1  ;;  %v6579_v51 = vrot.slane %v3746_v4, %v3701_v21  ;;  %vm6593_vm11 = vcmp.lt.s32.totalorder %v3624_v23, 76  ;;  %v6703_v15 = vld [vmem:[#allocation66_spill] sm:$0xff] }
 0x144   :  { %6564 = vst [vmem:[#allocation90_spill] sm:$0xff] %v4158_v12  ;;  %v165_v52 = vmul.f32 %v4158_v12, %v157_v18  ;;  %v4181_v62 = vadd.f32 %v1317_v42, %v1271_v7  ;;  %v656_v18 = vsel %vm4002_vm3, %v631_v19, 0.0  ;;  %v684_v56 = vsel %vm6573_vm4, %v6572_v13, %v6570_v50  ;;  %v6578_v19 = vld [vmem:[#allocation14_spill] sm:$0xff] }
 0x145   :  { %v215_v42 = vmul.f32 %v6578_v19, %v207_v53  ;;  %vm4206_vm3 = vcmp.eq.s32.totalorder %v6579_v51, 1  ;;  %v6582_v50 = vrot.slane %v3746_v4, %v3709_v1  ;;  %v845_v51 = vrot.slane %v4169_v8, %v3699_v60  ;;  %v6586_v53 = vld [vmem:[#allocation20_spill] sm:$0xff]  ;;  %v6589_v19 = vld [vmem:[#allocation43_spill] sm:$0xff] }
 0x146   :  { %6569 = vst [vmem:[#allocation92_spill] sm:$0xff] %v4181_v62  ;;  %v169_v7 = vadd.f32 %v165_v52, %v114_v57  ;;  %v4200_v35 = vpop.permute.xlu1 %1403  ;;  %v841_v57 = vrot.slane %v4169_v8, %v3697_v46  ;;  %vm6591_vm4 = vcmp.lt.s32.totalorder %v3624_v23, 1  ;;  %v707_v8 = vsel %vm4047_vm5, %v683_v41, 0.0 }
 0x147   :  { %6577 = vst [vmem:[#allocation32_spill] sm:$0xff] %v4200_v35  ;;  %vm4213_vm7 = vcmp.eq.s32.totalorder %v6582_v50, 1  ;;  %v4217_v13 = vpop.permute.xlu0 %375  ;;  %v6587_v35 = vld [vmem:[#allocation22_spill] sm:$0xff]  ;;  %v6588_v50 = vld [vmem:[#allocation12_spill] sm:$0xff]  ;;  %v287_v52 = vsel %vm6591_vm4, %v6590_v61, %v6589_v19  ;;  %v706_v20 = vsel %vm4054_vm13, %v684_v56, 0.0  ;;  %v4247_v63 = vsel %vm6593_vm11, %v3534_v47, %v6592_v0  ;;  %v6600_v47 = vld [vmem:[#allocation47_spill] sm:$0xff] }
 0x148   :  { %6585 = vst [vmem:[#allocation93_spill] sm:$0xff] %v4217_v13  ;;  %v4229_v4 = vsel %vm6403_vm15, %v6587_v35, %v6586_v53  ;;  %v665_v43 = vmul.f32 %v6588_v50, %v657_v25  ;;  %v259_v13 = vsel %vm4033_vm8, %v235_v31, 0.0  ;;  %v664_v32 = vmul.f32 %v6588_v50, %v656_v18  ;;  %6594 = vst [vmem:[#allocation45_spill] sm:$0xff] %v4247_v63  ;;  %v6595_v31 = vld [vmem:[#allocation33_spill] sm:$0xff]  ;;  %v6596_v25 = vld [vmem:[#allocation35_spill] sm:$0xff] }
 0x149   :  { %v219_v53 = vadd.f32 %v215_v42, %v169_v7  ;;  %vm6597_vm8 = vcmp.lt.s32.totalorder %v3624_v23, 90  ;;  %v1254_v56 = vrot.slane %v3884_v39, %v3709_v1  ;;  %v267_v18 = vmul.f32 %v6599_v55, %v259_v13  ;;  %v6613_v55 = vld [vmem:[#allocation13_spill] sm:$0xff] }
 0x14a   :  { %v734_v19 = vsel %vm6597_vm8, %v6596_v25, %v6595_v31  ;;  %v4253_v58 = vpop.permute.xlu1 %279  ;;  %v309_v41 = vsel %vm4090_vm10, %v287_v52, 0.0  ;;  %vm6601_vm5 = vmmov %vm6597_vm8  ;;  %v6602_v42 = vrot.slane %v3803_v11, %v3701_v21  ;;  %v6605_v50 = vrot.slane %v3803_v11, %v3709_v1 }
 0x14b   :  { %6598 = vst [vmem:[#allocation25_spill] sm:$0xff] %v4253_v58  ;;  %v733_v7 = vsel %vm6601_vm5, %v6595_v31, %v6600_v47  ;;  %vm6608_vm10 = vmmov %vm6591_vm4  ;;  %v4286_v52 = vpop.permute.xlu0 %379  ;;  %v6611_v31 = vld [vmem:[#allocation23_spill] sm:$0xff]  ;;  %vm6612_vm4 = vcmp.lt.s32.totalorder %v3624_v23, 102  ;;  %v715_v47 = vmul.f32 %v6613_v55, %v707_v8  ;;  %v6614_v27 = vrot.slane %v3803_v11, %v3699_v60 }
 0x14c   :  { %vm4269_vm11 = vcmp.eq.s32.totalorder %v6602_v42, 1  ;;  %vm4276_vm13 = vcmp.eq.s32.totalorder %v6605_v50, 1  ;;  %v4284_v38 = vsel %vm6608_vm10, %v4253_v58, %v6590_v61  ;;  %6610 = vst [vmem:[#allocation94_spill] sm:$0xff] %v4286_v52  ;;  %v4292_v42 = vsel %vm6612_vm4, %v3480_v34, %v6611_v31  ;;  %v6617_v34 = vld [vmem:[#allocation79_spill] sm:$0xff]  ;;  %v6638_v58 = vld [vmem:[#allocation38_spill] sm:$0xff] }
 0x14d   :  { %6609 = vst [vmem:[#allocation33_spill] sm:$0xff] %v4284_v38  ;;  %v714_v50 = vmul.f32 %v6613_v55, %v706_v20  ;;  %vm4299_vm8 = vcmp.eq.s32.totalorder %v6614_v27, 1  ;;  %vm6415_vm5 = vcmp.lt.s32.totalorder %v3624_v23, 122  ;;  %v1296_v61 = vrot.slane %v3923_v26, %v3699_v60  ;;  %v6680_v27 = vld [vmem:[#allocation27_spill] sm:$0xff] }
 0x14e   :  { %v669_v52 = vadd.f32 %v665_v43, %v3987_v10  ;;  %v668_v38 = vadd.f32 %v664_v32, %v6617_v34  ;;  %v758_v8 = vsel %vm4126_vm0, %v734_v19, 0.0  ;;  %v6618_v20 = vrot.slane %v3884_v39, %v3699_v60  ;;  %v6625_v43 = vld [vmem:[#allocation19_spill] sm:$0xff] }
 0x14f   :  { %v271_v11 = vadd.f32 %v267_v18, %v219_v53  ;;  %vm4317_vm4 = vcmp.eq.s32.totalorder %v841_v57, 1  ;;  %vm4321_vm15 = vcmp.eq.s32.totalorder %v845_v51, 1  ;;  %v1158_v32 = vsel %vm4139_vm2, %v4247_v63, 0.0  ;;  %v328_v57 = vpop.permute.xlu1 %327  ;;  %v6627_v53 = vld [vmem:[#allocation36_spill] sm:$0xff]  ;;  %v6628_v18 = vld [vmem:[#allocation50_spill] sm:$0xff]  ;;  %v4354_v34 = vpop.permute.xlu0 %874 }
 0x150   :  { %vm4313_vm10 = vcmp.eq.s32.totalorder %v6618_v20, 1  ;;  %v317_v10 = vmul.f32 %v6625_v43, %v309_v41  ;;  %v759_v39 = vsel %vm4146_vm14, %v733_v7, 0.0  ;;  %v808_v19 = vsel %vm4153_vm9, %v6626_v49, 0.0  ;;  %v6633_v41 = vld [vmem:[#allocation62_spill] sm:$0xff] }
 0x151   :  { %vm6629_vm0 = vcmp.lt.s32.totalorder %v3624_v23, 76  ;;  %v4349_v3 = vsel %vm6420_vm1, %v328_v57, %v6633_v41  ;;  %v336_v7 = vsel %vm6420_vm1, %v6635_v17, %v328_v57  ;;  %v719_v20 = vadd.f32 %v715_v47, %v669_v52  ;;  %v6641_v52 = vld [vmem:[#allocation78_spill] sm:$0xff]  ;;  %v6658_v17 = vld [vmem:[#allocation39_spill] sm:$0xff] }
 0x152   :  { %v4338_v51 = vsel %vm6629_vm0, %v6628_v18, %v6627_v53  ;;  %vm6631_vm2 = vmmov %vm6629_vm0  ;;  %6634 = vst [vmem:[#allocation49_spill] sm:$0xff] %v4349_v3  ;;  %v718_v49 = vadd.f32 %v714_v50, %v668_v38  ;;  %v6636_v53 = vld [vmem:[#allocation18_spill] sm:$0xff]  ;;  %v359_v43 = vsel %vm4177_vm12, %v336_v7, 0.0  ;;  %v321_v3 = vadd.f32 %v317_v10, %v271_v11  ;;  %v6640_v38 = vld [vmem:[#allocation52_spill] sm:$0xff] }
 0x153   :  { %6630 = vst [vmem:[#allocation23_spill] sm:$0xff] %v4338_v51  ;;  %v4344_v59 = vsel %vm6631_vm2, %v6592_v0, %v6628_v18  ;;  %v766_v63 = vmul.f32 %v6636_v53, %v758_v8  ;;  %v767_v0 = vmul.f32 %v6636_v53, %v759_v39  ;;  %v6637_v18 = vld [vmem:[#allocation76_spill] sm:$0xff]  ;;  %v367_v35 = vmul.f32 %v6638_v58, %v359_v43  ;;  %v779_v54 = vpop.permute.xlu1 %778  ;;  %v6650_v10 = vld [vmem:[#allocation37_spill] sm:$0xff] }
 0x154   :  { %6632 = vst [vmem:[#allocation79_spill] sm:$0xff] %v4344_v59  ;;  %v809_v41 = vsel %vm4196_vm6, %v6637_v18, 0.0  ;;  %v816_v57 = vmul.f32 %v6639_v5, %v808_v19  ;;  %v1159_v47 = vsel %vm4206_vm3, %v4344_v59, 0.0  ;;  %v1160_v45 = vsel %vm4213_vm7, %v4338_v51, 0.0  ;;  %v6643_v8 = vld [vmem:[#allocation60_spill] sm:$0xff] }
 0x155   :  { %vm6642_vm12 = vcmp.lt.s32.totalorder %v3624_v23, 64  ;;  %v6644_v11 = vrot.slane %v6643_v8, %v3701_v21  ;;  %v6647_v62 = vrot.slane %v3712_v2, %v3701_v21  ;;  %v4397_v19 = vadd.f32 %v367_v35, %v321_v3  ;;  %v6653_v7 = vld [vmem:[#allocation48_spill] sm:$0xff] }
 0x156   :  { %v4375_v50 = vsel %vm6642_vm12, %v6641_v52, %v6640_v38  ;;  %vm6651_vm6 = vmmov %vm6642_vm12  ;;  %vm6654_vm3 = vcmp.lt.s32.totalorder %v3624_v23, 6  ;;  %v6655_v38 = vld [vmem:[#allocation74_spill] sm:$0xff]  ;;  %v817_v35 = vmul.f32 %v6639_v5, %v809_v41  ;;  %vm4418_vm2 = vcmp.eq.s32.totalorder %v1250_v9, 1 }
 0x157   :  { %vm4380_vm14 = vcmp.eq.s32.totalorder %v6644_v11, 1  ;;  %vm4387_vm9 = vcmp.eq.s32.totalorder %v6647_v62, 1  ;;  %v4395_v39 = vsel %vm6651_vm6, %v6650_v10, %v6641_v52  ;;  %6652 = vst [vmem:[#allocation36_spill] sm:$0xff] %v4397_v19  ;;  %v4402_v18 = vsel %vm6654_vm3, %v779_v54, %v6653_v7  ;;  %vm6656_vm7 = vmmov %vm6654_vm3  ;;  %v4409_v62 = vpop.permute.xlu0 %878 }
 0x158   :  { %v4407_v11 = vsel %vm6656_vm7, %v6655_v38, %v779_v54  ;;  %6657 = vst [vmem:[#allocation50_spill] sm:$0xff] %v4409_v62  ;;  %vm6659_vm0 = vmmov %vm6651_vm6  ;;  %vm4422_vm12 = vcmp.eq.s32.totalorder %v1254_v56, 1  ;;  %v1166_v54 = vmul.f32 %v3476_v33, %v1158_v32  ;;  %v770_v38 = vadd.f32 %v766_v63, %v718_v49  ;;  %v6670_v49 = vld [vmem:[#allocation68_spill] sm:$0xff] }
 0x159   :  { %v4415_v52 = vsel %vm6659_vm0, %v6658_v17, %v6650_v10  ;;  %v771_v19 = vadd.f32 %v767_v0, %v719_v20  ;;  %vm4427_vm6 = vcmp.eq.s32.totalorder %v1296_v61, 1  ;;  %v1167_v17 = vmul.f32 %v3476_v33, %v1159_v47  ;;  %v827_v10 = vpop.permute.xlu1 %826  ;;  %v6669_v20 = vld [vmem:[#allocation71_spill] sm:$0xff]  ;;  %v6736_v61 = vld [vmem:[#allocation17_spill] sm:$0xff] }
 0x15a   :  { %v1168_v41 = vmul.f32 %v3476_v33, %v1160_v45  ;;  %v1209_v9 = vsel %vm4269_vm11, %v4395_v39, 0.0  ;;  %v1210_v56 = vsel %vm4276_vm13, %v4375_v50, 0.0  ;;  %v6666_v63 = vrot.slane %v3712_v2, %v3709_v1  ;;  %v6671_v2 = vld [vmem:[#allocation63_spill] sm:$0xff]  ;;  %v6744_v45 = vld [vmem:[#allocation61_spill] sm:$0xff] }
 0x15b   :  { %v1208_v33 = vsel %vm4299_vm8, %v4415_v52, 0.0  ;;  %v820_v32 = vadd.f32 %v816_v57, %v770_v38  ;;  %v834_v25 = vsel %vm6415_vm5, %v827_v10, %v6669_v20  ;;  %v835_v13 = vsel %vm6415_vm5, %v6670_v49, %v827_v10  ;;  %v4455_v0 = vpop.permute.xlu0 %1325 }
 0x15c   :  { %vm4442_vm3 = vcmp.eq.s32.totalorder %v6666_v63, 1  ;;  %v6672_v47 = vrot.slane %v6671_v2, %v3701_v21  ;;  %v1260_v57 = vsel %vm4313_vm10, %v6675_v30, 0.0  ;;  %v821_v38 = vadd.f32 %v817_v35, %v771_v19 }
 0x15d   :  { %v858_v63 = vsel %vm4317_vm4, %v835_v13, 0.0  ;;  %v859_v10 = vsel %vm4321_vm15, %v834_v25, 0.0  ;;  %v6676_v59 = vrot.slane %v6643_v8, %v3699_v60  ;;  %v6677_v2 = vmov 0  ;;  %v1226_v25 = vpop.permute.xlu1 %1225  ;;  %v6681_v13 = vld [vmem:[#allocation53_spill] sm:$0xff] }
 0x15e   :  { %vm4460_vm11 = vcmp.eq.s32.totalorder %v6672_v47, 1  ;;  %v1217_v47 = vmul.f32 %v3495_v37, %v1209_v9  ;;  %v1218_v51 = vmul.f32 %v3495_v37, %v1210_v56  ;;  %v866_v30 = vmul.f32 %v6680_v27, %v858_v63  ;;  %v6685_v56 = vld [vmem:[#allocation51_spill] sm:$0xff] }
 0x15f   :  { %vm4474_vm13 = vcmp.eq.s32.totalorder %v6676_v59, 1  ;;  %v867_v19 = vmul.f32 %v6680_v27, %v859_v10  ;;  %v1216_v55 = vmul.f32 %v3495_v37, %v1208_v33  ;;  %v1171_v26 = vadd.f32 %v1167_v17, %v4113_v16  ;;  %v4500_v16 = vpop.permute.xlu0 %1329  ;;  %v6771_v63 = vld [vmem:[#allocation15_spill] sm:$0xff] }
 0x160   :  { %v6678_v2 = vsel %vm4474_vm13, 4294967295, %v6677_v2  ;;  %v1172_v35 = vadd.f32 %v1168_v41, %v4117_v22  ;;  %vm6419_vm15 = vcmp.lt.s32.totalorder %v6681_v13, 10  ;;  %v4486_v59 = vadd.f32 %v866_v30, %v820_v32  ;;  %v6765_v32 = vld [vmem:[#allocation82_spill] sm:$0xff] }
 0x161   :  { %6679 = vst [vmem:[#allocation18_spill] sm:$0xff] %v6678_v2  ;;  %v4488_v8 = vadd.f32 %v867_v19, %v821_v38  ;;  %vm6683_vm8 = vcmp.lt.s32.totalorder %v3624_v23, 52  ;;  %v1170_v22 = vadd.f32 %v1166_v54, %v4099_v6  ;;  %v1268_v17 = vmul.f32 %v3537_v48, %v1260_v57 }
 0x162   :  { %v4493_v9 = vsel %vm6683_vm8, %v1226_v25, %v4042_v24  ;;  %vm6686_vm10 = vmmov %vm6683_vm8  ;;  %v6688_v41 = vrot.slane %v3768_v29, %v3701_v21  ;;  %v6691_v24 = vrot.slane %v3840_v28, %v3697_v46  ;;  %v1221_v30 = vadd.f32 %v1217_v47, %v1171_v26  ;;  %v4545_v26 = vpop.permute.xlu1 %1277 }
 0x163   :  { %6682 = vst [vmem:[#allocation76_spill] sm:$0xff] %v4488_v8  ;;  %6684 = vst [vmem:[#allocation38_spill] sm:$0xff] %v4493_v9  ;;  %v4498_v37 = vsel %vm6686_vm10, %v6685_v56, %v1226_v25  ;;  %v1262_v54 = vsel %vm4422_vm12, %v4493_v9, 0.0  ;;  %v1222_v57 = vadd.f32 %v1218_v51, %v1172_v35  ;;  %v6694_v38 = vrot.slane %v3840_v28, %v3709_v1  ;;  %v6707_v56 = vld [vmem:[#allocation42_spill] sm:$0xff]  ;;  %v6839_v9 = vld [vmem:[#allocation80_spill] sm:$0xff] }
 0x164   :  { %6687 = vst [vmem:[#allocation26_spill] sm:$0xff] %v4498_v37  ;;  %vm4507_vm4 = vcmp.eq.s32.totalorder %v6688_v41, 1  ;;  %vm4514_vm7 = vcmp.eq.s32.totalorder %v6691_v24, 1  ;;  %v1261_v6 = vsel %vm4418_vm2, %v4498_v37, 0.0  ;;  %v1270_v19 = vmul.f32 %v3537_v48, %v1262_v54 }
 0x165   :  { %vm4527_vm0 = vcmp.eq.s32.totalorder %v6694_v38, 1  ;;  %v1269_v10 = vmul.f32 %v3537_v48, %v1261_v6  ;;  %v159_v3 = vsel %vm4380_vm14, %v4229_v4, 0.0  ;;  %v658_v7 = vsel %vm4387_vm9, %v4292_v42, 0.0  ;;  %v6718_v38 = vld [vmem:[#allocation16_spill] sm:$0xff] }
 0x166   :  { %vm6697_vm2 = vcmp.lt.s32.totalorder %v3624_v23, 102  ;;  %v803_v47 = vrot.slane %v3847_v40, %v3709_v1  ;;  %v1220_v35 = vadd.f32 %v1216_v55, %v1170_v22  ;;  %v6698_v48 = vrot.slane %v3773_v36, %v3701_v21  ;;  %v6708_v22 = vld [vmem:[#allocation21_spill] sm:$0xff] }
 0x167   :  { %v628_v51 = vsel %vm6697_vm2, %v6611_v31, %v3521_v44  ;;  %v4554_v43 = vadd.f32 %v1269_v10, %v1221_v30  ;;  %v4556_v42 = vadd.f32 %v1270_v19, %v1222_v57  ;;  %vm6701_vm14 = vcmp.lt.s32.totalorder %v3624_v23, 12  ;;  %v4562_v31 = vpop.permute.xlu0 %381  ;;  %v6713_v30 = vld [vmem:[#allocation54_spill] sm:$0xff] }
 0x168   :  { %vm4550_vm12 = vcmp.eq.s32.totalorder %v6698_v48, 1  ;;  %v1286_v44 = vsel %vm6701_vm14, %v3918_v14, %v4545_v26  ;;  %6702 = vst [vmem:[#allocation52_spill] sm:$0xff] %v4562_v31  ;;  %v6704_v55 = vrot.slane %v6703_v15, %v3701_v21  ;;  %vm6709_vm8 = vcmp.lt.s32.totalorder %v3624_v23, 16  ;;  %v6727_v31 = vld [vmem:[#allocation12_spill] sm:$0xff] }
 0x169   :  { %v183_v41 = vsel %vm6709_vm8, %v6708_v22, %v6707_v56  ;;  %v6710_v24 = vrot.slane %v3773_v36, %v3709_v1  ;;  %v167_v14 = vmul.f32 %v4158_v12, %v159_v3  ;;  %v1310_v54 = vsel %vm4427_vm6, %v1286_v44, 0.0  ;;  %v6717_v36 = vld [vmem:[#allocation22_spill] sm:$0xff]  ;;  %v6721_v3 = vld [vmem:[#allocation65_spill] sm:$0xff] }
 0x16a   :  { %vm4567_vm9 = vcmp.eq.s32.totalorder %v6704_v55, 1  ;;  %vm6432_vm2 = vcmp.lt.s32.totalorder %v6681_v13, 15  ;;  %vm6714_vm14 = vcmp.ge.s32.totalorder %v6713_v30, 6  ;;  %vm6719_vm8 = vcmp.lt.s32.totalorder %v3624_v23, 17  ;;  %v6725_v44 = vld [vmem:[#allocation69_spill] sm:$0xff] }
 0x16b   :  { %vm4578_vm10 = vcmp.eq.s32.totalorder %v6710_v24, 1  ;;  %vm4590_vm5 = vmand %vm6419_vm15, %vm6714_vm14  ;;  %v4598_v10 = vsel %vm6719_vm8, %v6718_v38, %v6717_v36  ;;  %v1272_v19 = vadd.f32 %v1268_v17, %v1220_v35  ;;  %v6722_v62 = vrot.slane %v6721_v3, %v3701_v21  ;;  %v6726_v24 = vld [vmem:[#allocation40_spill] sm:$0xff]  ;;  %v6767_v38 = vld [vmem:[#allocation47_spill] sm:$0xff] }
 0x16c   :  { %6720 = vst [vmem:[#allocation78_spill] sm:$0xff] %v4598_v10  ;;  %v1318_v8 = vmul.f32 %v6726_v24, %v1310_v54  ;;  %v666_v12 = vmul.f32 %v6727_v31, %v658_v7  ;;  %v659_v56 = vsel %vm4442_vm3, %v628_v51, 0.0  ;;  %v6728_v17 = vrot.slane %v6721_v3, %v3709_v1  ;;  %v6734_v54 = vld [vmem:[#allocation88_spill] sm:$0xff] }
 0x16d   :  { %vm4603_vm6 = vcmp.eq.s32.totalorder %v6722_v62, 1  ;;  %v6731_v36 = vrot.slane %v6725_v44, %v3701_v21  ;;  %v4629_v62 = vpop.permute.xlu1 %517  ;;  %v6737_v51 = vld [vmem:[#allocation20_spill] sm:$0xff]  ;;  %vm6738_vm3 = vcmp.lt.s32.totalorder %v3624_v23, 17  ;;  %vm6741_vm15 = vcmp.ge.s32.totalorder %v6713_v30, 1  ;;  %v6749_v44 = vld [vmem:[#allocation67_spill] sm:$0xff] }
 0x16e   :  { %vm4616_vm14 = vcmp.eq.s32.totalorder %v6728_v17, 1  ;;  %6735 = vst [vmem:[#allocation37_spill] sm:$0xff] %v4629_v62  ;;  %v4635_v3 = vsel %vm6738_vm3, %v6737_v51, %v6736_v61  ;;  %v209_v17 = vsel %vm4460_vm11, %v183_v41, 0.0  ;;  %v4639_v55 = vadd.f32 %v1318_v8, %v1272_v19  ;;  %vm389_vm1 = vmand %vm6432_vm2, %vm6741_vm15  ;;  %v6745_v41 = vld [vmem:[#allocation44_spill] sm:$0xff] }
 0x16f   :  { %vm4623_vm8 = vcmp.eq.s32.totalorder %v6731_v36, 1  ;;  %6739 = vst [vmem:[#allocation48_spill] sm:$0xff] %v4635_v3  ;;  %v4645_v36 = vpop.permute.xlu0 %429  ;;  %v6743_v7 = vmov 0   ;;  %vm6746_vm11 = vcmp.lt.s32.totalorder %v3624_v23, 15  ;;  %v6747_v19 = vld [vmem:[#allocation84_spill] sm:$0xff]  ;;  %v6748_v3 = vld [vmem:[#allocation25_spill] sm:$0xff]  ;;  %v6751_v57 = vrot.slane %v3847_v40, %v3701_v21 }
 0x170   :  { %6740 = vst [vmem:[#allocation74_spill] sm:$0xff] %v4639_v55  ;;  %6742 = vst [vmem:[#allocation39_spill] sm:$0xff] %v4645_v36  ;;  %v4650_v62 = vsel %vm4590_vm5, 1, %v6743_v7  ;;  %v233_v8 = vsel %vm6746_vm11, %v6745_v41, %v6744_v45  ;;  %v171_v51 = vadd.f32 %v167_v14, %v6747_v19  ;;  %vm6750_vm15 = vcmp.lt.s32.totalorder %v3624_v23, 1  ;;  %v6756_v14 = vld [vmem:[#allocation73_spill] sm:$0xff]  ;;  %v6766_v55 = vld [vmem:[#allocation70_spill] sm:$0xff] }
 0x171   :  { %v285_v36 = vsel %vm6750_vm15, %v6749_v44, %v6748_v3  ;;  %vm4667_vm5 = vcmp.eq.s32.totalorder %v6751_v57, 1  ;;  %vm4671_vm3 = vcmp.eq.s32.totalorder %v803_v47, 1  ;;  %v667_v45 = vmul.f32 %v6727_v31, %v659_v56  ;;  %v6757_v40 = vld [vmem:[#allocation81_spill] sm:$0xff]  ;;  %v6758_v44 = vld [vmem:[#allocation14_spill] sm:$0xff]  ;;  %v6761_v56 = vld [vmem:[#allocation24_spill] sm:$0xff] }
 0x172   :  { %v350_v3 = vrot.slane %v6734_v54, %v3701_v21  ;;  %v670_v57 = vadd.f32 %v666_v12, %v6757_v40  ;;  %v217_v10 = vmul.f32 %v6758_v44, %v209_v17  ;;  %v4685_v47 = vsel %vm389_vm1, 1, %v6743_v7  ;;  %v6760_v31 = vld [vmem:[#allocation46_spill] sm:$0xff]  ;;  %v4700_v40 = vpop.permute.xlu1 %1440 }
 0x173   :  { %6759 = vst [vmem:[#allocation71_spill] sm:$0xff] %v4685_v47  ;;  %v905_v2 = vrot.slane %v4650_v62, %v3709_v1  ;;  %vm6762_vm11 = vcmp.lt.s32.totalorder %v3624_v23, 96  ;;  %v261_v41 = vsel %vm4507_vm4, %v233_v8, 0.0  ;;  %v1435_v12 = vsel %vm4514_vm7, %v4375_v50, 0.0  ;;  %v6763_v44 = vld [vmem:[#allocation34_spill] sm:$0xff]  ;;  %v4717_v37 = vpop.permute.xlu0 %880 }
 0x174   :  { %v682_v19 = vsel %vm6762_vm11, %v6761_v56, %v6760_v31  ;;  %v311_v17 = vsel %vm4623_vm8, %v285_v36, 0.0  ;;  %vm6764_vm1 = vmmov %vm6762_vm11  ;;  %v1438_v56 = vsel %vm4527_vm0, %v4395_v39, 0.0  ;;  %v221_v33 = vadd.f32 %v217_v10, %v171_v51 }
 0x175   :  { %v681_v47 = vsel %vm6764_vm1, %v6760_v31, %v6763_v44  ;;  %v4710_v8 = vmul.f32 %v4700_v40, %v1435_v12  ;;  %v671_v50 = vadd.f32 %v667_v45, %v6765_v32  ;;  %vm6768_vm4 = vcmp.lt.s32.totalorder %v3624_v23, 90  ;;  %v6772_v45 = vld [vmem:[#allocation35_spill] sm:$0xff]  ;;  %v6775_v32 = vld [vmem:[#allocation45_spill] sm:$0xff] }
 0x176   :  { %v732_v36 = vsel %vm6768_vm4, %v6767_v38, %v6766_v55  ;;  %v4720_v29 = vmul.f32 %v4700_v40, %v1438_v56  ;;  %vm4722_vm7 = vcmp.eq.s32.totalorder %v350_v3, 1  ;;  %v708_v39 = vsel %vm4550_vm12, %v682_v19, 0.0  ;;  %vm6773_vm0 = vmmov %vm6768_vm4  ;;  %v6774_v31 = vld [vmem:[#allocation19_spill] sm:$0xff] }
 0x177   :  { %v269_v10 = vmul.f32 %v6771_v63, %v261_v41  ;;  %v731_v51 = vsel %vm6773_vm0, %v6766_v55, %v6772_v45  ;;  %v319_v12 = vmul.f32 %v6774_v31, %v311_v17  ;;  %v709_v3 = vsel %vm4578_vm10, %v681_v47, 0.0  ;;  %v4744_v41 = vpop.permute.xlu1 %331  ;;  %v6779_v17 = vld [vmem:[#allocation62_spill] sm:$0xff] }
 0x178   :  { %vm6433_vm8 = vcmp.lt.s32.totalorder %v3624_v23, 38  ;;  %vm4740_vm15 = vcmp.eq.s32.totalorder %v905_v2, 1  ;;  %6778 = vst [vmem:[#allocation68_spill] sm:$0xff] %v4744_v41  ;;  %v760_v55 = vsel %vm4603_vm6, %v732_v36, 0.0  ;;  %vm6780_vm12 = vcmp.lt.s32.totalorder %v3624_v23, 127  ;;  %v6782_v2 = vld [vmem:[#allocation13_spill] sm:$0xff] }
 0x179   :  { %v273_v19 = vadd.f32 %v269_v10, %v221_v33  ;;  %v334_v38 = vsel %vm6780_vm12, %v6779_v17, %v4744_v41  ;;  %vm6781_vm10 = vcmp.lt.s32.totalorder %v6713_v30, 4  ;;  %v716_v47 = vmul.f32 %v6782_v2, %v708_v39  ;;  %v6783_v33 = vld [vmem:[#allocation91_spill] sm:$0xff] }
 0x17a   :  { %v4755_v6 = vsel %vm6781_vm10, 1, %v6743_v7  ;;  %v761_v45 = vsel %vm4616_vm14, %v731_v51, 0.0  ;;  %v361_v48 = vsel %vm4722_vm7, %v334_v38, 0.0  ;;  %v849_v36 = vrot.slane %v6783_v33, %v3701_v21 }
 0x17b   :  { %v6784_v10 = vrot.slane %v6703_v15, %v3699_v60  ;;  %v717_v56 = vmul.f32 %v6782_v2, %v709_v3  ;;  %v323_v31 = vadd.f32 %v319_v12, %v273_v19  ;;  %v369_v39 = vmul.f32 %v6638_v58, %v361_v48  ;;  %v4784_v41 = vpop.permute.xlu1 %377  ;;  %v6788_v3 = vld [vmem:[#allocation28_spill] sm:$0xff] }
 0x17c   :  { %v853_v35 = vrot.slane %v6783_v33, %v3709_v1  ;;  %v768_v44 = vmul.f32 %v6636_v53, %v760_v55  ;;  %v810_v51 = vsel %vm4667_vm5, %v4407_v11, 0.0  ;;  %v811_v38 = vsel %vm4671_vm3, %v4402_v18, 0.0 }
 0x17d   :  { %vm4767_vm6 = vcmp.eq.s32.totalorder %v6784_v10, 1  ;;  %v4782_v10 = vpop.permute.xlu0 %928  ;;  %v893_v12 = vrot.slane %v4650_v62, %v3697_v46  ;;  %vm6789_vm14 = vcmp.lt.s32.totalorder %v3624_v23, 16  ;;  %v6790_v11 = vrot.slane %v3840_v28, %v3701_v21 }
 0x17e   :  { %6787 = vst [vmem:[#allocation27_spill] sm:$0xff] %v4782_v10  ;;  %v4792_v55 = vsel %vm6789_vm14, %v6788_v3, %v6708_v22  ;;  %v769_v18 = vmul.f32 %v6636_v53, %v761_v45  ;;  %v4804_v19 = vadd.f32 %v369_v39, %v323_v31  ;;  %v720_v2 = vadd.f32 %v716_v47, %v670_v57  ;;  %v6848_v31 = vld [vmem:[#allocation79_spill] sm:$0xff] }
 0x17f   :  { %vm4797_vm5 = vcmp.eq.s32.totalorder %v6790_v11, 1  ;;  %v886_v22 = vsel %vm6433_vm8, %v4717_v37, %v4354_v34  ;;  %v1350_v48 = vrot.slane %v4755_v6, %v3701_v21  ;;  %vm4812_vm3 = vcmp.eq.s32.totalorder %v849_v36, 1 }
 0x180   :  { %v721_v3 = vadd.f32 %v717_v56, %v671_v50  ;;  %v6795_v53 = vrot.slane %v6703_v15, %v3697_v46  ;;  %v818_v57 = vmul.f32 %v6639_v5, %v810_v51  ;;  %v819_v47 = vmul.f32 %v6639_v5, %v811_v38 }
 0x181   :  { %vm4825_vm1 = vcmp.eq.s32.totalorder %v853_v35, 1  ;;  %v6800_v36 = vrot.slane %v6703_v15, %v3709_v1  ;;  %v6803_v56 = vrot.slane %v3840_v28, %v3699_v60  ;;  %v772_v51 = vadd.f32 %v768_v44, %v720_v2  ;;  %v831_v35 = vpop.permute.xlu1 %830 }
 0x182   :  { %vm4819_vm11 = vcmp.eq.s32.totalorder %v6795_v53, 1  ;;  %vm6435_vm0 = vcmp.lt.s32.totalorder %v3624_v23, 116  ;;  %v1354_v5 = vrot.slane %v4755_v6, %v3709_v1  ;;  %vm4846_vm12 = vcmp.eq.s32.totalorder %v893_v12, 1 }
 0x183   :  { %vm4832_vm4 = vcmp.eq.s32.totalorder %v6800_v36, 1  ;;  %vm4839_vm7 = vcmp.eq.s32.totalorder %v6803_v56, 1  ;;  %v6808_v38 = vrot.slane %v6756_v14, %v3701_v21  ;;  %v773_v11 = vadd.f32 %v769_v18, %v721_v3  ;;  %v1332_v56 = vpop.permute.xlu0 %1331 }
 0x184   :  { %v6811_v44 = vrot.slane %v6756_v14, %v3699_v60  ;;  %v913_v12 = vsel %vm4740_vm15, %v886_v22, 0.0  ;;  %vm6814_vm2 = vcmp.lt.s32.totalorder %v3624_v23, 122  ;;  %v822_v22 = vadd.f32 %v818_v57, %v772_v51 }
 0x185   :  { %vm4853_vm10 = vcmp.eq.s32.totalorder %v6808_v38, 1  ;;  %v833_v53 = vsel %vm6814_vm2, %v6669_v20, %v831_v35  ;;  %vm6815_vm8 = vmmov %vm6814_vm2  ;;  %v6816_v38 = vld [vmem:[#allocation77_spill] sm:$0xff]  ;;  %v823_v61 = vadd.f32 %v819_v47, %v773_v11  ;;  %vm4883_vm2 = vcmp.eq.s32.totalorder %v1350_v48, 1  ;;  %v4887_v45 = vpop.permute.xlu1 %876 }
 0x186   :  { %vm4860_vm14 = vcmp.eq.s32.totalorder %v6811_v44, 1  ;;  %v836_v36 = vsel %vm6815_vm8, %v831_v35, %v6670_v49  ;;  %v860_v18 = vsel %vm4812_vm3, %v833_v53, 0.0  ;;  %v1300_v44 = vrot.slane %v6816_v38, %v3701_v21  ;;  %v6817_v49 = vld [vmem:[#allocation41_spill] sm:$0xff] }
 0x187   :  { %v861_v3 = vsel %vm4825_vm1, %v836_v36, 0.0  ;;  %v1304_v4 = vrot.slane %v6816_v38, %v3709_v1  ;;  %v868_v20 = vmul.f32 %v6680_v27, %v860_v18  ;;  %v921_v35 = vmul.f32 %v6817_v49, %v913_v12 }
 0x188   :  { %v869_v10 = vmul.f32 %v6680_v27, %v861_v3  ;;  %v1342_v53 = vrot.slane %v4755_v6, %v3697_v46  ;;  %v1346_v36 = vrot.slane %v4755_v6, %v3699_v60  ;;  %v6820_v57 = vrot.slane %v6756_v14, %v3709_v1  ;;  %v6824_v6 = vld [vmem:[#allocation72_spill] sm:$0xff] }
 0x189   :  { %v1334_v27 = vsel %vm6435_vm0, %v4500_v16, %v1332_v56  ;;  %v4903_v48 = vadd.f32 %v868_v20, %v822_v22  ;;  %vm6823_vm15 = vcmp.lt.s32.totalorder %v3624_v23, 38  ;;  %v1399_v12 = vsel %vm4767_vm6, %v6824_v6, 0.0  ;;  %v1280_v22 = vpop.permute.xlu1 %1279 }
 0x18a   :  { %vm4896_vm8 = vcmp.eq.s32.totalorder %v6820_v57, 1  ;;  %v873_v51 = vadd.f32 %v869_v10, %v823_v61  ;;  %v885_v11 = vsel %vm6823_vm15, %v4354_v34, %v4887_v45  ;;  %v1337_v18 = vsel %vm6435_vm0, %v1332_v56, %v4455_v0 }
 0x18b   :  { %vm4915_vm3 = vcmp.eq.s32.totalorder %v1354_v5, 1  ;;  %v910_v10 = vsel %vm4846_vm12, %v885_v11, 0.0  ;;  %v6827_v61 = vrot.slane %v6756_v14, %v3697_v46  ;;  %vm4929_vm6 = vcmp.eq.s32.totalorder %v1300_v44, 1 }
 0x18c   :  { %v918_v17 = vmul.f32 %v6817_v49, %v910_v10  ;;  %vm4933_vm15 = vcmp.eq.s32.totalorder %v1304_v4, 1  ;;  %v4937_v56 = vadd.f32 %v921_v35, %v873_v51  ;;  %v1437_v14 = vsel %vm4797_vm5, %v4415_v52, 0.0  ;;  %v6844_v51 = vld [vmem:[#allocation60_spill] sm:$0xff] }
 0x18d   :  { %vm4924_vm1 = vcmp.eq.s32.totalorder %v6827_v61, 1  ;;  %v1361_v15 = vsel %vm4883_vm2, %v1334_v27, 0.0  ;;  %vm4944_vm12 = vcmp.eq.s32.totalorder %v1342_v53, 1  ;;  %vm4948_vm0 = vcmp.eq.s32.totalorder %v1346_v36, 1  ;;  %v6842_v53 = vld [vmem:[#allocation23_spill] sm:$0xff] }
 0x18e   :  { %6834 = vst [vmem:[#allocation53_spill] sm:$0xff] %v4937_v56  ;;  %v1362_v4 = vsel %vm4915_vm3, %v1337_v18, 0.0  ;;  %v4955_v35 = vadd.f32 %v918_v17, %v4486_v59  ;;  %vm6840_vm5 = vcmp.lt.s32.totalorder %v3624_v23, 12  ;;  %v1398_v36 = vsel %vm4819_vm11, %v6842_v53, 0.0  ;;  %v6849_v18 = vld [vmem:[#allocation75_spill] sm:$0xff] }
 0x18f   :  { %v1284_v52 = vsel %vm6840_vm5, %v1280_v22, %v6839_v9  ;;  %vm6841_vm2 = vmmov %vm6840_vm5  ;;  %vm6843_vm3 = vcmp.lt.s32.totalorder %v6681_v13, 15  ;;  %v6845_v11 = vrot.slane %v6844_v51, %v3709_v1  ;;  %v1401_v6 = vsel %vm4832_vm4, %v6848_v31, 0.0  ;;  %v6850_v17 = vld [vmem:[#allocation63_spill] sm:$0xff]  ;;  %v6855_v9 = vld [vmem:[#allocation86_spill] sm:$0xff] }
 0x190   :  { %v1285_v33 = vsel %vm6841_vm2, %v4545_v26, %v1280_v22  ;;  %v1312_v27 = vsel %vm4933_vm15, %v1284_v52, 0.0  ;;  %v4973_v59 = vsel %vm6843_vm3, 1, %v6743_v7  ;;  %v1436_v3 = vsel %vm4839_vm7, %v6849_v18, 0.0  ;;  %v6854_v22 = vld [vmem:[#allocation55_spill] sm:$0xff]  ;;  %v6856_v52 = vld [vmem:[#allocation58_spill] sm:$0xff] }
 0x191   :  { %v1311_v57 = vsel %vm4929_vm6, %v1285_v33, 0.0  ;;  %vm4978_vm5 = vcmp.eq.s32.totalorder %v6845_v11, 1  ;;  %v1320_v61 = vmul.f32 %v6726_v24, %v1312_v27  ;;  %v6851_v38 = vrot.slane %v6850_v17, %v3699_v60  ;;  %v6900_v27 = vld [vmem:[#allocation83_spill] sm:$0xff] }
 0x192   :  { %v1319_v10 = vmul.f32 %v6726_v24, %v1311_v57  ;;  %v1475_v50 = vsel %vm4853_vm10, %v6854_v22, 0.0  ;;  %v1474_v39 = vsel %vm4860_vm14, %v6855_v9, 0.0  ;;  %v1369_v33 = vmul.f32 %v6856_v52, %v1361_v15  ;;  %v1328_v24 = vpop.permute.xlu1 %1327 }
 0x193   :  { %vm4993_vm11 = vcmp.eq.s32.totalorder %v6851_v38, 1  ;;  %v1370_v53 = vmul.f32 %v6856_v52, %v1362_v4  ;;  %v6857_v57 = vrot.slane %v6850_v17, %v3709_v1  ;;  %v1324_v28 = vadd.f32 %v1320_v61, %v4556_v42  ;;  %v6862_v4 = vld [vmem:[#allocation64_spill] sm:$0xff] }
 0x194   :  { %v1323_v51 = vadd.f32 %v1319_v10, %v4554_v43  ;;  %vm6860_vm7 = vcmp.lt.s32.totalorder %v3624_v23, 116  ;;  %v6863_v11 = vrot.slane %v6862_v4, %v3699_v60  ;;  %v6866_v43 = vsel %vm4567_vm9, %v6775_v32, 0.0  ;;  %v6867_v42 = vld [vmem:[#allocation32_spill] sm:$0xff] }
 0x195   :  { %vm5008_vm4 = vcmp.eq.s32.totalorder %v6857_v57, 1  ;;  %v1335_v2 = vsel %vm6860_vm7, %v1328_v24, %v4500_v16  ;;  %vm6861_vm10 = vmmov %vm6860_vm7  ;;  %v1408_v18 = vmul.f32 %v6867_v42, %v6866_v43  ;;  %v1409_v10 = vmul.f32 %v6867_v42, %v1401_v6  ;;  %v5033_v16 = vpop.permute.xlu0 %1031 }
 0x196   :  { %v1336_v15 = vsel %vm6861_vm10, %v4455_v0, %v1328_v24  ;;  %vm5023_vm14 = vcmp.eq.s32.totalorder %v6863_v11, 1  ;;  %6868 = vst [vmem:[#allocation51_spill] sm:$0xff] %v5033_v16  ;;  %v1360_v61 = vsel %vm4948_vm0, %v1335_v2, 0.0  ;;  %v1373_v17 = vadd.f32 %v1369_v33, %v1323_v51  ;;  %v6869_v24 = vld [vmem:[#allocation26_spill] sm:$0xff]  ;;  %v1479_v57 = vpop.permute.xlu1 %1478  ;;  %v6870_v2 = vld [vmem:[#allocation92_spill] sm:$0xff] }
 0x197   :  { %v1359_v0 = vsel %vm4944_vm12, %v1336_v15, 0.0  ;;  %v1374_v38 = vadd.f32 %v1370_v53, %v1324_v28  ;;  %v1368_v25 = vmul.f32 %v6856_v52, %v1360_v61  ;;  %v1406_v32 = vmul.f32 %v6867_v42, %v1398_v36  ;;  %v6871_v53 = vld [vmem:[#allocation74_spill] sm:$0xff]  ;;  %vm6899_vm12 = vmmov %vm6843_vm3 }
 0x198   :  { %v1367_v22 = vmul.f32 %v6856_v52, %v1359_v0  ;;  %v1407_v9 = vmul.f32 %v6867_v42, %v1399_v12  ;;  %v1476_v6 = vsel %vm4896_vm8, %v6869_v24, 0.0  ;;  %v1445_v20 = vmul.f32 %v4700_v40, %v1437_v14  ;;  %v6872_v28 = vld [vmem:[#allocation38_spill] sm:$0xff] }
 0x199   :  { %v1412_v15 = vadd.f32 %v1408_v18, %v1373_v17  ;;  %v1413_v44 = vadd.f32 %v1409_v10, %v1374_v38  ;;  %v1372_v51 = vadd.f32 %v1368_v25, %v6871_v53  ;;  %v1473_v52 = vsel %vm4924_vm1, %v6872_v28, 0.0  ;;  %v6873_v0 = vld [vmem:[#allocation30_spill] sm:$0xff]  ;;  %v6893_v53 = vld [vmem:[#allocation48_spill] sm:$0xff] }
 0x19a   :  { %v1371_v33 = vadd.f32 %v1367_v22, %v6870_v2  ;;  %v1444_v36 = vmul.f32 %v4700_v40, %v1436_v3  ;;  %v1483_v12 = vmul.f32 %v1479_v57, %v1475_v50  ;;  %v1484_v11 = vmul.f32 %v1479_v57, %v1476_v6  ;;  %v6874_v18 = vld [vmem:[#allocation42_spill] sm:$0xff]  ;;  %v5070_v22 = vpop.permute.xlu0 %479  ;;  %v6894_v28 = vld [vmem:[#allocation44_spill] sm:$0xff] }
 0x19b   :  { %v1411_v47 = vadd.f32 %v1407_v9, %v1372_v51  ;;  %v1449_v42 = vadd.f32 %v1445_v20, %v1412_v15  ;;  %v1450_v14 = vadd.f32 %v4720_v29, %v1413_v44  ;;  %vm6875_vm9 = vcmp.lt.s32.totalorder %v3624_v23, 16  ;;  %v6880_v3 = vld [vmem:[#allocation78_spill] sm:$0xff]  ;;  %v6883_v9 = vld [vmem:[#allocation69_spill] sm:$0xff] }
 0x19c   :  { %v1410_v43 = vadd.f32 %v1406_v32, %v1371_v33  ;;  %v182_v10 = vsel %vm6875_vm9, %v6874_v18, %v6873_v0  ;;  %v6876_v61 = vrot.slane %v6862_v4, %v3709_v1  ;;  %v6881_v50 = vsel %vm4474_vm13, %v6880_v3, 0.0  ;;  %v6882_v17 = vld [vmem:[#allocation90_spill] sm:$0xff]  ;;  %v5072_v32 = vpop.permute.xlu1 %427  ;;  %v6897_v18 = vld [vmem:[#allocation71_spill] sm:$0xff] }
 0x19d   :  { %v166_v38 = vmul.f32 %v6882_v17, %v6881_v50  ;;  %v1481_v29 = vmul.f32 %v1479_v57, %v1473_v52  ;;  %v1482_v25 = vmul.f32 %v1479_v57, %v1474_v39  ;;  %v6884_v24 = vrot.slane %v6883_v9, %v3699_v60  ;;  %v6895_v52 = vld [vmem:[#allocation29_spill] sm:$0xff]  ;;  %v6966_v39 = vld [vmem:[#allocation36_spill] sm:$0xff] }
 0x19e   :  { %vm5061_vm0 = vcmp.eq.s32.totalorder %v6876_v61, 1  ;;  %v6887_v6 = vrot.slane %v6883_v9, %v3709_v1  ;;  %v6890_v15 = vrot.slane %v6734_v54, %v3699_v60  ;;  %v1447_v57 = vadd.f32 %v4710_v8, %v1410_v43 }
 0x19f   :  { %vm5077_vm8 = vcmp.eq.s32.totalorder %v6884_v24, 1  ;;  %v1448_v44 = vadd.f32 %v1444_v36, %v1411_v47  ;;  %v5096_v2 = vadd.f32 %v1483_v12, %v1449_v42  ;;  %v5098_v33 = vadd.f32 %v1484_v11, %v1450_v14 }
 0x1a0   :  { %vm5084_vm1 = vcmp.eq.s32.totalorder %v6887_v6, 1  ;;  %vm5091_vm13 = vcmp.eq.s32.totalorder %v6890_v15, 1  ;;  %v160_v51 = vsel %vm4978_vm5, %v6893_v53, 0.0  ;;  %vm6896_vm6 = vcmp.lt.s32.totalorder %v3624_v23, 15  ;;  %v5127_v5 = vpop.permute.xlu1 %431 }
 0x1a1   :  { %v234_v0 = vsel %vm6896_vm6, %v6895_v52, %v6894_v28  ;;  %v402_v61 = vrot.slane %v6897_v18, %v3701_v21  ;;  %v394_v8 = vrot.slane %v6897_v18, %v3697_v46  ;;  %v208_v36 = vsel %vm4993_vm11, %v4792_v55, 0.0  ;;  %vm6910_vm10 = vmmov %vm6896_vm6 }
 0x1a2   :  { %v406_v12 = vrot.slane %v6897_v18, %v3709_v1  ;;  %v5116_v26 = vadd.f32 %v1481_v29, %v1447_v57  ;;  %v5118_v11 = vadd.f32 %v1482_v25, %v1448_v44  ;;  %v210_v43 = vsel %vm5008_vm4, %v182_v10, 0.0  ;;  %v5158_v25 = vpop.permute.xlu0 %932  ;;  %v6908_v57 = vld [vmem:[#allocation31_spill] sm:$0xff]  ;;  %v6909_v44 = vld [vmem:[#allocation61_spill] sm:$0xff] }
 0x1a3   :  { %v168_v47 = vmul.f32 %v6882_v17, %v160_v51  ;;  %v901_v42 = vrot.slane %v4650_v62, %v3701_v21  ;;  %v444_v14 = vrot.slane %v4973_v59, %v3697_v46  ;;  %vm6898_vm15 = vcmp.lt.s32.totalorder %v6713_v30, 15  ;;  %v6905_v17 = vld [vmem:[#allocation14_spill] sm:$0xff] }
 0x1a4   :  { %vm490_vm2 = vmand %vm6899_vm12, %vm6898_vm15  ;;  %v260_v55 = vsel %vm5023_vm14, %v234_v0, 0.0  ;;  %v170_v10 = vadd.f32 %v166_v38, %v6900_v27  ;;  %vm383_vm3 = vcmp.lt.s32.totalorder %v3624_v23, 113  ;;  %v6901_v40 = vrot.slane %v6734_v54, %v3709_v1  ;;  %v5181_v0 = vpop.permute.xlu1 %926 }
 0x1a5   :  { %vm6904_vm11 = vcmp.lt.s32.totalorder %v6681_v13, 10  ;;  %v216_v29 = vmul.f32 %v6905_v17, %v208_v36  ;;  %v398_v31 = vrot.slane %v6897_v18, %v3699_v60  ;;  %vm5152_vm4 = vcmp.eq.s32.totalorder %v394_v8, 1  ;;  %v6918_v8 = vld [vmem:[#allocation67_spill] sm:$0xff] }
 0x1a6   :  { %vm5140_vm5 = vcmp.eq.s32.totalorder %v6901_v40, 1  ;;  %v5147_v50 = vsel %vm6904_vm11, 1, %v6743_v7  ;;  %v897_v54 = vrot.slane %v4650_v62, %v3699_v60  ;;  %v218_v9 = vmul.f32 %v6905_v17, %v210_v43  ;;  %v6911_v62 = vld [vmem:[#allocation85_spill] sm:$0xff]  ;;  %vm6917_vm15 = vmmov %vm6904_vm11  ;;  %v6919_v36 = vld [vmem:[#allocation43_spill] sm:$0xff] }
 0x1a7   :  { %vm435_vm7 = vcmp.lt.s32.totalorder %v3624_v23, 112  ;;  %v448_v24 = vrot.slane %v4973_v59, %v3699_v60  ;;  %v5165_v6 = vsel %vm490_vm2, 1, %v6743_v7  ;;  %v268_v15 = vmul.f32 %v6771_v63, %v260_v55  ;;  %v6926_v17 = vld [vmem:[#allocation68_spill] sm:$0xff] }
 0x1a8   :  { %v232_v53 = vsel %vm6910_vm10, %v6909_v44, %v6908_v57  ;;  %v172_v51 = vadd.f32 %v168_v47, %v6911_v62  ;;  %vm5173_vm14 = vcmp.eq.s32.totalorder %v402_v61, 1  ;;  %vm5177_vm9 = vcmp.eq.s32.totalorder %v444_v14, 1  ;;  %v5242_v4 = vpop.permute.xlu1 %930 }
 0x1a9   :  { %vm6916_vm6 = vcmp.lt.s32.totalorder %v6713_v30, 10  ;;  %vm6920_vm2 = vcmp.lt.s32.totalorder %v3624_v23, 1  ;;  %v220_v43 = vadd.f32 %v216_v29, %v170_v10  ;;  %vm5193_vm11 = vcmp.eq.s32.totalorder %v406_v12, 1  ;;  %v5291_v12 = vld [vmem:[%s6288_s0 + $0x38] sm:$0xff]  ;;  %v6963_v30 = vld [vmem:[#allocation89_spill] sm:$0xff] }
 0x1aa   :  { %vm989_vm12 = vmand %vm6917_vm15, %vm6916_vm6  ;;  %v286_v61 = vsel %vm6920_vm2, %v6919_v36, %v6918_v8  ;;  %v452_v14 = vrot.slane %v4973_v59, %v3701_v21  ;;  %v456_v55 = vrot.slane %v4973_v59, %v3709_v1  ;;  %vm5201_vm10 = vcmp.eq.s32.totalorder %v398_v31, 1  ;;  %v6925_v59 = vld [vmem:[#allocation59_spill] sm:$0xff]  ;;  %v6928_v8 = vld [vmem:[#allocation33_spill] sm:$0xff] }
 0x1ab   :  { %v495_v10 = vrot.slane %v5165_v6, %v3697_v46  ;;  %v262_v40 = vsel %vm5061_vm0, %v232_v53, 0.0  ;;  %vm6927_vm6 = vcmp.lt.s32.totalorder %v3624_v23, 127  ;;  %v507_v31 = vrot.slane %v5165_v6, %v3709_v1  ;;  %v6929_v53 = vld [vmem:[#allocation49_spill] sm:$0xff] }
 0x1ac   :  { %v337_v29 = vsel %vm6927_vm6, %v6926_v17, %v6925_v59  ;;  %v5222_v57 = vsel %vm989_vm12, 1, %v6743_v7  ;;  %v310_v44 = vsel %vm5077_vm8, %v286_v61, 0.0  ;;  %v222_v62 = vadd.f32 %v218_v9, %v172_v51  ;;  %v5236_v17 = vpop.permute.xlu0 %978  ;;  %v5259_v51 = vld [vmem:[%s6288_s0 + $0x30] sm:$0xff]  ;;  %v5301_v13 = vpop.permute.xlu1 %531  ;;  %s5703_s0 = sld [smem:[#allocation2 + $0x102]] }
 0x1ad   :  { %v312_v34 = vsel %vm5084_vm1, %v6928_v8, 0.0  ;;  %v360_v36 = vsel %vm5091_vm13, %v6929_v53, 0.0  ;;  %vm5232_vm0 = vcmp.eq.s32.totalorder %v901_v42, 1  ;;  %vm5238_vm15 = vcmp.eq.s32.totalorder %v448_v24, 1  ;;  %v6941_v8 = vld [vmem:[#allocation19_spill] sm:$0xff] }
 0x1ae   :  { %v272_v9 = vadd.f32 %v268_v15, %v220_v43  ;;  %vm5244_vm8 = vcmp.eq.s32.totalorder %v452_v14, 1  ;;  %vm5248_vm1 = vcmp.eq.s32.totalorder %v456_v55, 1  ;;  %v499_v42 = vrot.slane %v5165_v6, %v3699_v60  ;;  %v6938_v43 = vld [vmem:[#allocation93_spill] sm:$0xff] }
 0x1af   :  { %v503_v24 = vrot.slane %v5165_v6, %v3701_v21  ;;  %v270_v15 = vmul.f32 %v6771_v63, %v262_v40  ;;  %v362_v61 = vsel %vm5140_vm5, %v337_v29, 0.0  ;;  %v386_v14 = vsel %vm383_vm3, %v6938_v43, %v4784_v41 }
 0x1b0   :  { %vm5268_vm13 = vcmp.eq.s32.totalorder %v897_v54, 1  ;;  %vm485_vm12 = vcmp.lt.s32.totalorder %v3624_v23, 111  ;;  %v994_v6 = vrot.slane %v5222_v57, %v3697_v46  ;;  %v318_v53 = vmul.f32 %v6941_v8, %v310_v44  ;;  %v5317_v16 = vpop.permute.xlu0 %1493  ;;  %v434_v47 = vpop.permute.xlu1 %433 }
 0x1b1   :  { %v320_v63 = vmul.f32 %v6941_v8, %v312_v34  ;;  %v368_v3 = vmul.f32 %v6638_v58, %v360_v36  ;;  %vm5278_vm5 = vcmp.eq.s32.totalorder %v495_v10, 1  ;;  %vm5282_vm2 = vcmp.eq.s32.totalorder %v507_v31, 1  ;;  %v6946_v34 = vld [vmem:[#allocation52_spill] sm:$0xff]  ;;  %v6947_v8 = vld [vmem:[#allocation94_spill] sm:$0xff]  ;;  %v6948_v36 = vld [vmem:[#allocation39_spill] sm:$0xff] }
 0x1b2   :  { %v274_v44 = vadd.f32 %v270_v15, %v222_v62  ;;  %v384_v10 = vsel %vm383_vm3, %v6947_v8, %v6946_v34  ;;  %v438_v31 = vsel %vm435_vm7, %v5072_v32, %v6948_v36  ;;  %v1574_v29 = vcombine.high %v5259_v51, %v5259_v51 }
 0x1b3   :  { %v322_v27 = vadd.f32 %v318_v53, %v272_v9  ;;  %v387_v62 = vsel %vm383_vm3, %v6946_v34, %v6938_v43  ;;  %v370_v15 = vmul.f32 %v6638_v58, %v362_v61  ;;  %v411_v18 = vsel %vm5152_vm4, %v386_v14, 0.0 }
 0x1b4   :  { %v385_v56 = vsel %vm383_vm3, %v4784_v41, %v6947_v8  ;;  %v1575_v9 = vcombine.high %v5291_v12, %v5291_v12  ;;  %v1002_v43 = vrot.slane %v5222_v57, %v3701_v21  ;;  %v1006_v58 = vrot.slane %v5222_v57, %v3709_v1 }
 0x1b5   :  { %v324_v38 = vadd.f32 %v320_v63, %v274_v44  ;;  %v372_v61 = vadd.f32 %v368_v3, %v322_v27  ;;  %v413_v14 = vsel %vm5173_vm14, %v384_v10, 0.0  ;;  %v461_v53 = vsel %vm5177_vm9, %v438_v31, 0.0  ;;  %v6953_v63 = vld [vmem:[#allocation50_spill] sm:$0xff]  ;;  %v6955_v27 = vld [vmem:[#allocation56_spill] sm:$0xff] }
 0x1b6   :  { %vm5329_vm3 = vcmp.eq.s32.totalorder %v499_v42, 1  ;;  %vm5333_vm4 = vcmp.eq.s32.totalorder %v503_v24, 1  ;;  %v414_v8 = vsel %vm5193_vm11, %v387_v62, 0.0  ;;  %vm6954_vm6 = vcmp.lt.s32.totalorder %v3624_v23, 38 }
 0x1b7   :  { %v883_v28 = vsel %vm6954_vm6, %v6953_v63, %v4717_v37  ;;  %v419_v3 = vmul.f32 %v6955_v27, %v411_v18  ;;  %v437_v52 = vsel %vm435_vm7, %v6948_v36, %v5127_v5  ;;  %v6956_v42 = vrot.slane %v5147_v50, %v3697_v46  ;;  %vm6962_vm11 = vmmov %vm6954_vm6 }
 0x1b8   :  { %v374_v44 = vadd.f32 %v370_v15, %v324_v38  ;;  %v412_v10 = vsel %vm5201_vm10, %v385_v56, 0.0  ;;  %v6959_v37 = vrot.slane %v5147_v50, %v3699_v60  ;;  %v436_v46 = vsel %vm435_vm7, %v5127_v5, %v434_v47 }
 0x1b9   :  { %vm5351_vm14 = vcmp.eq.s32.totalorder %v6956_v42, 1  ;;  %v439_v36 = vsel %vm435_vm7, %v434_v47, %v5072_v32  ;;  %v421_v31 = vmul.f32 %v6955_v27, %v413_v14  ;;  %v884_v56 = vsel %vm6962_vm11, %v4887_v45, %v6953_v63  ;;  %v484_v63 = vpop.permute.xlu0 %483 }
 0x1ba   :  { %vm5360_vm9 = vcmp.eq.s32.totalorder %v6959_v37, 1  ;;  %v469_v62 = vmul.f32 %v6963_v30, %v461_v53  ;;  %v464_v15 = vsel %vm5248_vm1, %v439_v36, 0.0  ;;  %vm984_vm10 = vcmp.lt.s32.totalorder %v3624_v23, 26 }
 0x1bb   :  { %v422_v5 = vmul.f32 %v6955_v27, %v414_v8  ;;  %v912_v38 = vsel %vm5232_vm0, %v883_v28, 0.0  ;;  %v462_v32 = vsel %vm5238_vm15, %v437_v52, 0.0  ;;  %v472_v14 = vmul.f32 %v6963_v30, %v464_v15  ;;  %v478_v8 = vpop.permute.xlu1 %477 }
 0x1bc   :  { %vm5385_vm7 = vcmp.eq.s32.totalorder %v994_v6, 1  ;;  %v420_v45 = vmul.f32 %v6955_v27, %v412_v10  ;;  %v423_v53 = vadd.f32 %v419_v3, %v6966_v39  ;;  %v425_v47 = vadd.f32 %v421_v31, %v4804_v19  ;;  %v6973_v31 = vld [vmem:[#allocation37_spill] sm:$0xff] }
 0x1bd   :  { %v463_v59 = vsel %vm5244_vm8, %v436_v46, 0.0  ;;  %v911_v7 = vsel %vm5268_vm13, %v884_v56, 0.0  ;;  %v6967_v6 = vrot.slane %v5147_v50, %v3709_v1  ;;  %v426_v27 = vadd.f32 %v422_v5, %v374_v44  ;;  %v6977_v5 = vld [vmem:[#allocation27_spill] sm:$0xff] }
 0x1be   :  { %v488_v3 = vsel %vm485_vm12, %v478_v8, %v5070_v22  ;;  %v489_v19 = vsel %vm485_vm12, %v484_v63, %v478_v8  ;;  %v473_v20 = vadd.f32 %v469_v62, %v423_v53  ;;  %v470_v52 = vmul.f32 %v6963_v30, %v462_v32  ;;  %v6988_v1 = vld [vmem:[#allocation87_spill] sm:$0xff] }
 0x1bf   :  { %vm5399_vm0 = vcmp.eq.s32.totalorder %v6967_v6, 1  ;;  %v512_v55 = vsel %vm5278_vm5, %v488_v3, 0.0  ;;  %v515_v10 = vsel %vm5282_vm2, %v489_v19, 0.0  ;;  %v6970_v37 = vrot.slane %v5147_v50, %v3701_v21  ;;  %v6980_v19 = vld [vmem:[#allocation76_spill] sm:$0xff] }
 0x1c0   :  { %v471_v46 = vmul.f32 %v6963_v30, %v463_v59  ;;  %v476_v36 = vadd.f32 %v472_v14, %v426_v27  ;;  %v520_v56 = vmul.f32 %v6973_v31, %v512_v55  ;;  %v523_v62 = vmul.f32 %v6973_v31, %v515_v10  ;;  %v482_v14 = vpop.permute.xlu1 %481 }
 0x1c1   :  { %vm5416_vm15 = vcmp.eq.s32.totalorder %v6970_v37, 1  ;;  %v6974_v40 = vrot.slane %v5222_v57, %v3699_v60  ;;  %v424_v15 = vadd.f32 %v420_v45, %v372_v61  ;;  %v919_v50 = vmul.f32 %v6817_v49, %v911_v7 }
 0x1c2   :  { %vm6978_vm1 = vcmp.lt.s32.totalorder %v3624_v23, 32  ;;  %vm540_vm5 = vcmask 1043456   ;;  %v524_v60 = vadd.f32 %v520_v56, %v473_v20  ;;  %v527_v39 = vadd.f32 %v523_v62, %v476_v36 }
 0x1c3   :  { %vm5426_vm8 = vcmp.eq.s32.totalorder %v6974_v40, 1  ;;  %v937_v30 = vsel %vm6978_vm1, %v5181_v0, %v6977_v5  ;;  %vm6979_vm13 = vmmov %vm6978_vm1  ;;  %v486_v53 = vsel %vm485_vm12, %v482_v14, %v484_v63  ;;  %v487_v61 = vsel %vm485_vm12, %v5070_v22, %v482_v14 }
 0x1c4   :  { %v936_v32 = vsel %vm6979_vm13, %v6977_v5, %v5242_v4  ;;  %v920_v45 = vmul.f32 %v6817_v49, %v912_v38  ;;  %v474_v59 = vadd.f32 %v470_v52, %v424_v15  ;;  %v513_v8 = vsel %vm5329_vm3, %v487_v61, 0.0  ;;  %vm6981_vm12 = vmmov %vm6978_vm1  ;;  %v977_v34 = vpop.permute.xlu1 %976 }
 0x1c5   :  { %v514_v7 = vsel %vm5333_vm4, %v486_v53, 0.0  ;;  %v960_v6 = vsel %vm5351_vm14, %v937_v30, 0.0  ;;  %v475_v27 = vadd.f32 %v471_v46, %v425_v47  ;;  %v521_v3 = vmul.f32 %v6973_v31, %v513_v8  ;;  %vm6983_vm2 = vmmov %vm6978_vm1 }
 0x1c6   :  { %v522_v63 = vmul.f32 %v6973_v31, %v514_v7  ;;  %v923_v20 = vadd.f32 %v919_v50, %v6980_v19  ;;  %v938_v49 = vsel %vm6981_vm12, %v5158_v25, %v5181_v0  ;;  %v924_v22 = vadd.f32 %v920_v45, %v4903_v48  ;;  %v6982_v0 = vld [vmem:[#allocation57_spill] sm:$0xff] }
 0x1c7   :  { %v961_v41 = vsel %vm5360_vm9, %v936_v32, 0.0  ;;  %v5462_v24 = vadd.f32 %v5301_v13, %v524_v60  ;;  %v525_v38 = vadd.f32 %v521_v3, %v474_v59  ;;  %v987_v52 = vsel %vm984_vm10, %v977_v34, %v5236_v17  ;;  %v6989_v59 = vld [vmem:[#allocation51_spill] sm:$0xff]  ;;  %v6990_v3 = vld [vmem:[#allocation53_spill] sm:$0xff] }
 0x1c8   :  { %v526_v47 = vadd.f32 %v522_v63, %v475_v27  ;;  %v5469_v55 = vadd.f32 %v5317_v16, %v5096_v2  ;;  %v5473_v48 = vadd.f32 %v5317_v16, %v5098_v33  ;;  %v968_v18 = vmul.f32 %v6982_v0, %v960_v6  ;;  %v981_v31 = vpop.permute.xlu1 %980 }
 0x1c9   :  { %v1011_v10 = vsel %vm5385_vm7, %v987_v52, 0.0  ;;  %v935_v37 = vsel %vm6983_vm2, %v5242_v4, %v5158_v25  ;;  %v969_v46 = vmul.f32 %v6982_v0, %v961_v41  ;;  %v5484_v36 = vadd.f32 %v5301_v13, %v525_v38  ;;  %v1587_v52 = vpop.permute.xlu0 %1586 }
 0x1ca   :  { %v5487_v2 = vadd.f32 %v5301_v13, %v526_v47  ;;  %vm5492_vm6 = vcmp.eq.s32.totalorder %v1002_v43, 1  ;;  %vm5499_vm3 = vcmp.eq.s32.totalorder %v1006_v58, 1  ;;  %v5505_v4 = vadd.f32 %v5317_v16, %v5116_v26 }
 0x1cb   :  { %v5509_v42 = vadd.f32 %v5317_v16, %v5118_v11  ;;  %v963_v21 = vsel %vm5399_vm0, %v938_v49, 0.0  ;;  %v5514_v43 = vadd.f32 %v5301_v13, %v527_v39  ;;  %v1019_v57 = vmul.f32 %v6988_v1, %v1011_v10 }
 0x1cc   :  { %v986_v58 = vsel %vm984_vm10, %v5236_v17, %v981_v31  ;;  %v541_v26 = vsel %vm540_vm5, %v5462_v24, 0.0  ;;  %v542_v16 = vsel %vm540_vm5, %v5484_v36, 0.0  ;;  %v962_v11 = vsel %vm5416_vm15, %v935_v37, 0.0  ;;  %v1570_v5 = vpop.permute.xlu1 %1569 }
 0x1cd   :  { %v1012_v13 = vsel %vm5426_vm8, %v986_v58, 0.0  ;;  %v543_v28 = vadd.f32 %v542_v16, %v541_v26  ;;  %v1515_v56 = vmul.f32 %v5469_v55, %v5469_v55  ;;  %v972_v62 = vadd.f32 %v968_v18, %v4955_v35 }
 0x1ce   :  { %v973_v40 = vadd.f32 %v969_v46, %v923_v20  ;;  %v1020_v17 = vmul.f32 %v6988_v1, %v1012_v13  ;;  %v544_v15 = vsel %vm540_vm5, %v5487_v2, 0.0  ;;  %v971_v50 = vmul.f32 %v6982_v0, %v963_v21 }
 0x1cf   :  { %v545_v44 = vadd.f32 %v544_v15, %v543_v28  ;;  %v1513_v54 = vmul.f32 %v5505_v4, %v5505_v4  ;;  %v1514_v30 = vmul.f32 %v5509_v42, %v5509_v42  ;;  %v970_v32 = vmul.f32 %v6982_v0, %v962_v11 }
 0x1d0   :  { %v1023_v14 = vadd.f32 %v1019_v57, %v972_v62  ;;  %v1024_v35 = vadd.f32 %v1020_v17, %v973_v40  ;;  %v546_v60 = vsel %vm540_vm5, %v5514_v43, 0.0  ;;  %v5544_v53 = vmul.f32 %v5473_v48, %v5473_v48  ;;  %v983_v19 = vpop.permute.xlu1 %982 }
 0x1d1   :  { %v547_v39 = vadd.f32 %v546_v60, %v545_v44  ;;  %v5547_v61 = vsel %vm540_vm5, %v1515_v56, 0.0  ;;  %v1504_v45 = vsel %vm540_vm5, %v5505_v4, 0.0  ;;  %v1578_v7 = vmul.f32 %v5259_v51, %v1570_v5 }
 0x1d2   :  { %v5552_v8 = vadd.f32 %v6989_v59, %v1024_v35  ;;  %v1579_v6 = vmul.f32 %v1574_v29, %v1570_v5  ;;  %v1505_v27 = vsel %vm540_vm5, %v5509_v42, 0.0  ;;  %v975_v63 = vadd.f32 %v971_v50, %v6990_v3 }
 0x1d3   :  { %548 = vadd.xlane.f32.xlu1 %v547_v39  ;;  %v551_v20 = vmul.f32 %v5484_v36, %v5484_v36  ;;  %v1517_v49 = vsel %vm540_vm5, %v1513_v54, 0.0  ;;  %v1518_v41 = vsel %vm540_vm5, %v1514_v30, 0.0  ;;  %v974_v38 = vadd.f32 %v970_v32, %v924_v22 }
 0x1d4   :  { %v5566_v47 = vadd.f32 %v6989_v59, %v1023_v14  ;;  %v985_v51 = vsel %vm984_vm10, %v981_v31, %v983_v19  ;;  %v988_v29 = vsel %vm984_vm10, %v983_v19, %v977_v34  ;;  %v1052_v10 = vmul.f32 %v5552_v8, %v5552_v8 }
 0x1d5   :  { %v1013_v0 = vsel %vm5492_vm6, %v985_v51, 0.0  ;;  %v1014_v18 = vsel %vm5499_vm3, %v988_v29, 0.0  ;;  %v550_v22 = vmul.f32 %v5462_v24, %v5462_v24  ;;  %v5580_v37 = vadd.f32 %v1587_v52, %v1578_v7 }
 0x1d6   :  { %v5582_v46 = vadd.f32 %v1587_v52, %v1579_v6  ;;  %v1021_v23 = vmul.f32 %v6988_v1, %v1013_v0  ;;  %v1022_v34 = vmul.f32 %v6988_v1, %v1014_v18  ;;  %v1580_v33 = vmul.f32 %v5291_v12, %v1570_v5 }
 0x1d7   :  { %v555_v21 = vsel %vm540_vm5, %v551_v20, 0.0  ;;  %v1519_v25 = vadd.f32 %v1518_v41, %v1517_v49  ;;  %v1506_v31 = vadd.f32 %v1505_v27, %v1504_v45  ;;  %v1043_v26 = vsel %vm540_vm5, %v5552_v8, 0.0 }
 0x1d8   :  { %v1025_v57 = vadd.f32 %v1021_v23, %v974_v38  ;;  %v1026_v58 = vadd.f32 %v1022_v34, %v975_v63  ;;  %v1051_v16 = vmul.f32 %v5566_v47, %v5566_v47  ;;  %v1042_v11 = vsel %vm540_vm5, %v5566_v47, 0.0 }
 0x1d9   :  { %v1056_v13 = vsel %vm540_vm5, %v1052_v10, 0.0  ;;  %v552_v1 = vmul.f32 %v5487_v2, %v5487_v2  ;;  %v554_v28 = vsel %vm540_vm5, %v550_v22, 0.0  ;;  %v1606_v40 = vmul.f32 %v5580_v37, %v5580_v37 }
 0x1da   :  { %v5599_v56 = vadd.f32 %v6989_v59, %v1025_v57  ;;  %v5602_v62 = vadd.f32 %v6989_v59, %v1026_v58  ;;  %v1607_v17 = vmul.f32 %v5582_v46, %v5582_v46  ;;  %v1581_v15 = vmul.f32 %v1575_v9, %v1570_v5 }
 0x1db   :  { %v5611_v50 = vadd.f32 %v1587_v52, %v1580_v33  ;;  %v1044_v44 = vadd.f32 %v1043_v26, %v1042_v11  ;;  %v556_v54 = vadd.f32 %v555_v21, %v554_v28  ;;  %v1055_v35 = vsel %vm540_vm5, %v1051_v16, 0.0  ;;  %v538_v28 = vld [vmem:[%s6293_s5] sm:$0xf] }
 0x1dc   :  { %v1045_v30 = vsel %vm540_vm5, %v5599_v56, 0.0  ;;  %v1053_v32 = vmul.f32 %v5599_v56, %v5599_v56  ;;  %v1054_v14 = vmul.f32 %v5602_v62, %v5602_v62  ;;  %v1057_v39 = vadd.f32 %v1056_v13, %v1055_v35  ;;  %v2890_v13 = vld [vmem:[%s6293_s5 + $0x4] sm:$0xf] }
 0x1dd   :  { %v1046_v60 = vadd.f32 %v1045_v30, %v1044_v44  ;;  %v553_v12 = vmul.f32 %v5514_v43, %v5514_v43  ;;  %v557_v9 = vsel %vm540_vm5, %v552_v1, 0.0  ;;  %v1047_v5 = vsel %vm540_vm5, %v5602_v62, 0.0  ;;  %v539_v1 = vld [vmem:[%s6294_s6] sm:$0xf]  ;;  %v2897_v44 = vld [vmem:[%s6294_s6 + $0x8] sm:$0xf] }
 0x1de   :  { %v1058_v45 = vsel %vm540_vm5, %v1053_v32, 0.0  ;;  %v1610_v59 = vsel %vm540_vm5, %v1606_v40, 0.0  ;;  %v1611_v7 = vsel %vm540_vm5, %v1607_v17, 0.0  ;;  %v5628_v6 = vadd.f32 %v1587_v52, %v1581_v15  ;;  %v2896_v40 = vld [vmem:[%s6293_s5 + $0x8] sm:$0xf] }
 0x1df   :  { %v1048_v27 = vadd.f32 %v1047_v5, %v1046_v60  ;;  %v1059_v3 = vadd.f32 %v1058_v45, %v1057_v39  ;;  %v558_v63 = vadd.f32 %v557_v9, %v556_v54  ;;  %v1060_v19 = vsel %vm540_vm5, %v1054_v14, 0.0  ;;  %v2891_v17 = vld [vmem:[%s6294_s6 + $0x4] sm:$0xf]  ;;  %v2902_v15 = vld [vmem:[%s6293_s5 + $0xc] sm:$0xf]  ;;  %s5687_s5 = sld [smem:[#allocation2 + $0x180]] }
 0x1e0   :  { %v1608_v20 = vmul.f32 %v5611_v50, %v5611_v50  ;;  %v1597_v49 = vsel %vm540_vm5, %v5580_v37, 0.0  ;;  %v1598_v41 = vsel %vm540_vm5, %v5582_v46, 0.0  ;;  %v1521_v51 = vadd.f32 %v5547_v61, %v1519_v25  ;;  %v2903_v54 = vld [vmem:[%s6294_s6 + $0xc] sm:$0xf]  ;;  %s5693_s6 = sld [smem:[#allocation2 + $0x101]] }
 0x1e1   :  { %1049 = vadd.xlane.f32.xlu0 %v1048_v27  ;;  %v1061_v38 = vadd.f32 %v1060_v19, %v1059_v3  ;;  %v1612_v29 = vadd.f32 %v1611_v7, %v1610_v59  ;;  %v559_v52 = vsel %vm540_vm5, %v553_v12, 0.0  ;;  %v1507_v0 = vsel %vm540_vm5, %v5469_v55, 0.0 }
 0x1e2   :  { %v560_v18 = vadd.f32 %v559_v52, %v558_v63  ;;  %v1508_v10 = vadd.f32 %v1507_v0, %v1506_v31  ;;  %v1599_v22 = vadd.f32 %v1598_v41, %v1597_v49  ;;  %v1522_v23 = vsel %vm540_vm5, %v5544_v53, 0.0 }
 0x1e3   :  { %1062 = vadd.xlane.f32.xlu1 %v1061_v38  ;;  %v1609_v34 = vmul.f32 %v5628_v6, %v5628_v6  ;;  %v1613_v33 = vsel %vm540_vm5, %v1608_v20, 0.0  ;;  %v1523_v61 = vadd.f32 %v1522_v23, %v1521_v51  ;;  %v1509_v25 = vsel %vm540_vm5, %v5473_v48, 0.0 }
 0x1e4   :  { %v1614_v21 = vadd.f32 %v1613_v33, %v1612_v29  ;;  %v1600_v57 = vsel %vm540_vm5, %v5611_v50, 0.0  ;;  %v1510_v31 = vadd.f32 %v1509_v25, %v1508_v10  ;;  %v1602_v16 = vsel %vm540_vm5, %v5628_v6, 0.0 }
 0x1e5   :  { %561 = vadd.xlane.f32.xlu0 %v560_v18  ;;  %v1601_v58 = vadd.f32 %v1600_v57, %v1599_v22  ;;  %v1615_v26 = vsel %vm540_vm5, %v1609_v34, 0.0  ;;  %v5728_v49 = vstv %s5677_s27  ;;  %v5731_v41 = vstv %s5679_s28 }
 0x1e6   :  { %v1616_v53 = vadd.f32 %v1615_v26, %v1614_v21  ;;  %v5734_v38 = vstv %s5681_s1  ;;  %v5739_v0 = vstv %s5687_s5  ;;  %v5742_v10 = vstv %s5689_s2  ;;  %s1697_s1 = sld [smem:[#allocation6]]  ;;  %s6106_s2 = sld [smem:[#allocation6 + $0x2]] }
 0x1e7   :  { %1524 = vadd.xlane.f32.xlu1 %v1523_v61  ;;  %v1603_v11 = vadd.f32 %v1602_v16, %v1601_v58  ;;  %v5745_v22 = vstv %s5691_s3  ;;  %v5748_v23 = vstv %s5693_s6  ;;  %v5751_v34 = vstv %s5697_s29  ;;  %s6099_s5 = sld [smem:[#allocation7]]  ;;  %s6111_s3 = sld [smem:[#allocation7 + $0x2]] }
 0x1e8   :  { %v5756_v21 = vstv %s5699_s30  ;;  %v5759_v25 = vstv %s5701_s16  ;;  %v5762_v57 = vstv %s5703_s0  ;;  %v5768_v58 = vstv %s5709_s18  ;;  %s6132_s30 = sld [smem:[#allocation6 + $0x3]] }
 0x1e9   :  { %1511 = vadd.xlane.f32.xlu0 %v1510_v31  ;;  %v5765_v31 = vstv %s5707_s17  ;;  %v5771_v26 = vstv %s5711_s19  ;;  %vm2036_vm4 = vcmask 31744   ;;  %s6146_s17 = sld [smem:[#allocation7 + $0x3]] }
 0x1eb   :  { %1617 = vadd.xlane.f32.xlu1 %v1616_v53 }
 0x1ed   :  { %1604 = vadd.xlane.f32.xlu0 %v1603_v11 }
 0x1fc   :  { %1080 = vperm.xlu1 %3054, %v2890_v13   ;;  %v5776_v13 = vstv %s5713_s9 }
 0x200   :  { %588 = vperm.xlu1 %3054, %v539_v1   ;;  %v5779_v1 = vstv %s5715_s10 }
 0x203   :  { %579 = vperm.xlu0 %3049, %v538_v28   ;;  %v5782_v28 = vstv %s5717_s20 }
 0x204   :  { %1542 = vperm.xlu1 %3054, %v2896_v40   ;;  %v5785_v40 = vstv %s5719_s21 }
 0x207   :  { %1089 = vperm.xlu0 %3049, %v2891_v17   ;;  %v5788_v17 = vstv %s5721_s22 }
 0x208   :  { %1635 = vperm.xlu1 %3054, %v2902_v15  }
 0x20b   :  { %1551 = vperm.xlu0 %3049, %v2897_v44  }
 0x20f   :  { %1644 = vperm.xlu0 %3049, %v2903_v54  }
 0x260   :  { %v549_v30 = vpop.xlane.xlu1 %548 }
 0x261   :  { %v5683_v14 = vmul.f32 0.001953125, %v549_v30  ;;  %v5793_v30 = vstv %s5725_s23 }
 0x263   :  { %v565_v59 = vmul.f32 %v5683_v14, %v5683_v14  ;;  %v567_v54 = vsub.f32 %v5462_v24, %v5683_v14  ;;  %v569_v24 = vsub.f32 %v5487_v2, %v5683_v14 }
 0x26e   :  { %v1050_v32 = vpop.xlane.xlu0 %1049 }
 0x26f   :  { %v5685_v35 = vmul.f32 0.001953125, %v1050_v32 }
 0x270   :  { %v1063_v60 = vpop.xlane.xlu1 %1062 }
 0x271   :  { %v1066_v39 = vmul.f32 %v5685_v35, %v5685_v35  ;;  %v1065_v12 = vmul.f32 0.001953125, %v1063_v60  ;;  %v1068_v32 = vsub.f32 %v5566_v47, %v5685_v35  ;;  %v1069_v60 = vsub.f32 %v5552_v8, %v5685_v35 }
 0x272   :  { %v562_v9 = vpop.xlane.xlu0 %561  ;;  %v570_v47 = vsub.f32 %v5514_v43, %v5683_v14 }
 0x273   :  { %v1067_v5 = vsub.f32 %v1065_v12, %v1066_v39  ;;  %v564_v45 = vmul.f32 0.001953125, %v562_v9  ;;  %v1070_v39 = vsub.f32 %v5599_v56, %v5685_v35  ;;  %v568_v12 = vsub.f32 %v5484_v36, %v5683_v14 }
 0x274   :  { %v1525_v7 = vpop.xlane.xlu1 %1524 }
 0x275   :  { %v1072_v27 = vadd.f32 1e-05, %v1067_v5  ;;  %v566_v3 = vsub.f32 %v564_v45, %v565_v59  ;;  %v1527_v51 = vmul.f32 0.001953125, %v1525_v7  ;;  %v1071_v45 = vsub.f32 %v5602_v62, %v5685_v35 }
 0x276   :  { %v1512_v63 = vpop.xlane.xlu0 %1511 }
 0x277   :  { %3063 = vrsqrt.f32 %v1072_v27  ;;  %v571_v19 = vadd.f32 1e-05, %v566_v3  ;;  %v5723_v20 = vmul.f32 0.001953125, %v1512_v63 }
 0x278   :  { %v1618_v52 = vpop.xlane.xlu1 %1617 }
 0x279   :  { %3065 = vrsqrt.f32 %v571_v19  ;;  %v1528_v29 = vmul.f32 %v5723_v20, %v5723_v20  ;;  %v1620_v16 = vmul.f32 0.001953125, %v1618_v52  ;;  %v1530_v56 = vsub.f32 %v5505_v4, %v5723_v20 }
 0x27a   :  { %v1605_v18 = vpop.xlane.xlu0 %1604  ;;  %v1531_v63 = vsub.f32 %v5509_v42, %v5723_v20  ;;  %v1532_v62 = vsub.f32 %v5469_v55, %v5723_v20  ;;  %v1533_v2 = vsub.f32 %v5473_v48, %v5723_v20 }
 0x27b   :  { %v1529_v33 = vsub.f32 %v1527_v51, %v1528_v29  ;;  %v5753_v61 = vmul.f32 0.001953125, %v1605_v18 }
 0x27c   :  { %v1081_v44 = vpop.permute.xlu1 %1080 }
 0x27d   :  { %v1534_v53 = vadd.f32 1e-05, %v1529_v33  ;;  %v1621_v11 = vmul.f32 %v5753_v61, %v5753_v61  ;;  %v1623_v33 = vsub.f32 %v5580_v37, %v5753_v61  ;;  %v1624_v42 = vsub.f32 %v5582_v46, %v5753_v61 }
 0x27e   :  { %v1625_v55 = vsub.f32 %v5611_v50, %v5753_v61  ;;  %v1626_v48 = vsub.f32 %v5628_v6, %v5753_v61 }
 0x27f   :  { %3067 = vrsqrt.f32 %v1534_v53  ;;  %v1622_v15 = vsub.f32 %v1620_v16, %v1621_v11 }
 0x280   :  { %v589_v19 = vpop.permute.xlu1 %588 }
 0x281   :  { %v3064_v9 = vpop.eup %3063  ;;  %v1627_v5 = vadd.f32 1e-05, %v1622_v15 }
 0x282   :  { %v1074_v59 = vmul.f32 %v3064_v9, %v1068_v32  ;;  %v1075_v7 = vmul.f32 %v3064_v9, %v1069_v60  ;;  %v1076_v8 = vmul.f32 %v3064_v9, %v1070_v39  ;;  %v580_v27 = vpop.permute.xlu0 %579  ;;  %v1077_v36 = vmul.f32 %v3064_v9, %v1071_v45 }
 0x283   :  { %v3066_v3 = vpop.eup %3065  ;;  %3069 = vrsqrt.f32 %v1627_v5 }
 0x284   :  { %v1083_v43 = vmul.f32 %v1081_v44, %v1074_v59  ;;  %v1084_v14 = vmul.f32 %v1081_v44, %v1075_v7  ;;  %v1085_v35 = vmul.f32 %v1081_v44, %v1076_v8  ;;  %v573_v51 = vmul.f32 %v3066_v3, %v567_v54  ;;  %v1543_v7 = vpop.permute.xlu1 %1542 }
 0x285   :  { %v574_v29 = vmul.f32 %v3066_v3, %v568_v12  ;;  %v575_v52 = vmul.f32 %v3066_v3, %v569_v24  ;;  %v576_v4 = vmul.f32 %v3066_v3, %v570_v47  ;;  %v1086_v15 = vmul.f32 %v1081_v44, %v1077_v36 }
 0x286   :  { %v1090_v18 = vpop.permute.xlu0 %1089  ;;  %v582_v20 = vmul.f32 %v580_v27, %v573_v51 }
 0x287   :  { %v583_v53 = vmul.f32 %v580_v27, %v574_v29  ;;  %v584_v16 = vmul.f32 %v580_v27, %v575_v52  ;;  %v585_v11 = vmul.f32 %v580_v27, %v576_v4  ;;  %v1092_v54 = vadd.f32 %v1090_v18, %v1083_v43 }
 0x288   :  { %v1093_v32 = vadd.f32 %v1090_v18, %v1084_v14  ;;  %v1094_v60 = vadd.f32 %v1090_v18, %v1085_v35  ;;  %v591_v12 = vadd.f32 %v589_v19, %v582_v20  ;;  %v1095_v3 = vadd.f32 %v1090_v18, %v1086_v15 }
 0x289   :  { %v3068_v39 = vpop.eup %3067  ;;  %v592_v37 = vadd.f32 %v589_v19, %v583_v53  ;;  %v593_v9 = vadd.f32 %v589_v19, %v584_v16  ;;  %v594_v5 = vadd.f32 %v589_v19, %v585_v11  ;;  %v1096_v16 = vmax.f32 %v1092_v54, 0.0 }
 0x28a   :  { %v1536_v46 = vmul.f32 %v3068_v39, %v1530_v56  ;;  %v1537_v45 = vmul.f32 %v3068_v39, %v1531_v63  ;;  %v1538_v24 = vmul.f32 %v3068_v39, %v1532_v62  ;;  %v1539_v50 = vmul.f32 %v3068_v39, %v1533_v2 }
 0x28b   :  { %v595_v47 = vmax.f32 %v591_v12, 0.0  ;;  %v596_v59 = vmax.f32 %v592_v37, 0.0  ;;  %v597_v6 = vmax.f32 %v593_v9, 0.0  ;;  %v598_v61 = vmax.f32 %v594_v5, 0.0 }
 0x28c   :  { %v5825_v8 = vmul.f32 %v1543_v7, %v1536_v46  ;;  %v5827_v44 = vmul.f32 %v1543_v7, %v1537_v45  ;;  %v5829_v27 = vmul.f32 %v1543_v7, %v1538_v24  ;;  %v5834_v63 = vmul.f32 %v1543_v7, %v1539_v50 }
 0x28d   :  { %v1657_v36 = vmul.f32 %v5728_v49, %v595_v47  ;;  %v1658_v43 = vmul.f32 %v5728_v49, %v596_v59  ;;  %v1659_v56 = vmul.f32 %v5728_v49, %v597_v6  ;;  %v3070_v62 = vpop.eup %3069  ;;  %v1660_v2 = vmul.f32 %v5728_v49, %v598_v61 }
 0x28e   :  { %v1751_v14 = vmul.f32 %v5731_v41, %v595_v47  ;;  %v1752_v35 = vmul.f32 %v5731_v41, %v596_v59  ;;  %v1753_v19 = vmul.f32 %v5731_v41, %v597_v6  ;;  %v5841_v51 = vmul.f32 %v5731_v41, %v598_v61 }
 0x28f   :  { %v1845_v29 = vmul.f32 %v5734_v38, %v595_v47  ;;  %v1846_v52 = vmul.f32 %v5734_v38, %v596_v59  ;;  %v1847_v4 = vmul.f32 %v5734_v38, %v597_v6  ;;  %v1848_v18 = vmul.f32 %v5734_v38, %v598_v61 }
 0x290   :  { %v1939_v20 = vmul.f32 %v5739_v0, %v595_v47  ;;  %v1940_v49 = vmul.f32 %v5739_v0, %v596_v59  ;;  %v1941_v53 = vmul.f32 %v5739_v0, %v597_v6  ;;  %v1097_v11 = vmax.f32 %v1093_v32, 0.0 }
 0x291   :  { %v1098_v15 = vmax.f32 %v1094_v60, 0.0  ;;  %v1099_v39 = vmax.f32 %v1095_v3, 0.0  ;;  %v1942_v41 = vmul.f32 %v5739_v0, %v598_v61  ;;  %v1629_v12 = vmul.f32 %v3070_v62, %v1623_v33 }
 0x292   :  { %v1630_v37 = vmul.f32 %v3070_v62, %v1624_v42  ;;  %v1631_v9 = vmul.f32 %v3070_v62, %v1625_v55  ;;  %v1663_v5 = vmul.f32 %v5742_v10, %v1096_v16  ;;  %v1664_v46 = vmul.f32 %v5742_v10, %v1097_v11  ;;  %v1552_v55 = vpop.permute.xlu0 %1551 }
 0x293   :  { %v1665_v38 = vmul.f32 %v5742_v10, %v1098_v15  ;;  %v1666_v45 = vmul.f32 %v5742_v10, %v1099_v39  ;;  %v1757_v24 = vmul.f32 %v5745_v22, %v1096_v16  ;;  %v1758_v54 = vmul.f32 %v5745_v22, %v1097_v11 }
 0x294   :  { %v1759_v32 = vmul.f32 %v5745_v22, %v1098_v15  ;;  %v1632_v60 = vmul.f32 %v3070_v62, %v1626_v48  ;;  %v1667_v50 = vadd.f32 %v1663_v5, %v1657_v36  ;;  %v1668_v0 = vadd.f32 %v1664_v46, %v1658_v43  ;;  %v1636_v5 = vpop.permute.xlu1 %1635 }
 0x295   :  { %v1669_v33 = vadd.f32 %v1665_v38, %v1659_v56  ;;  %v5859_v42 = vmul.f32 %v5745_v22, %v1099_v39  ;;  %v5861_v47 = vadd.f32 %v1666_v45, %v1660_v2  ;;  %v1761_v59 = vadd.f32 %v1757_v24, %v1751_v14 }
 0x296   :  { %v1762_v6 = vadd.f32 %v1758_v54, %v1752_v35  ;;  %v1851_v10 = vmul.f32 %v5748_v23, %v1096_v16  ;;  %v1852_v61 = vmul.f32 %v5748_v23, %v1097_v11  ;;  %v1853_v7 = vmul.f32 %v5748_v23, %v1098_v15  ;;  %v1645_v54 = vpop.permute.xlu0 %1644 }
 0x297   :  { %v1854_v3 = vmul.f32 %v5748_v23, %v1099_v39  ;;  %v1945_v48 = vmul.f32 %v5751_v34, %v1096_v16  ;;  %v5868_v36 = vadd.f32 %v1759_v32, %v1753_v19  ;;  %v1946_v22 = vmul.f32 %v5751_v34, %v1097_v11 }
 0x298   :  { %v1855_v43 = vadd.f32 %v1851_v10, %v1845_v29  ;;  %v1947_v56 = vmul.f32 %v5751_v34, %v1098_v15  ;;  %v1856_v62 = vadd.f32 %v1852_v61, %v1846_v52  ;;  %v1857_v2 = vadd.f32 %v1853_v7, %v1847_v4 }
 0x299   :  { %v5872_v14 = vadd.f32 %v1854_v3, %v1848_v18  ;;  %v1948_v35 = vmul.f32 %v5751_v34, %v1099_v39  ;;  %v1949_v46 = vadd.f32 %v1945_v48, %v1939_v20  ;;  %v1950_v38 = vadd.f32 %v1946_v22, %v1940_v49 }
 0x29a   :  { %v1951_v45 = vadd.f32 %v1947_v56, %v1941_v53  ;;  %v1638_v23 = vmul.f32 %v1636_v5, %v1629_v12  ;;  %v1639_v24 = vmul.f32 %v1636_v5, %v1630_v37  ;;  %v1640_v16 = vmul.f32 %v1636_v5, %v1631_v9 }
 0x29b   :  { %v1641_v19 = vmul.f32 %v1636_v5, %v1632_v60  ;;  %v1554_v29 = vadd.f32 %v1552_v55, %v5825_v8  ;;  %v1555_v11 = vadd.f32 %v1552_v55, %v5827_v44  ;;  %v1556_v52 = vadd.f32 %v1552_v55, %v5829_v27 }
 0x29c   :  { %v1557_v4 = vadd.f32 %v1552_v55, %v5834_v63  ;;  %v1647_v18 = vadd.f32 %v1645_v54, %v1638_v23  ;;  %v5879_v15 = vadd.f32 %v1948_v35, %v1942_v41  ;;  %v1648_v20 = vadd.f32 %v1645_v54, %v1639_v24 }
 0x29d   :  { %v1558_v34 = vmax.f32 %v1554_v29, 0.0  ;;  %v1649_v49 = vadd.f32 %v1645_v54, %v1640_v16  ;;  %v1559_v53 = vmax.f32 %v1555_v11, 0.0  ;;  %v1560_v39 = vmax.f32 %v1556_v52, 0.0 }
 0x29e   :  { %v1561_v12 = vmax.f32 %v1557_v4, 0.0  ;;  %v1650_v37 = vadd.f32 %v1645_v54, %v1641_v19  ;;  %v1651_v32 = vmax.f32 %v1647_v18, 0.0 }
 0x29f   :  { %v1673_v9 = vmul.f32 %v5756_v21, %v1558_v34  ;;  %v1767_v8 = vmul.f32 %v5759_v25, %v1558_v34  ;;  %v1861_v44 = vmul.f32 %v5762_v57, %v1558_v34  ;;  %v1674_v27 = vmul.f32 %v5756_v21, %v1559_v53 }
 0x2a0   :  { %v1675_v63 = vmul.f32 %v5756_v21, %v1560_v39  ;;  %v1768_v41 = vmul.f32 %v5759_v25, %v1559_v53  ;;  %v1955_v60 = vmul.f32 %v5765_v31, %v1558_v34  ;;  %v1676_v55 = vmul.f32 %v5756_v21, %v1561_v12 }
 0x2a1   :  { %v1677_v10 = vadd.f32 %v1673_v9, %v1667_v50  ;;  %v1769_v61 = vmul.f32 %v5759_v25, %v1560_v39  ;;  %v1770_v7 = vmul.f32 %v5759_v25, %v1561_v12  ;;  %v1678_v3 = vadd.f32 %v1674_v27, %v1668_v0 }
 0x2a2   :  { %v1679_v48 = vadd.f32 %v1675_v63, %v1669_v33  ;;  %v1771_v22 = vadd.f32 %v1767_v8, %v1761_v59  ;;  %v1862_v56 = vmul.f32 %v5762_v57, %v1559_v53  ;;  %v1772_v35 = vadd.f32 %v1768_v41, %v1762_v6 }
 0x2a3   :  { %v1863_v5 = vmul.f32 %v5762_v57, %v1560_v39  ;;  %v5894_v23 = vmul.f32 %v5762_v57, %v1561_v12  ;;  %v1956_v24 = vmul.f32 %v5765_v31, %v1559_v53  ;;  %v1865_v16 = vadd.f32 %v1861_v44, %v1855_v43 }
 0x2a4   :  { %v1866_v21 = vadd.f32 %v1862_v56, %v1856_v62  ;;  %v1957_v50 = vmul.f32 %v5765_v31, %v1560_v39  ;;  %v5899_v19 = vmul.f32 %v5765_v31, %v1561_v12  ;;  %v1959_v0 = vadd.f32 %v1955_v60, %v1949_v46 }
 0x2a5   :  { %v5901_v25 = vadd.f32 %v1863_v5, %v1857_v2  ;;  %v1652_v33 = vmax.f32 %v1648_v20, 0.0  ;;  %v1653_v59 = vmax.f32 %v1649_v49, 0.0  ;;  %v1960_v6 = vadd.f32 %v1956_v24, %v1950_v38 }
 0x2a6   :  { %v5903_v29 = vadd.f32 %v1957_v50, %v1951_v45  ;;  %v1654_v54 = vmax.f32 %v1650_v37, 0.0  ;;  %v1683_v57 = vmul.f32 %v5768_v58, %v1651_v32  ;;  %v1777_v62 = vmul.f32 %v5771_v26, %v1651_v32 }
 0x2a7   :  { %v1684_v11 = vmul.f32 %v5768_v58, %v1652_v33  ;;  %v1685_v43 = vmul.f32 %v5768_v58, %v1653_v59  ;;  %v1778_v31 = vmul.f32 %v5771_v26, %v1652_v33  ;;  %v1779_v46 = vmul.f32 %v5771_v26, %v1653_v59 }
 0x2a8   :  { %v1686_v2 = vmul.f32 %v5768_v58, %v1654_v54  ;;  %v1871_v52 = vmul.f32 %v5776_v13, %v1651_v32  ;;  %v1872_v38 = vmul.f32 %v5776_v13, %v1652_v33  ;;  %v1687_v45 = vadd.f32 %v1683_v57, %v1677_v10 }
 0x2a9   :  { %v1688_v4 = vadd.f32 %v1684_v11, %v1678_v3  ;;  %v1873_v18 = vmul.f32 %v5776_v13, %v1653_v59  ;;  %v1965_v34 = vmul.f32 %v5779_v1, %v1651_v32  ;;  %v5917_v20 = vmul.f32 %v5776_v13, %v1654_v54 }
 0x2aa   :  { %v5919_v49 = vadd.f32 %v1871_v52, %v1865_v16  ;;  %v5921_v53 = vadd.f32 %v1872_v38, %v1866_v21  ;;  %v1966_v58 = vmul.f32 %v5779_v1, %v1652_v33  ;;  %v5925_v39 = vmul.f32 %v5779_v1, %v1653_v59 }
 0x2ab   :  { %v5928_v12 = vmul.f32 %v5779_v1, %v1654_v54  ;;  %v1764_v37 = vadd.f32 %v5859_v42, %v5841_v51  ;;  %v1773_v9 = vadd.f32 %v1769_v61, %v5868_v36  ;;  %v5933_v8 = vadd.f32 %v1965_v34, %v1959_v0 }
 0x2ac   :  { %v1780_v13 = vmul.f32 %v5771_v26, %v1654_v54  ;;  %v1781_v44 = vadd.f32 %v1777_v62, %v1771_v22  ;;  %v1782_v32 = vadd.f32 %v1778_v31, %v1772_v35  ;;  %v1680_v41 = vadd.f32 %v1676_v55, %v5861_v47 }
 0x2ad   :  { %v1774_v27 = vadd.f32 %v1770_v7, %v1764_v37  ;;  %v1783_v63 = vadd.f32 %v1779_v46, %v1773_v9  ;;  %v1689_v60 = vadd.f32 %v1685_v43, %v1679_v48  ;;  %v5944_v51 = vadd.f32 %v5785_v40, %v1687_v45 }
 0x2ae   :  { %v5938_v10 = vadd.f32 %v5782_v28, %v1781_v44  ;;  %v5941_v1 = vadd.f32 %v5782_v28, %v1782_v32  ;;  %v5947_v42 = vadd.f32 %v5785_v40, %v1688_v4  ;;  %v1690_v61 = vadd.f32 %v1686_v2, %v1680_v41 }
 0x2af   :  { %v1784_v26 = vadd.f32 %v1780_v13, %v1774_v27  ;;  %v5950_v36 = vadd.f32 %v5782_v28, %v1783_v63  ;;  %v5953_v47 = vadd.f32 %v5785_v40, %v1689_v60  ;;  %v1708_v50 = vmul.f32 %v5944_v51, %v5944_v51 }
 0x2b0   :  { %v1793_v55 = vsel %vm540_vm5, %v5938_v10, 0.0  ;;  %v1794_v7 = vsel %vm540_vm5, %v5941_v1, 0.0  ;;  %v1802_v3 = vmul.f32 %v5938_v10, %v5938_v10  ;;  %v1803_v48 = vmul.f32 %v5941_v1, %v5941_v1 }
 0x2b1   :  { %v5964_v22 = vadd.f32 %v5782_v28, %v1784_v26  ;;  %v1795_v56 = vadd.f32 %v1794_v7, %v1793_v55  ;;  %v1796_v35 = vsel %vm540_vm5, %v5950_v36, 0.0  ;;  %v1804_v5 = vmul.f32 %v5950_v36, %v5950_v36 }
 0x2b2   :  { %v1806_v24 = vsel %vm540_vm5, %v1802_v3, 0.0  ;;  %v1807_v16 = vsel %vm540_vm5, %v1803_v48, 0.0  ;;  %v5973_v21 = vadd.f32 %v5785_v40, %v1690_v61  ;;  %v1709_v57 = vmul.f32 %v5947_v42, %v5947_v42 }
 0x2b3   :  { %v1797_v0 = vadd.f32 %v1796_v35, %v1795_v56  ;;  %v1798_v28 = vsel %vm540_vm5, %v5964_v22, 0.0  ;;  %v1805_v33 = vmul.f32 %v5964_v22, %v5964_v22  ;;  %v1808_v59 = vadd.f32 %v1807_v16, %v1806_v24 }
 0x2b4   :  { %v1809_v54 = vsel %vm540_vm5, %v1804_v5, 0.0  ;;  %v1710_v40 = vmul.f32 %v5953_v47, %v5953_v47  ;;  %v1711_v11 = vmul.f32 %v5973_v21, %v5973_v21  ;;  %v1970_v43 = vadd.f32 %v1966_v58, %v1960_v6 }
 0x2b5   :  { %v1799_v62 = vadd.f32 %v1798_v28, %v1797_v0  ;;  %v1810_v31 = vadd.f32 %v1809_v54, %v1808_v59  ;;  %v1712_v2 = vsel %vm540_vm5, %v1708_v50, 0.0  ;;  %v1811_v46 = vsel %vm540_vm5, %v1805_v33, 0.0 }
 0x2b6   :  { %v1713_v52 = vsel %vm540_vm5, %v1709_v57, 0.0  ;;  %v1715_v38 = vsel %vm540_vm5, %v1710_v40, 0.0  ;;  %v1699_v45 = vsel %vm540_vm5, %v5944_v51, 0.0  ;;  %v1717_v37 = vsel %vm540_vm5, %v1711_v11, 0.0 }
 0x2b7   :  { %1800 = vadd.xlane.f32.xlu1 %v1799_v62  ;;  %v1812_v4 = vadd.f32 %v1811_v46, %v1810_v31  ;;  %v1714_v34 = vadd.f32 %v1713_v52, %v1712_v2  ;;  %v1700_v6 = vsel %vm540_vm5, %v5947_v42, 0.0  ;;  %v1702_v9 = vsel %vm540_vm5, %v5953_v47, 0.0 }
 0x2b8   :  { %v1701_v58 = vadd.f32 %v1700_v6, %v1699_v45  ;;  %v1868_v13 = vadd.f32 %v5894_v23, %v5872_v14  ;;  %v1877_v44 = vadd.f32 %v1873_v18, %v5901_v25  ;;  %v1704_v27 = vsel %vm540_vm5, %v5973_v21, 0.0 }
 0x2b9   :  { %1813 = vadd.xlane.f32.xlu0 %v1812_v4  ;;  %v1716_v32 = vadd.f32 %v1715_v38, %v1714_v34  ;;  %v6006_v63 = vadd.f32 %v5788_v17, %v5919_v49  ;;  %v6010_v41 = vadd.f32 %v5788_v17, %v5921_v53  ;;  %v1971_v23 = vadd.f32 %v5925_v39, %v5903_v29 }
 0x2ba   :  { %v1703_v60 = vadd.f32 %v1702_v9, %v1701_v58  ;;  %v1878_v26 = vadd.f32 %v5917_v20, %v1868_v13  ;;  %v6014_v14 = vadd.f32 %v5788_v17, %v1877_v44  ;;  %v1962_v48 = vadd.f32 %v5899_v19, %v5879_v15  ;;  %v2748_v9 = vld [vmem:[%s6300_s12 + $0x8] sm:$0xff]  ;;  %v2747_v44 = vld [vmem:[%s6300_s12] sm:$0xff]  ;;  %s2912_s12 = sld [smem:[#allocation6 + $0x1]] }
 0x2bb   :  { %v1718_v25 = vadd.f32 %v1717_v37, %v1716_v32  ;;  %v1896_v18 = vmul.f32 %v6006_v63, %v6006_v63  ;;  %v1897_v49 = vmul.f32 %v6010_v41, %v6010_v41  ;;  %v1887_v53 = vsel %vm540_vm5, %v6006_v63, 0.0  ;;  %v2768_v13 = vld [vmem:[%s6301_s13 + $0x8] sm:$0xff]  ;;  %v2767_v32 = vld [vmem:[%s6301_s13] sm:$0xff]  ;;  %s2913_s13 = sld [smem:[#allocation7 + $0x1]] }
 0x2bc   :  { %v1705_v61 = vadd.f32 %v1704_v27, %v1703_v60  ;;  %v6025_v55 = vadd.f32 %v5788_v17, %v1878_v26  ;;  %v1898_v20 = vmul.f32 %v6014_v14, %v6014_v14  ;;  %v1888_v29 = vsel %vm540_vm5, %v6010_v41, 0.0 }
 0x2bd   :  { %1719 = vadd.xlane.f32.xlu1 %v1718_v25  ;;  %v1900_v39 = vsel %vm540_vm5, %v1896_v18, 0.0  ;;  %v1901_v7 = vsel %vm540_vm5, %v1897_v49, 0.0  ;;  %v1889_v3 = vadd.f32 %v1888_v29, %v1887_v53  ;;  %v1890_v5 = vsel %vm540_vm5, %v6014_v14, 0.0 }
 0x2be   :  { %1706 = vadd.xlane.f32.xlu0 %v1705_v61  ;;  %v1899_v17 = vmul.f32 %v6025_v55, %v6025_v55  ;;  %v1902_v56 = vadd.f32 %v1901_v7, %v1900_v39  ;;  %v1903_v35 = vsel %vm540_vm5, %v1898_v20, 0.0  ;;  %v1972_v16 = vadd.f32 %v5928_v12, %v1962_v48 }
 0x2bf   :  { %v1891_v24 = vadd.f32 %v1890_v5, %v1889_v3  ;;  %v6043_v50 = vadd.f32 %v5793_v30, %v5933_v8  ;;  %v6046_v0 = vadd.f32 %v5793_v30, %v1970_v43  ;;  %v1892_v28 = vsel %vm540_vm5, %v6025_v55, 0.0 }
 0x2c0   :  { %v1904_v15 = vadd.f32 %v1903_v35, %v1902_v56  ;;  %v1905_v19 = vsel %vm540_vm5, %v1899_v17, 0.0  ;;  %v6052_v33 = vadd.f32 %v5793_v30, %v1971_v23  ;;  %v6055_v54 = vadd.f32 %v5793_v30, %v1972_v16 }
 0x2c1   :  { %v1893_v59 = vadd.f32 %v1892_v28, %v1891_v24  ;;  %v1990_v12 = vmul.f32 %v6043_v50, %v6043_v50  ;;  %v1991_v8 = vmul.f32 %v6046_v0, %v6046_v0  ;;  %v1981_v11 = vsel %vm540_vm5, %v6043_v50, 0.0 }
 0x2c2   :  { %v1906_v57 = vadd.f32 %v1905_v19, %v1904_v15  ;;  %v1992_v40 = vmul.f32 %v6052_v33, %v6052_v33  ;;  %v1982_v43 = vsel %vm540_vm5, %v6046_v0, 0.0  ;;  %v1993_v30 = vmul.f32 %v6055_v54, %v6055_v54 }
 0x2c3   :  { %1894 = vadd.xlane.f32.xlu0 %v1893_v59  ;;  %v1994_v62 = vsel %vm540_vm5, %v1990_v12, 0.0  ;;  %v1995_v31 = vsel %vm540_vm5, %v1991_v8, 0.0  ;;  %v1983_v2 = vadd.f32 %v1982_v43, %v1981_v11  ;;  %v1984_v52 = vsel %vm540_vm5, %v6052_v33, 0.0 }
 0x2c4   :  { %1907 = vadd.xlane.f32.xlu1 %v1906_v57  ;;  %v1996_v46 = vadd.f32 %v1995_v31, %v1994_v62  ;;  %v1997_v38 = vsel %vm540_vm5, %v1992_v40, 0.0  ;;  %v1986_v34 = vsel %vm540_vm5, %v6055_v54, 0.0  ;;  %v1999_v37 = vsel %vm540_vm5, %v1993_v30, 0.0 }
 0x2c5   :  { %v1985_v45 = vadd.f32 %v1984_v52, %v1983_v2  ;;  %v3171_v27 = vmov 0.0   ;;  %v1829_v11 = vstv %s2912_s12  ;;  %v1834_v30 = vstv %s2913_s13 }
 0x2c6   :  { %v1998_v4 = vadd.f32 %v1997_v38, %v1996_v46  ;;  %2119 = vmatprep.mubr.f32.mxu0 %v3171_v27  ;;  %2196 = vmatprep.mubr.f32.mxu1 %v3171_v27 }
 0x2c7   :  { %v1987_v6 = vadd.f32 %v1986_v34, %v1985_v45 }
 0x2c8   :  { %v2000_v58 = vadd.f32 %v1999_v37, %v1998_v4  ;;  %v1735_v4 = vstv %s1697_s1 }
 0x2c9   :  { %1988 = vadd.xlane.f32.xlu0 %v1987_v6 }
 0x2ca   :  { %2001 = vadd.xlane.f32.xlu1 %v2000_v58  ;;  %v1740_v58 = vstv %s6099_s5 }
 0x2db   :  { %2756 = vperm.xlu1 %3054, %v2748_v9  }
 0x2df   :  { %2834 = vperm.xlu1 %3054, %v2768_v13   ;;  %2751 = vperm.xlu0 %3049, %v2747_v44  }
 0x2e3   :  { %2829 = vperm.xlu0 %3049, %v2767_v32  }
 0x344   :  { %v1801_v60 = vpop.xlane.xlu1 %1800 }
 0x345   :  { %v1815_v26 = vmul.f32 0.001953125, %v1801_v60 }
 0x346   :  { %v1814_v23 = vpop.xlane.xlu0 %1813 }
 0x347   :  { %v1816_v25 = vmul.f32 0.001953125, %v1814_v23  ;;  %v1817_v18 = vmul.f32 %v1815_v26, %v1815_v26  ;;  %v1820_v19 = vsub.f32 %v5941_v1, %v1815_v26  ;;  %v1822_v28 = vsub.f32 %v5964_v22, %v1815_v26 }
 0x348   :  { %v1819_v59 = vsub.f32 %v5938_v10, %v1815_v26  ;;  %v1821_v10 = vsub.f32 %v5950_v36, %v1815_v26 }
 0x349   :  { %v1818_v49 = vsub.f32 %v1816_v25, %v1817_v18 }
 0x34a   :  { %v1720_v61 = vpop.xlane.xlu1 %1719 }
 0x34b   :  { %v1823_v53 = vadd.f32 1e-05, %v1818_v49  ;;  %v1707_v20 = vpop.xlane.xlu0 %1706  ;;  %v1722_v39 = vmul.f32 0.001953125, %v1720_v61 }
 0x34c   :  { %v6091_v29 = vmul.f32 0.001953125, %v1707_v20  ;;  %v1923_v20 = vstv %s6106_s2 }
 0x34d   :  { %3071 = vrsqrt.f32 %v1823_v53 }
 0x34e   :  { %v1723_v7 = vmul.f32 %v6091_v29, %v6091_v29  ;;  %v1725_v34 = vsub.f32 %v5944_v51, %v6091_v29  ;;  %v1727_v9 = vsub.f32 %v5953_v47, %v6091_v29  ;;  %v1726_v60 = vsub.f32 %v5947_v42, %v6091_v29  ;;  %v2928_v47 = vld [vmem:[%s6299_s11 + $0x10] sm:$0xff] }
 0x34f   :  { %v1728_v26 = vsub.f32 %v5973_v21, %v6091_v29 }
 0x350   :  { %v1724_v3 = vsub.f32 %v1722_v39, %v1723_v7  ;;  %v1895_v48 = vpop.xlane.xlu0 %1894  ;;  %v1928_v7 = vstv %s6111_s3 }
 0x351   :  { %v1908_v17 = vpop.xlane.xlu1 %1907  ;;  %v6095_v56 = vmul.f32 0.001953125, %v1895_v48 }
 0x352   :  { %v1729_v35 = vadd.f32 1e-05, %v1724_v3  ;;  %v1910_v5 = vmul.f32 0.001953125, %v1908_v17 }
 0x353   :  { %v1911_v24 = vmul.f32 %v6095_v56, %v6095_v56  ;;  %v1913_v21 = vsub.f32 %v6006_v63, %v6095_v56  ;;  %v1915_v3 = vsub.f32 %v6014_v14, %v6095_v56  ;;  %v1916_v63 = vsub.f32 %v6025_v55, %v6095_v56 }
 0x354   :  { %3073 = vrsqrt.f32 %v1729_v35 }
 0x355   :  { %v1912_v16 = vsub.f32 %v1910_v5, %v1911_v24  ;;  %v1914_v24 = vsub.f32 %v6010_v41, %v6095_v56 }
 0x356   :  { %v1989_v15 = vpop.xlane.xlu0 %1988 }
 0x357   :  { %v3072_v12 = vpop.eup %3071  ;;  %v1917_v8 = vadd.f32 1e-05, %v1912_v16  ;;  %v2002_v57 = vpop.xlane.xlu1 %2001  ;;  %v6104_v40 = vmul.f32 0.001953125, %v1989_v15  ;;  %v2929_v16 = vld [vmem:[%s6299_s11 + $0x18] sm:$0xff] }
 0x358   :  { %v1826_v43 = vmul.f32 %v3072_v12, %v1820_v19  ;;  %v1828_v62 = vmul.f32 %v3072_v12, %v1822_v28  ;;  %v1825_v31 = vmul.f32 %v3072_v12, %v1819_v59  ;;  %v2004_v2 = vmul.f32 0.001953125, %v2002_v57 }
 0x359   :  { %3075 = vrsqrt.f32 %v1917_v8  ;;  %v2005_v1 = vmul.f32 %v6104_v40, %v6104_v40  ;;  %v1827_v45 = vmul.f32 %v3072_v12, %v1821_v10  ;;  %v2009_v10 = vsub.f32 %v6052_v33, %v6104_v40 }
 0x35a   :  { %v1831_v22 = vmul.f32 %v1829_v11, %v1826_v43  ;;  %v1833_v46 = vmul.f32 %v1829_v11, %v1828_v62  ;;  %v1830_v38 = vmul.f32 %v1829_v11, %v1825_v31  ;;  %v2007_v62 = vsub.f32 %v6043_v50, %v6104_v40 }
 0x35b   :  { %v2006_v52 = vsub.f32 %v2004_v2, %v2005_v1  ;;  %v1832_v44 = vmul.f32 %v1829_v11, %v1827_v45  ;;  %v2008_v31 = vsub.f32 %v6046_v0, %v6104_v40  ;;  %v2010_v0 = vsub.f32 %v6055_v54, %v6104_v40 }
 0x35c   :  { %v1836_v37 = vadd.f32 %v1834_v30, %v1831_v22  ;;  %v1838_v6 = vadd.f32 %v1834_v30, %v1833_v46  ;;  %v1835_v36 = vadd.f32 %v1834_v30, %v1830_v38  ;;  %v2031_v22 = vld [vmem:[%s6299_s11] sm:$0xff]  ;;  %v2017_v45 = vstv %s6132_s30 }
 0x35d   :  { %v2011_v13 = vadd.f32 1e-05, %v2006_v52  ;;  %v1837_v53 = vadd.f32 %v1834_v30, %v1832_v44 }
 0x35e   :  { %v3074_v32 = vpop.eup %3073  ;;  %v1840_v23 = vmax.f32 %v1836_v37, 0.0  ;;  %v1842_v25 = vmax.f32 %v1838_v6, 0.0  ;;  %v1839_v49 = vmax.f32 %v1835_v36, 0.0 }
 0x35f   :  { %v1731_v51 = vmul.f32 %v3074_v32, %v1725_v34  ;;  %v1733_v18 = vmul.f32 %v3074_v32, %v1727_v9  ;;  %3077 = vrsqrt.f32 %v2011_v13  ;;  %v1732_v42 = vmul.f32 %v3074_v32, %v1726_v60 }
 0x360   :  { %2930 = vmatprep.subr.msk.mxu0 %vm540_vm5, %v1840_v23  ;;  %2934 = vmatprep.subr.msk.mxu1 %vm540_vm5, %v1842_v25  ;;  %v1734_v61 = vmul.f32 %v3074_v32, %v1728_v26  ;;  %v1841_v48 = vmax.f32 %v1837_v53, 0.0  ;;  %v2022_v13 = vstv %s6146_s17  ;;  %v2032_v32 = vld [vmem:[%s6299_s11 + $0x8] sm:$0xff]  ;;  %v2946_v53 = vld [vmem:[%s6299_s11 + $0x20] sm:$0xff] }
 0x361   :  { %2931 = vmatpush1.msk.msra.mxu0 %vm540_vm5, %v1839_v49  ;;  %v1736_v29 = vmul.f32 %v1735_v4, %v1731_v51  ;;  %v1738_v39 = vmul.f32 %v1735_v4, %v1733_v18  ;;  %v1737_v17 = vmul.f32 %v1735_v4, %v1732_v42 }
 0x362   :  { %2932 = vmatmul.mubr.msk.f32.vlgmr.msra.gmra.mrb[0].mxu0 %vm2036_vm4, %v2928_v47  ;;  %v1739_v35 = vmul.f32 %v1735_v4, %v1734_v61  ;;  %2935 = vmatpush1.msk.msra.mxu1 %vm540_vm5, %v1841_v48 }
 0x363   :  { %v3076_v5 = vpop.eup %3075  ;;  %2125 = vmatprep.mubr.f32.mxu0 %v3171_v27  ;;  %v1741_v15 = vadd.f32 %v1740_v58, %v1736_v29  ;;  %v1743_v14 = vadd.f32 %v1740_v58, %v1738_v39  ;;  %v1742_v59 = vadd.f32 %v1740_v58, %v1737_v17  ;;  %2936 = vmatmul.mubr.msk.f32.vlgmr.msra.gmra.mrb[0].mxu1 %vm2036_vm4, %v2928_v47  ;;  %v2957_v29 = vld [vmem:[%s6299_s11 + $0x38] sm:$0xff]  ;;  %v2752_v39 = vpop.permute.xlu0 %2751 }
 0x364   :  { %v1919_v19 = vmul.f32 %v3076_v5, %v1913_v21  ;;  %v1921_v28 = vmul.f32 %v3076_v5, %v1915_v3  ;;  %v1744_v12 = vadd.f32 %v1740_v58, %v1739_v35  ;;  %v1920_v56 = vmul.f32 %v3076_v5, %v1914_v24  ;;  %2202 = vmatprep.mubr.f32.mxu1 %v3171_v27  ;;  %v2956_v21 = vld [vmem:[%s6299_s11 + $0x30] sm:$0xff] }
 0x365   :  { %v1745_v41 = vmax.f32 %v1741_v15, 0.0  ;;  %v1747_v55 = vmax.f32 %v1743_v14, 0.0  ;;  %v1922_v8 = vmul.f32 %v3076_v5, %v1916_v63  ;;  %v1746_v57 = vmax.f32 %v1742_v59, 0.0 }
 0x366   :  { %2933 = vmatmul.mubr.msk.f32.gmra.mrb[2].mxu0 %vm2036_vm4, %v2929_v16  ;;  %v1748_v11 = vmax.f32 %v1744_v12, 0.0  ;;  %v1924_v43 = vmul.f32 %v1923_v20, %v1919_v19  ;;  %v1926_v30 = vmul.f32 %v1923_v20, %v1921_v28  ;;  %v1925_v2 = vmul.f32 %v1923_v20, %v1920_v56 }
 0x367   :  { %2291 = vmatprep.mubr.f32.mxu0 %v3171_v27  ;;  %v1927_v1 = vmul.f32 %v1923_v20, %v1922_v8  ;;  %2938 = vmatprep.subr.msk.mxu0 %vm540_vm5, %v1746_v57  ;;  %v2947_v20 = vld [vmem:[%s6299_s11 + $0x28] sm:$0xff] }
 0x368   :  { %2942 = vmatprep.subr.msk.mxu1 %vm540_vm5, %v1748_v11  ;;  %v1929_v50 = vadd.f32 %v1928_v7, %v1924_v43  ;;  %v1931_v46 = vadd.f32 %v1928_v7, %v1926_v30  ;;  %2937 = vmatmul.mubr.msk.f32.gmra.mrb[2].mxu1 %vm2036_vm4, %v2929_v16  ;;  %v1930_v33 = vadd.f32 %v1928_v7, %v1925_v2  ;;  %v2757_v16 = vpop.permute.xlu1 %2756 }
 0x369   :  { %v3078_v52 = vpop.eup %3077  ;;  %2939 = vmatpush1.msk.msra.mxu0 %vm540_vm5, %v1745_v41  ;;  %v1932_v38 = vadd.f32 %v1928_v7, %v1927_v1  ;;  %2943 = vmatpush1.msk.msra.mxu1 %vm540_vm5, %v1747_v55 }
 0x36a   :  { %v2013_v4 = vmul.f32 %v3078_v52, %v2007_v62  ;;  %v2015_v34 = vmul.f32 %v3078_v52, %v2009_v10  ;;  %2368 = vmatprep.mubr.f32.mxu1 %v3171_v27  ;;  %v1933_v37 = vmax.f32 %v1929_v50, 0.0  ;;  %v1935_v6 = vmax.f32 %v1931_v46, 0.0  ;;  %2940 = vmatmul.mubr.msk.f32.vlgmr.msra.gmra.mrb[0].mxu0 %vm2036_vm4, %v2031_v22 }
 0x36b   :  { %v1934_v58 = vmax.f32 %v1930_v33, 0.0  ;;  %v1936_v54 = vmax.f32 %v1932_v38, 0.0  ;;  %v2014_v40 = vmul.f32 %v3078_v52, %v2008_v31  ;;  %v2016_v9 = vmul.f32 %v3078_v52, %v2010_v0  ;;  %2297 = vmatprep.mubr.f32.mxu0 %v3171_v27 }
 0x36c   :  { %v2018_v36 = vmul.f32 %v2017_v45, %v2013_v4  ;;  %v2020_v44 = vmul.f32 %v2017_v45, %v2015_v34  ;;  %2944 = vmatmul.mubr.msk.f32.vlgmr.msra.gmra.mrb[0].mxu1 %vm2036_vm4, %v2031_v22  ;;  %v2769_v4 = vld [vmem:[%s6302_s14] sm:$0xff]  ;;  %v2770_v34 = vld [vmem:[%s6302_s14 + $0x8] sm:$0xff] }
 0x36d   :  { %2948 = vmatprep.subr.msk.mxu0 %vm540_vm5, %v1934_v58  ;;  %v2019_v60 = vmul.f32 %v2017_v45, %v2014_v40  ;;  %v2021_v26 = vmul.f32 %v2017_v45, %v2016_v9  ;;  %2952 = vmatprep.subr.msk.mxu1 %vm540_vm5, %v1936_v54 }
 0x36e   :  { %2949 = vmatpush1.msk.msra.mxu0 %vm540_vm5, %v1933_v37  ;;  %2953 = vmatpush1.msk.msra.mxu1 %vm540_vm5, %v1935_v6  ;;  %v2023_v51 = vadd.f32 %v2022_v13, %v2018_v36  ;;  %v2025_v18 = vadd.f32 %v2022_v13, %v2020_v44  ;;  %v2835_v37 = vpop.permute.xlu1 %2834  ;;  %v2830_v6 = vpop.permute.xlu0 %2829 }
 0x36f   :  { %2374 = vmatprep.mubr.f32.mxu1 %v3171_v27  ;;  %v2024_v23 = vadd.f32 %v2022_v13, %v2019_v60  ;;  %v2026_v25 = vadd.f32 %v2022_v13, %v2021_v26  ;;  %2941 = vmatmul.mubr.msk.f32.gmra.mrb[2].mxu0 %vm2036_vm4, %v2032_v32 }
 0x370   :  { %2945 = vmatmul.mubr.msk.f32.gmra.mrb[2].mxu1 %vm2036_vm4, %v2032_v32  ;;  %2466 = vmatprep.mubr.f32.mxu0 %v3171_v27  ;;  %v2027_v42 = vmax.f32 %v2023_v51, 0.0  ;;  %v2029_v61 = vmax.f32 %v2025_v18, 0.0 }
 0x371   :  { %v2028_v49 = vmax.f32 %v2024_v23, 0.0  ;;  %v2030_v47 = vmax.f32 %v2026_v25, 0.0  ;;  %2543 = vmatprep.mubr.f32.mxu1 %v3171_v27 }
 0x373   :  { %2958 = vmatprep.subr.msk.mxu0 %vm540_vm5, %v2028_v49  ;;  %2962 = vmatprep.subr.msk.mxu1 %vm540_vm5, %v2030_v47 }
 0x374   :  { %2950 = vmatmul.mubr.msk.f32.vlgmr.msra.gmra.mrb[0].mxu0 %vm2036_vm4, %v2946_v53  ;;  %2954 = vmatmul.mubr.msk.f32.vlgmr.msra.gmra.mrb[0].mxu1 %vm2036_vm4, %v2946_v53 }
 0x375   :  { %2959 = vmatpush1.msk.msra.mxu0 %vm540_vm5, %v2027_v42  ;;  %2963 = vmatpush1.msk.msra.mxu1 %vm540_vm5, %v2029_v61 }
 0x376   :  { %2472 = vmatprep.mubr.f32.mxu0 %v3171_v27  ;;  %2549 = vmatprep.mubr.f32.mxu1 %v3171_v27 }
 0x378   :  { %2951 = vmatmul.mubr.msk.f32.gmra.mrb[2].mxu0 %vm2036_vm4, %v2947_v20  ;;  %2955 = vmatmul.mubr.msk.f32.gmra.mrb[2].mxu1 %vm2036_vm4, %v2947_v20 }
 0x379   :  { %2649 = vmatprep.mubr.f32.mxu0 %v3171_v27  ;;  %2726 = vmatprep.mubr.f32.mxu1 %v3171_v27 }
 0x37c   :  { %2960 = vmatmul.mubr.msk.f32.vlgmr.msra.gmra.mrb[0].mxu0 %vm2036_vm4, %v2956_v21  ;;  %2964 = vmatmul.mubr.msk.f32.vlgmr.msra.gmra.mrb[0].mxu1 %vm2036_vm4, %v2956_v21 }
 0x37d   :  { %2655 = vmatprep.mubr.f32.mxu0 %v3171_v27  ;;  %2732 = vmatprep.mubr.f32.mxu1 %v3171_v27 }
 0x380   :  { %2961 = vmatmul.mubr.msk.f32.gmra.mrb[2].mxu0 %vm2036_vm4, %v2957_v29  ;;  %2965 = vmatmul.mubr.msk.f32.gmra.mrb[2].mxu1 %vm2036_vm4, %v2957_v29 }
 0x44f   :  { %v2651_v7 = vpop.f32.mrb[0].mxu0  ;;  %v2728_v48 = vpop.f32.mrb[0].mxu1 }
 0x450   :  { %v6216_v3 = vadd.f32 %v2752_v39, %v2651_v7  ;;  %v2653_v17 = vpop.f32.mrb[1].mxu0  ;;  %v2730_v5 = vpop.f32.mrb[1].mxu1  ;;  %v6222_v63 = vadd.f32 %v2752_v39, %v2728_v48 }
 0x451   :  { %v6218_v35 = vadd.f32 %v2752_v39, %v2653_v17  ;;  %v2762_v19 = vadd.f32 %v2752_v39, %v2730_v5 }
 0x452   :  { %v2781_v24 = vmul.f32 %v6216_v3, %v6216_v3  ;;  %v2783_v11 = vmul.f32 %v6222_v63, %v6222_v63 }
 0x453   :  { %v2771_v27 = vadd.f32 %v6218_v35, %v6216_v3  ;;  %v2782_v15 = vmul.f32 %v6218_v35, %v6218_v35  ;;  %v2657_v14 = vpop.f32.mrb[2].mxu0  ;;  %v2734_v59 = vpop.f32.mrb[2].mxu1  ;;  %v2784_v1 = vmul.f32 %v2762_v19, %v2762_v19 }
 0x454   :  { %v6228_v28 = vadd.f32 %v2757_v16, %v2657_v14  ;;  %v2659_v12 = vpop.f32.mrb[3].mxu0  ;;  %v6230_v55 = vadd.f32 %v2757_v16, %v2734_v59  ;;  %v2736_v8 = vpop.f32.mrb[3].mxu1 }
 0x455   :  { %v2789_v41 = vadd.f32 %v2782_v15, %v2781_v24  ;;  %v6232_v56 = vadd.f32 %v2757_v16, %v2659_v12  ;;  %v2772_v57 = vadd.f32 %v2771_v27, %v6222_v63  ;;  %v6243_v31 = vadd.f32 %v2757_v16, %v2736_v8 }
 0x456   :  { %v2785_v43 = vmul.f32 %v6228_v28, %v6228_v28  ;;  %v2787_v22 = vmul.f32 %v6230_v55, %v6230_v55 }
 0x457   :  { %v2776_v30 = vadd.f32 %v6232_v56, %v6228_v28  ;;  %v2786_v62 = vmul.f32 %v6232_v56, %v6232_v56  ;;  %v2773_v2 = vadd.f32 %v2772_v57, %v2762_v19  ;;  %v2790_v10 = vadd.f32 %v2789_v41, %v2783_v11 }
 0x458   :  { %v2788_v0 = vmul.f32 %v6243_v31, %v6243_v31 }
 0x459   :  { %v2794_v50 = vadd.f32 %v2786_v62, %v2785_v43  ;;  %2774 = vadd.xlane.f32.xlu1 %v2773_v2  ;;  %v2791_v46 = vadd.f32 %v2790_v10, %v2784_v1  ;;  %v2777_v52 = vadd.f32 %v2776_v30, %v6230_v55 }
 0x45b   :  { %v2795_v33 = vadd.f32 %v2794_v50, %v2787_v22  ;;  %2792 = vadd.xlane.f32.xlu0 %v2791_v46  ;;  %v2778_v45 = vadd.f32 %v2777_v52, %v6243_v31 }
 0x45d   :  { %v2796_v38 = vadd.f32 %v2795_v33, %v2788_v0 }
 0x45f   :  { %2797 = vadd.xlane.f32.xlu1 %v2796_v38  ;;  %2779 = vadd.xlane.f32.xlu0 %v2778_v45 }
 0x470   :  { %2847 = vperm.xlu1 %3054, %v2769_v4  }
 0x475   :  { %2852 = vperm.xlu0 %3049, %v2770_v34  }
 0x4e6   :  { %v2775_v58 = vpop.xlane.xlu1 %2774 }
 0x4e7   :  { %v2799_v54 = vmul.f32 0.001953125, %v2775_v58 }
 0x4e8   :  { %v2793_v9 = vpop.xlane.xlu0 %2792 }
 0x4e9   :  { %v2803_v40 = vmul.f32 %v2799_v54, %v2799_v54  ;;  %v2801_v13 = vmul.f32 0.001953125, %v2793_v9  ;;  %v2807_v49 = vsub.f32 %v6216_v3, %v2799_v54  ;;  %v2808_v47 = vsub.f32 %v6218_v35, %v2799_v54 }
 0x4ea   :  { %v2809_v53 = vsub.f32 %v6222_v63, %v2799_v54  ;;  %v2810_v42 = vsub.f32 %v2762_v19, %v2799_v54 }
 0x4eb   :  { %v2805_v36 = vsub.f32 %v2801_v13, %v2803_v40 }
 0x4ec   :  { %v2798_v44 = vpop.xlane.xlu1 %2797  ;;  %v2780_v32 = vpop.xlane.xlu0 %2779 }
 0x4ed   :  { %v2815_v60 = vadd.f32 1e-05, %v2805_v36  ;;  %v2800_v26 = vmul.f32 0.001953125, %v2780_v32  ;;  %v2802_v23 = vmul.f32 0.001953125, %v2798_v44 }
 0x4ef   :  { %3079 = vrsqrt.f32 %v2815_v60  ;;  %v2804_v25 = vmul.f32 %v2800_v26, %v2800_v26  ;;  %v2811_v35 = vsub.f32 %v6228_v28, %v2800_v26  ;;  %v2812_v63 = vsub.f32 %v6232_v56, %v2800_v26 }
 0x4f0   :  { %v2848_v24 = vpop.permute.xlu1 %2847  ;;  %v2813_v19 = vsub.f32 %v6230_v55, %v2800_v26  ;;  %v2814_v59 = vsub.f32 %v6243_v31, %v2800_v26 }
 0x4f1   :  { %v2806_v51 = vsub.f32 %v2802_v23, %v2804_v25 }
 0x4f3   :  { %v2816_v18 = vadd.f32 1e-05, %v2806_v51 }
 0x4f4   :  { %v2853_v2 = vpop.permute.xlu0 %2852 }
 0x4f5   :  { %3081 = vrsqrt.f32 %v2816_v18 }
 0x4f9   :  { %v3080_v61 = vpop.eup %3079 }
 0x4fa   :  { %v2819_v20 = vmul.f32 %v3080_v61, %v2807_v49  ;;  %v2820_v21 = vmul.f32 %v3080_v61, %v2808_v47  ;;  %v2821_v29 = vmul.f32 %v3080_v61, %v2809_v53  ;;  %v2822_v39 = vmul.f32 %v3080_v61, %v2810_v42 }
 0x4fc   :  { %v2837_v7 = vmul.f32 %v2830_v6, %v2819_v20  ;;  %v2838_v48 = vmul.f32 %v2830_v6, %v2820_v21  ;;  %v2839_v17 = vmul.f32 %v2830_v6, %v2821_v29  ;;  %v2840_v5 = vmul.f32 %v2830_v6, %v2822_v39 }
 0x4fe   :  { %v2855_v16 = vadd.f32 %v2848_v24, %v2837_v7  ;;  %v2856_v27 = vadd.f32 %v2848_v24, %v2838_v48  ;;  %v2857_v15 = vadd.f32 %v2848_v24, %v2839_v17  ;;  %v2858_v14 = vadd.f32 %v2848_v24, %v2840_v5 }
 0x4ff   :  { %v3082_v3 = vpop.eup %3081 }
 0x500   :  { %v2863_v12 = vmax.f32 %v2855_v16, 0.0  ;;  %v2864_v41 = vmax.f32 %v2856_v27, 0.0  ;;  %v2865_v8 = vmax.f32 %v2857_v15, 0.0  ;;  %v2866_v57 = vmax.f32 %v2858_v14, 0.0 }
 0x501   :  { %v2823_v11 = vmul.f32 %v3082_v3, %v2811_v35  ;;  %v2824_v43 = vmul.f32 %v3082_v3, %v2812_v63  ;;  %v2825_v30 = vmul.f32 %v3082_v3, %v2813_v19  ;;  %v2826_v62 = vmul.f32 %v3082_v3, %v2814_v59 }
 0x502   :  { %2871 = vst [vmem:[%s6303_s15] sm:$0xff] %v2863_v12  ;;  %2872 = vst [vmem:[%s6303_s15 + $0x8] sm:$0xff] %v2864_v41 }
 0x503   :  { %2873 = vst [vmem:[%s6303_s15 + $0x10] sm:$0xff] %v2865_v8  ;;  %2874 = vst [vmem:[%s6303_s15 + $0x18] sm:$0xff] %v2866_v57  ;;  %v2841_v28 = vmul.f32 %v2835_v37, %v2823_v11  ;;  %v2842_v55 = vmul.f32 %v2835_v37, %v2824_v43  ;;  %v2843_v56 = vmul.f32 %v2835_v37, %v2825_v30 }
 0x504   :  { %v2844_v31 = vmul.f32 %v2835_v37, %v2826_v62 }
 0x505   :  { %v2859_v1 = vadd.f32 %v2853_v2, %v2841_v28  ;;  %v2860_v10 = vadd.f32 %v2853_v2, %v2842_v55  ;;  %v2861_v22 = vadd.f32 %v2853_v2, %v2843_v56 }
 0x506   :  { %v2862_v50 = vadd.f32 %v2853_v2, %v2844_v31 }
 0x507   :  { %v2867_v46 = vmax.f32 %v2859_v1, 0.0  ;;  %v2868_v52 = vmax.f32 %v2860_v10, 0.0  ;;  %v2869_v0 = vmax.f32 %v2861_v22, 0.0 }
 0x508   :  { %v2870_v33 = vmax.f32 %v2862_v50, 0.0 }
 0x509   :  { %2875 = vst [vmem:[%s6303_s15 + $0x20] sm:$0xff] %v2867_v46  ;;  %2876 = vst [vmem:[%s6303_s15 + $0x28] sm:$0xff] %v2868_v52 }
 0x50a   :  { %2877 = vst [vmem:[%s6303_s15 + $0x30] sm:$0xff] %v2869_v0  ;;  %2878 = vst [vmem:[%s6303_s15 + $0x38] sm:$0xff] %v2870_v33 }
 0x50b   :  { %2883 = vsyncpa [#allocation3], 1 }
 0x50c   :  { %2884 = vsyncpa [#allocation5], 1 }
 0x50d   :  { %2885 = vsyncpa [#allocation8], 1 }

</bundles_post_ra>
